<compile_context>
chip_gen: v6e
topology: v6e:2x2x1
jax: 0.10.0
libtpu: 0.0.40
codegen_flags: <defaults>
</compile_context>

<pallas_src>
import functools

import jax
import jax.numpy as jnp
from jax.experimental import pallas as pl
from jax.experimental.pallas import tpu as pltpu


# ----------------------------------------------------------------------------
# Pallas kernels
# ----------------------------------------------------------------------------
def _conv_tap_kernel(x_ref, w_ref, b_ref, o_ref, *, taps, shift, rows, relu):
    # x_ref: (1, R_in, K) bf16 with R_in == rows + (taps-1)*shift
    # w_ref: (taps, K, Cout) bf16, b_ref: (1, Cout) f32, o_ref: (1, rows, Cout)
    acc = jnp.dot(x_ref[0, 0:rows, :], w_ref[0],
                  preferred_element_type=jnp.float32)
    for t in range(1, taps):  # in-kernel accumulation over the conv H-taps
        acc += jnp.dot(x_ref[0, t * shift:t * shift + rows, :], w_ref[t],
                       preferred_element_type=jnp.float32)
    acc = acc + b_ref[...]
    if relu:
        acc = jnp.maximum(acc, 0.0)
    o_ref[0] = acc.astype(o_ref.dtype)


def _conv_tap_upfold_kernel(x_ref, w_ref, b_ref, wu_ref, bu_ref, o_ref,
                            *, taps, shift, rows):
    # Last decoder conv (+ bias + ReLU) fused with the folded
    # ConvTranspose(64->64,2,2) o ConvTranspose(64->1,2,2) head.
    # wu_ref: (Cout, 128) bf16 (16 real cols, lane-padded), bu_ref: (1, 128).
    acc = jnp.dot(x_ref[0, 0:rows, :], w_ref[0],
                  preferred_element_type=jnp.float32)
    for t in range(1, taps):
        acc += jnp.dot(x_ref[0, t * shift:t * shift + rows, :], w_ref[t],
                       preferred_element_type=jnp.float32)
    h = jnp.maximum(acc + b_ref[...], 0.0).astype(jnp.bfloat16)
    out = jnp.dot(h, wu_ref[...], preferred_element_type=jnp.float32)
    o_ref[0] = (out + bu_ref[...]).astype(o_ref.dtype)


def _maxpool2x2_kernel(x_ref, o_ref):
    # x_ref: (TR, 2, Wo, 2*C)  (2 H-rows; the W pair folded into lanes)
    x = x_ref[...]
    c = o_ref.shape[-1]
    a = jnp.maximum(x[:, 0], x[:, 1])                    # reduce the H pair
    o_ref[...] = jnp.maximum(a[:, :, :c], a[:, :, c:])   # reduce the W pair


# ----------------------------------------------------------------------------
# Wrapper-side glue (layout only, no heavy compute)
# ----------------------------------------------------------------------------
def _wtap_slab(x_nhwc):
    # (N,H,W,Cin) -> padded, W-taps folded into lanes: (N, (H+2)*W, 3*Cin) bf16
    N, H, W, Cin = x_nhwc.shape
    x = x_nhwc.astype(jnp.bfloat16)
    xp = jnp.pad(x, ((0, 0), (1, 1), (1, 1), (0, 0)))
    xw = jnp.concatenate([xp[:, :, kx:kx + W, :] for kx in range(3)], axis=-1)
    return xw.reshape(N, (H + 2) * W, 3 * Cin)


def _conv_weights(w, b):
    # PyTorch (Cout, Cin, 3, 3) -> per-H-tap (3, 3*Cin, Cout) bf16, (1,Cout) f32
    Cout, Cin = w.shape[0], w.shape[1]
    w3 = jnp.transpose(w, (2, 3, 1, 0)).reshape(3, 3 * Cin, Cout)
    return w3.astype(jnp.bfloat16), b.astype(jnp.float32).reshape(1, Cout)


# ----------------------------------------------------------------------------
# pallas_call wrappers
# ----------------------------------------------------------------------------
def _conv3x3_relu(x_nhwc, w, b, *, out_dtype=jnp.bfloat16):
    N, H, W, Cin = x_nhwc.shape
    Cout = w.shape[0]
    x3 = _wtap_slab(x_nhwc)
    w3, b2 = _conv_weights(w, b)
    rows = H * W
    kernel = functools.partial(_conv_tap_kernel, taps=3, shift=W, rows=rows,
                               relu=True)
    out = pl.pallas_call(
        kernel,
        out_shape=jax.ShapeDtypeStruct((N, rows, Cout), out_dtype),
        grid_spec=pltpu.PrefetchScalarGridSpec(
            num_scalar_prefetch=0,
            grid=(N,),  # >=2 blocks; weights (constant index) stay resident
            in_specs=[
                pl.BlockSpec((1, x3.shape[1], x3.shape[2]), lambda n: (n, 0, 0)),
                pl.BlockSpec(w3.shape, lambda n: (0, 0, 0)),
                pl.BlockSpec(b2.shape, lambda n: (0, 0)),
            ],
            out_specs=pl.BlockSpec((1, rows, Cout), lambda n: (n, 0, 0)),
        ),
        compiler_params=pltpu.CompilerParams(
            dimension_semantics=("parallel",)),
    )(x3, w3, b2)
    return out.reshape(N, H, W, Cout)


def _conv3x3_relu_upfold(x_nhwc, wc, bc, w_up1, b_up1, w_up2, b_up2,
                         *, pad_lanes=128):
    # Fused: conv3x3(+ReLU) -> folded (ConvT 2x2 s2) o (ConvT 2x2 s2) head.
    # Returns (N, H*W, 16) f32, cols ordered (dy1, dx1, dy2, dx2).
    N, H, W, Cin = x_nhwc.shape
    Cout = wc.shape[0]
    x3 = _wtap_slab(x_nhwc)
    w3, b2 = _conv_weights(wc, bc)

    # Fold the two transposed convs (linear o linear, no nonlinearity between):
    #   wu[ci, dy1, dx1, dy2, dx2] = sum_cm w1[ci,cm,dy1,dx1] * w2[cm,0,dy2,dx2]
    #   bu[dy2, dx2]               = sum_cm b1[cm] * w2[cm,0,dy2,dx2] + b2
    wu = jnp.einsum("imab,mcd->iabcd",
                    w_up1.astype(jnp.float32),
                    w_up2[:, 0].astype(jnp.float32)).reshape(Cout, 16)
    bu_cd = jnp.einsum("m,mcd->cd",
                       b_up1.astype(jnp.float32),
                       w_up2[:, 0].astype(jnp.float32)) + b_up2[0]
    bu = jnp.tile(bu_cd.reshape(-1), 4)                  # (16,), (dy1,dx1) major
    n_out = 16
    wu2 = jnp.pad(wu, ((0, 0), (0, pad_lanes - n_out))).astype(jnp.bfloat16)
    bu2 = jnp.pad(bu, ((0, pad_lanes - n_out),)).astype(jnp.float32).reshape(1, -1)

    rows = H * W
    kernel = functools.partial(_conv_tap_upfold_kernel, taps=3, shift=W,
                               rows=rows)
    out = pl.pallas_call(
        kernel,
        out_shape=jax.ShapeDtypeStruct((N, rows, pad_lanes), jnp.float32),
        grid_spec=pltpu.PrefetchScalarGridSpec(
            num_scalar_prefetch=0,
            grid=(N,),
            in_specs=[
                pl.BlockSpec((1, x3.shape[1], x3.shape[2]), lambda n: (n, 0, 0)),
                pl.BlockSpec(w3.shape, lambda n: (0, 0, 0)),
                pl.BlockSpec(b2.shape, lambda n: (0, 0)),
                pl.BlockSpec(wu2.shape, lambda n: (0, 0)),
                pl.BlockSpec(bu2.shape, lambda n: (0, 0)),
            ],
            out_specs=pl.BlockSpec((1, rows, pad_lanes), lambda n: (n, 0, 0)),
        ),
        compiler_params=pltpu.CompilerParams(
            dimension_semantics=("parallel",)),
    )(x3, w3, b2, wu2, bu2)
    return out[..., :n_out]


def _maxpool_2x2(x_nhwc):
    N, H, W, C = x_nhwc.shape
    Ho, Wo = H // 2, W // 2
    # Free contiguous view: (N*Ho, 2, Wo, 2*C) -- no strided 4-tap stack in HBM.
    xr = x_nhwc.reshape(N * Ho, 2, Wo, 2 * C)
    R = N * Ho
    TR = R // 2 if R % 2 == 0 else R  # keep >=2 row blocks when possible
    out = pl.pallas_call(
        _maxpool2x2_kernel,
        out_shape=jax.ShapeDtypeStruct((R, Wo, C), x_nhwc.dtype),
        grid_spec=pltpu.PrefetchScalarGridSpec(
            num_scalar_prefetch=0,
            grid=(R // TR,),
            in_specs=[pl.BlockSpec((TR, 2, Wo, 2 * C),
                                   lambda i: (i, 0, 0, 0))],
            out_specs=pl.BlockSpec((TR, Wo, C), lambda i: (i, 0, 0)),
        ),
        compiler_params=pltpu.CompilerParams(
            dimension_semantics=("parallel",)),
    )(xr)
    return out.reshape(N, Ho, Wo, C)


# ----------------------------------------------------------------------------
# Parameters (deterministic synthetic init, PyTorch-like uniform bounds)
# ----------------------------------------------------------------------------
def init_unet_params(key):
    keys = jax.random.split(key, 8)

    def conv_init(k, cout, cin, ksz):
        kw, kb = jax.random.split(k)
        bound = 1.0 / float((cin * ksz * ksz) ** 0.5)
        w = jax.random.uniform(kw, (cout, cin, ksz, ksz), jnp.float32, -bound, bound)
        b = jax.random.uniform(kb, (cout,), jnp.float32, -bound, bound)
        return w, b

    def deconv_init(k, cin, cout, ksz):
        kw, kb = jax.random.split(k)
        bound = 1.0 / float((cin * ksz * ksz) ** 0.5)
        w = jax.random.uniform(kw, (cin, cout, ksz, ksz), jnp.float32, -bound, bound)
        b = jax.random.uniform(kb, (cout,), jnp.float32, -bound, bound)
        return w, b

    return {
        "enc1": conv_init(keys[0], 64, 3, 3),
        "enc2": conv_init(keys[1], 64, 64, 3),
        "mid1": conv_init(keys[2], 128, 64, 3),
        "mid2": conv_init(keys[3], 128, 128, 3),
        "dec1": conv_init(keys[4], 64, 128, 3),
        "dec2": conv_init(keys[5], 64, 64, 3),
        "up1": deconv_init(keys[6], 64, 64, 2),
        "up2": deconv_init(keys[7], 64, 1, 2),
    }


# ----------------------------------------------------------------------------
# Forward pass (matches the PyTorch UNet.forward semantics)
# ----------------------------------------------------------------------------
def unet_forward(params, x_nchw):
    x = jnp.transpose(x_nchw, (0, 2, 3, 1))  # NCHW -> NHWC

    # encoder
    x = _conv3x3_relu(x, *params["enc1"])
    x = _conv3x3_relu(x, *params["enc2"])
    x = _maxpool_2x2(x)

    # middle
    x = _conv3x3_relu(x, *params["mid1"])
    x = _conv3x3_relu(x, *params["mid2"])
    x = _maxpool_2x2(x)

    # decoder: dec1 conv, then dec2 conv fused with the folded ConvT-ConvT head
    x = _conv3x3_relu(x, *params["dec1"])
    N, H1, W1, _ = x.shape
    w_up1, b_up1 = params["up1"]
    w_up2, b_up2 = params["up2"]
    y = _conv3x3_relu_upfold(x, *params["dec2"], w_up1, b_up1, w_up2, b_up2)

    # Assemble the final NCHW image with a single tiny transpose:
    # value (n, h1, w1, dy1, dx1, dy2, dx2) -> (n, 0, 4h1+2dy1+dy2, 4w1+2dx1+dx2)
    y = y.reshape(N, H1, W1, 2, 2, 2, 2)
    y = jnp.transpose(y, (0, 1, 3, 5, 2, 4, 6)).reshape(N, 1, 4 * H1, 4 * W1)
    return y


if __name__ == "__main__":
    key = jax.random.PRNGKey(0)
    kx, kp = jax.random.split(key)
    x = jax.random.normal(kx, (2, 3, 16, 16), dtype=jnp.float32)  # NCHW
    params = init_unet_params(kp)

    fwd = jax.jit(unet_forward)
    out = fwd(params, x)
    jax.block_until_ready(out)

    assert out.shape == (2, 1, 16, 16), out.shape
    assert out.dtype == jnp.float32
    print("KERNEL_OK")
</pallas_src>

<mosaic_0001>
module attributes {stable_mosaic.version = 11 : i64} {
  func.func @_conv_tap_kernel(%arg0: i32, %arg1: memref<1x288x9xbf16, #tpu.memory_space<vmem>>, %arg2: memref<3x9x64xbf16, #tpu.memory_space<vmem>>, %arg3: memref<1x64xf32, #tpu.memory_space<vmem>>, %arg4: memref<1x256x64xbf16, #tpu.memory_space<vmem>>) attributes {dimension_semantics = [#tpu.dimension_semantics<parallel>], iteration_bounds = array<i64: 2>, scalar_prefetch = 0 : i64, scratch_operands = 0 : i64, tpu.core_type = #tpu.core_type<tc>, window_params = [{transform_indices = @transform_0, window_bounds = array<i64: 1, 288, 9>}, {pipeline_mode = #tpu.pipeline_mode<synchronous>, transform_indices = @transform_1, window_bounds = array<i64: 3, 9, 64>}, {pipeline_mode = #tpu.pipeline_mode<synchronous>, transform_indices = @transform_2, window_bounds = array<i64: 1, 64>}, {transform_indices = @transform_3, window_bounds = array<i64: 1, 256, 64>}]} {
    %c0 = arith.constant 0 : index
    %c0_0 = arith.constant 0 : index
    %c0_1 = arith.constant 0 : index
    %0 = vector.load %arg1[%c0, %c0_0, %c0_1] : memref<1x288x9xbf16, #tpu.memory_space<vmem>>, vector<1x256x9xbf16>
    %1 = vector.shape_cast %0 : vector<1x256x9xbf16> to vector<256x9xbf16>
    %c0_2 = arith.constant 0 : index
    %c0_3 = arith.constant 0 : index
    %c0_4 = arith.constant 0 : index
    %2 = vector.load %arg2[%c0_2, %c0_3, %c0_4] : memref<3x9x64xbf16, #tpu.memory_space<vmem>>, vector<1x9x64xbf16>
    %3 = vector.shape_cast %2 : vector<1x9x64xbf16> to vector<9x64xbf16>
    %cst = arith.constant dense<0.000000e+00> : vector<256x64xf32>
    %4 = tpu.matmul %1, %3, %cst {dimension_numbers = #tpu.dot_dimension_numbers<[1], [0], [0], [1], [0, 0, 1, 1], [], []>} : vector<256x9xbf16>, vector<9x64xbf16>, vector<256x64xf32> -> vector<256x64xf32>
    %c0_5 = arith.constant 0 : index
    %c16 = arith.constant 16 : index
    %c0_6 = arith.constant 0 : index
    %5 = vector.load %arg1[%c0_5, %c16, %c0_6] : memref<1x288x9xbf16, #tpu.memory_space<vmem>>, vector<1x256x9xbf16>
    %6 = vector.shape_cast %5 : vector<1x256x9xbf16> to vector<256x9xbf16>
    %c1 = arith.constant 1 : index
    %c0_7 = arith.constant 0 : index
    %c0_8 = arith.constant 0 : index
    %7 = vector.load %arg2[%c1, %c0_7, %c0_8] : memref<3x9x64xbf16, #tpu.memory_space<vmem>>, vector<1x9x64xbf16>
    %8 = vector.shape_cast %7 : vector<1x9x64xbf16> to vector<9x64xbf16>
    %cst_9 = arith.constant dense<0.000000e+00> : vector<256x64xf32>
    %9 = tpu.matmul %6, %8, %cst_9 {dimension_numbers = #tpu.dot_dimension_numbers<[1], [0], [0], [1], [0, 0, 1, 1], [], []>} : vector<256x9xbf16>, vector<9x64xbf16>, vector<256x64xf32> -> vector<256x64xf32>
    %10 = arith.addf %4, %9 : vector<256x64xf32>
    %c0_10 = arith.constant 0 : index
    %c32 = arith.constant 32 : index
    %c0_11 = arith.constant 0 : index
    %11 = vector.load %arg1[%c0_10, %c32, %c0_11] : memref<1x288x9xbf16, #tpu.memory_space<vmem>>, vector<1x256x9xbf16>
    %12 = vector.shape_cast %11 : vector<1x256x9xbf16> to vector<256x9xbf16>
    %c2 = arith.constant 2 : index
    %c0_12 = arith.constant 0 : index
    %c0_13 = arith.constant 0 : index
    %13 = vector.load %arg2[%c2, %c0_12, %c0_13] : memref<3x9x64xbf16, #tpu.memory_space<vmem>>, vector<1x9x64xbf16>
    %14 = vector.shape_cast %13 : vector<1x9x64xbf16> to vector<9x64xbf16>
    %cst_14 = arith.constant dense<0.000000e+00> : vector<256x64xf32>
    %15 = tpu.matmul %12, %14, %cst_14 {dimension_numbers = #tpu.dot_dimension_numbers<[1], [0], [0], [1], [0, 0, 1, 1], [], []>} : vector<256x9xbf16>, vector<9x64xbf16>, vector<256x64xf32> -> vector<256x64xf32>
    %16 = arith.addf %10, %15 : vector<256x64xf32>
    %c0_15 = arith.constant 0 : index
    %c0_16 = arith.constant 0 : index
    %17 = vector.load %arg3[%c0_15, %c0_16] : memref<1x64xf32, #tpu.memory_space<vmem>>, vector<1x64xf32>
    %18 = vector.broadcast %17 : vector<1x64xf32> to vector<256x64xf32>
    %19 = arith.addf %16, %18 : vector<256x64xf32>
    %cst_17 = arith.constant 0.000000e+00 : f32
    %20 = vector.broadcast %cst_17 : f32 to vector<256x64xf32>
    %21 = arith.maximumf %19, %20 : vector<256x64xf32>
    %22 = arith.truncf %21 : vector<256x64xf32> to vector<256x64xbf16>
    %c0_18 = arith.constant 0 : index
    %c0_19 = arith.constant 0 : index
    %c0_20 = arith.constant 0 : index
    %23 = vector.load %arg4[%c0_18, %c0_19, %c0_20] : memref<1x256x64xbf16, #tpu.memory_space<vmem>>, vector<1x256x64xbf16>
    %24 = vector.shape_cast %23 : vector<1x256x64xbf16> to vector<256x64xbf16>
    %25 = vector.shape_cast %22 : vector<256x64xbf16> to vector<1x256x64xbf16>
    tpu.vector_store %arg4[%c0_18, %c0_19, %c0_20], %25 {strides = array<i32>} : memref<1x256x64xbf16, #tpu.memory_space<vmem>>, vector<1x256x64xbf16>,
    return
  }
  func.func @transform_0(%arg0: i32) -> (i32, i32, i32) {
    %c0_i32 = arith.constant 0 : i32
    %c0_i32_0 = arith.constant 0 : i32
    %c0_i32_1 = arith.constant 0 : i32
    return %arg0, %c0_i32, %c0_i32_0 : i32, i32, i32
  }
  func.func @transform_1(%arg0: i32) -> (i32, i32, i32) {
    %c0_i32 = arith.constant 0 : i32
    %c0_i32_0 = arith.constant 0 : i32
    %c0_i32_1 = arith.constant 0 : i32
    %c0_i32_2 = arith.constant 0 : i32
    return %c0_i32, %c0_i32_0, %c0_i32_1 : i32, i32, i32
  }
  func.func @transform_2(%arg0: i32) -> (i32, i32) {
    %c0_i32 = arith.constant 0 : i32
    %c0_i32_0 = arith.constant 0 : i32
    %c0_i32_1 = arith.constant 0 : i32
    return %c0_i32, %c0_i32_0 : i32, i32
  }
  func.func @transform_3(%arg0: i32) -> (i32, i32, i32) {
    %c0_i32 = arith.constant 0 : i32
    %c0_i32_0 = arith.constant 0 : i32
    %c0_i32_1 = arith.constant 0 : i32
    return %arg0, %c0_i32, %c0_i32_0 : i32, i32, i32
  }
}

module attributes {stable_mosaic.version = 11 : i64} {
  func.func @_conv_tap_kernel(%arg0: i32, %arg1: memref<1x288x192xbf16, #tpu.memory_space<vmem>>, %arg2: memref<3x192x64xbf16, #tpu.memory_space<vmem>>, %arg3: memref<1x64xf32, #tpu.memory_space<vmem>>, %arg4: memref<1x256x64xbf16, #tpu.memory_space<vmem>>) attributes {dimension_semantics = [#tpu.dimension_semantics<parallel>], iteration_bounds = array<i64: 2>, scalar_prefetch = 0 : i64, scratch_operands = 0 : i64, tpu.core_type = #tpu.core_type<tc>, window_params = [{transform_indices = @transform_0, window_bounds = array<i64: 1, 288, 192>}, {pipeline_mode = #tpu.pipeline_mode<synchronous>, transform_indices = @transform_1, window_bounds = array<i64: 3, 192, 64>}, {pipeline_mode = #tpu.pipeline_mode<synchronous>, transform_indices = @transform_2, window_bounds = array<i64: 1, 64>}, {transform_indices = @transform_3, window_bounds = array<i64: 1, 256, 64>}]} {
    %c0 = arith.constant 0 : index
    %c0_0 = arith.constant 0 : index
    %c0_1 = arith.constant 0 : index
    %0 = vector.load %arg1[%c0, %c0_0, %c0_1] : memref<1x288x192xbf16, #tpu.memory_space<vmem>>, vector<1x256x192xbf16>
    %1 = vector.shape_cast %0 : vector<1x256x192xbf16> to vector<256x192xbf16>
    %c0_2 = arith.constant 0 : index
    %c0_3 = arith.constant 0 : index
    %c0_4 = arith.constant 0 : index
    %2 = vector.load %arg2[%c0_2, %c0_3, %c0_4] : memref<3x192x64xbf16, #tpu.memory_space<vmem>>, vector<1x192x64xbf16>
    %3 = vector.shape_cast %2 : vector<1x192x64xbf16> to vector<192x64xbf16>
    %cst = arith.constant dense<0.000000e+00> : vector<256x64xf32>
    %4 = tpu.matmul %1, %3, %cst {dimension_numbers = #tpu.dot_dimension_numbers<[1], [0], [0], [1], [0, 0, 1, 1], [], []>} : vector<256x192xbf16>, vector<192x64xbf16>, vector<256x64xf32> -> vector<256x64xf32>
    %c0_5 = arith.constant 0 : index
    %c16 = arith.constant 16 : index
    %c0_6 = arith.constant 0 : index
    %5 = vector.load %arg1[%c0_5, %c16, %c0_6] : memref<1x288x192xbf16, #tpu.memory_space<vmem>>, vector<1x256x192xbf16>
    %6 = vector.shape_cast %5 : vector<1x256x192xbf16> to vector<256x192xbf16>
    %c1 = arith.constant 1 : index
    %c0_7 = arith.constant 0 : index
    %c0_8 = arith.constant 0 : index
    %7 = vector.load %arg2[%c1, %c0_7, %c0_8] : memref<3x192x64xbf16, #tpu.memory_space<vmem>>, vector<1x192x64xbf16>
    %8 = vector.shape_cast %7 : vector<1x192x64xbf16> to vector<192x64xbf16>
    %cst_9 = arith.constant dense<0.000000e+00> : vector<256x64xf32>
    %9 = tpu.matmul %6, %8, %cst_9 {dimension_numbers = #tpu.dot_dimension_numbers<[1], [0], [0], [1], [0, 0, 1, 1], [], []>} : vector<256x192xbf16>, vector<192x64xbf16>, vector<256x64xf32> -> vector<256x64xf32>
    %10 = arith.addf %4, %9 : vector<256x64xf32>
    %c0_10 = arith.constant 0 : index
    %c32 = arith.constant 32 : index
    %c0_11 = arith.constant 0 : index
    %11 = vector.load %arg1[%c0_10, %c32, %c0_11] : memref<1x288x192xbf16, #tpu.memory_space<vmem>>, vector<1x256x192xbf16>
    %12 = vector.shape_cast %11 : vector<1x256x192xbf16> to vector<256x192xbf16>
    %c2 = arith.constant 2 : index
    %c0_12 = arith.constant 0 : index
    %c0_13 = arith.constant 0 : index
    %13 = vector.load %arg2[%c2, %c0_12, %c0_13] : memref<3x192x64xbf16, #tpu.memory_space<vmem>>, vector<1x192x64xbf16>
    %14 = vector.shape_cast %13 : vector<1x192x64xbf16> to vector<192x64xbf16>
    %cst_14 = arith.constant dense<0.000000e+00> : vector<256x64xf32>
    %15 = tpu.matmul %12, %14, %cst_14 {dimension_numbers = #tpu.dot_dimension_numbers<[1], [0], [0], [1], [0, 0, 1, 1], [], []>} : vector<256x192xbf16>, vector<192x64xbf16>, vector<256x64xf32> -> vector<256x64xf32>
    %16 = arith.addf %10, %15 : vector<256x64xf32>
    %c0_15 = arith.constant 0 : index
    %c0_16 = arith.constant 0 : index
    %17 = vector.load %arg3[%c0_15, %c0_16] : memref<1x64xf32, #tpu.memory_space<vmem>>, vector<1x64xf32>
    %18 = vector.broadcast %17 : vector<1x64xf32> to vector<256x64xf32>
    %19 = arith.addf %16, %18 : vector<256x64xf32>
    %cst_17 = arith.constant 0.000000e+00 : f32
    %20 = vector.broadcast %cst_17 : f32 to vector<256x64xf32>
    %21 = arith.maximumf %19, %20 : vector<256x64xf32>
    %22 = arith.truncf %21 : vector<256x64xf32> to vector<256x64xbf16>
    %c0_18 = arith.constant 0 : index
    %c0_19 = arith.constant 0 : index
    %c0_20 = arith.constant 0 : index
    %23 = vector.load %arg4[%c0_18, %c0_19, %c0_20] : memref<1x256x64xbf16, #tpu.memory_space<vmem>>, vector<1x256x64xbf16>
    %24 = vector.shape_cast %23 : vector<1x256x64xbf16> to vector<256x64xbf16>
    %25 = vector.shape_cast %22 : vector<256x64xbf16> to vector<1x256x64xbf16>
    tpu.vector_store %arg4[%c0_18, %c0_19, %c0_20], %25 {strides = array<i32>} : memref<1x256x64xbf16, #tpu.memory_space<vmem>>, vector<1x256x64xbf16>,
    return
  }
  func.func @transform_0(%arg0: i32) -> (i32, i32, i32) {
    %c0_i32 = arith.constant 0 : i32
    %c0_i32_0 = arith.constant 0 : i32
    %c0_i32_1 = arith.constant 0 : i32
    return %arg0, %c0_i32, %c0_i32_0 : i32, i32, i32
  }
  func.func @transform_1(%arg0: i32) -> (i32, i32, i32) {
    %c0_i32 = arith.constant 0 : i32
    %c0_i32_0 = arith.constant 0 : i32
    %c0_i32_1 = arith.constant 0 : i32
    %c0_i32_2 = arith.constant 0 : i32
    return %c0_i32, %c0_i32_0, %c0_i32_1 : i32, i32, i32
  }
  func.func @transform_2(%arg0: i32) -> (i32, i32) {
    %c0_i32 = arith.constant 0 : i32
    %c0_i32_0 = arith.constant 0 : i32
    %c0_i32_1 = arith.constant 0 : i32
    return %c0_i32, %c0_i32_0 : i32, i32
  }
  func.func @transform_3(%arg0: i32) -> (i32, i32, i32) {
    %c0_i32 = arith.constant 0 : i32
    %c0_i32_0 = arith.constant 0 : i32
    %c0_i32_1 = arith.constant 0 : i32
    return %arg0, %c0_i32, %c0_i32_0 : i32, i32, i32
  }
}

module attributes {stable_mosaic.version = 11 : i64} {
  func.func @_maxpool2x2_kernel(%arg0: i32, %arg1: memref<8x2x8x128xbf16, #tpu.memory_space<vmem>>, %arg2: memref<8x8x64xbf16, #tpu.memory_space<vmem>>) attributes {dimension_semantics = [#tpu.dimension_semantics<parallel>], iteration_bounds = array<i64: 2>, scalar_prefetch = 0 : i64, scratch_operands = 0 : i64, tpu.core_type = #tpu.core_type<tc>, window_params = [{transform_indices = @transform_0, window_bounds = array<i64: 8, 2, 8, 128>}, {transform_indices = @transform_1, window_bounds = array<i64: 8, 8, 64>}]} {
    %c0 = arith.constant 0 : index
    %c0_0 = arith.constant 0 : index
    %c0_1 = arith.constant 0 : index
    %c0_2 = arith.constant 0 : index
    %0 = vector.load %arg1[%c0, %c0_0, %c0_1, %c0_2] : memref<8x2x8x128xbf16, #tpu.memory_space<vmem>>, vector<8x2x8x128xbf16>
    %1 = vector.extract_strided_slice %0 {offsets = [0, 0, 0, 0], sizes = [8, 1, 8, 128], strides = [1, 1, 1, 1]} : vector<8x2x8x128xbf16> to vector<8x1x8x128xbf16>
    %2 = vector.shape_cast %1 : vector<8x1x8x128xbf16> to vector<8x8x128xbf16>
    %3 = vector.extract_strided_slice %0 {offsets = [0, 1, 0, 0], sizes = [8, 1, 8, 128], strides = [1, 1, 1, 1]} : vector<8x2x8x128xbf16> to vector<8x1x8x128xbf16>
    %4 = vector.shape_cast %3 : vector<8x1x8x128xbf16> to vector<8x8x128xbf16>
    %5 = arith.maximumf %2, %4 : vector<8x8x128xbf16>
    %6 = vector.extract_strided_slice %5 {offsets = [0, 0, 0], sizes = [8, 8, 64], strides = [1, 1, 1]} : vector<8x8x128xbf16> to vector<8x8x64xbf16>
    %7 = vector.extract_strided_slice %5 {offsets = [0, 0, 64], sizes = [8, 8, 64], strides = [1, 1, 1]} : vector<8x8x128xbf16> to vector<8x8x64xbf16>
    %8 = arith.maximumf %6, %7 : vector<8x8x64xbf16>
    %c0_3 = arith.constant 0 : index
    %c0_4 = arith.constant 0 : index
    %c0_5 = arith.constant 0 : index
    %9 = vector.load %arg2[%c0_3, %c0_4, %c0_5] : memref<8x8x64xbf16, #tpu.memory_space<vmem>>, vector<8x8x64xbf16>
    tpu.vector_store %arg2[%c0_3, %c0_4, %c0_5], %8 {strides = array<i32>} : memref<8x8x64xbf16, #tpu.memory_space<vmem>>, vector<8x8x64xbf16>,
    return
  }
  func.func @transform_0(%arg0: i32) -> (i32, i32, i32, i32) {
    %c0_i32 = arith.constant 0 : i32
    %c0_i32_0 = arith.constant 0 : i32
    %c0_i32_1 = arith.constant 0 : i32
    %c0_i32_2 = arith.constant 0 : i32
    return %arg0, %c0_i32, %c0_i32_0, %c0_i32_1 : i32, i32, i32, i32
  }
  func.func @transform_1(%arg0: i32) -> (i32, i32, i32) {
    %c0_i32 = arith.constant 0 : i32
    %c0_i32_0 = arith.constant 0 : i32
    %c0_i32_1 = arith.constant 0 : i32
    return %arg0, %c0_i32, %c0_i32_0 : i32, i32, i32
  }
}

module attributes {stable_mosaic.version = 11 : i64} {
  func.func @_conv_tap_kernel(%arg0: i32, %arg1: memref<1x80x192xbf16, #tpu.memory_space<vmem>>, %arg2: memref<3x192x128xbf16, #tpu.memory_space<vmem>>, %arg3: memref<1x128xf32, #tpu.memory_space<vmem>>, %arg4: memref<1x64x128xbf16, #tpu.memory_space<vmem>>) attributes {dimension_semantics = [#tpu.dimension_semantics<parallel>], iteration_bounds = array<i64: 2>, scalar_prefetch = 0 : i64, scratch_operands = 0 : i64, tpu.core_type = #tpu.core_type<tc>, window_params = [{transform_indices = @transform_0, window_bounds = array<i64: 1, 80, 192>}, {pipeline_mode = #tpu.pipeline_mode<synchronous>, transform_indices = @transform_1, window_bounds = array<i64: 3, 192, 128>}, {pipeline_mode = #tpu.pipeline_mode<synchronous>, transform_indices = @transform_2, window_bounds = array<i64: 1, 128>}, {transform_indices = @transform_3, window_bounds = array<i64: 1, 64, 128>}]} {
    %c0 = arith.constant 0 : index
    %c0_0 = arith.constant 0 : index
    %c0_1 = arith.constant 0 : index
    %0 = vector.load %arg1[%c0, %c0_0, %c0_1] : memref<1x80x192xbf16, #tpu.memory_space<vmem>>, vector<1x64x192xbf16>
    %1 = vector.shape_cast %0 : vector<1x64x192xbf16> to vector<64x192xbf16>
    %c0_2 = arith.constant 0 : index
    %c0_3 = arith.constant 0 : index
    %c0_4 = arith.constant 0 : index
    %2 = vector.load %arg2[%c0_2, %c0_3, %c0_4] : memref<3x192x128xbf16, #tpu.memory_space<vmem>>, vector<1x192x128xbf16>
    %3 = vector.shape_cast %2 : vector<1x192x128xbf16> to vector<192x128xbf16>
    %cst = arith.constant dense<0.000000e+00> : vector<64x128xf32>
    %4 = tpu.matmul %1, %3, %cst {dimension_numbers = #tpu.dot_dimension_numbers<[1], [0], [0], [1], [0, 0, 1, 1], [], []>} : vector<64x192xbf16>, vector<192x128xbf16>, vector<64x128xf32> -> vector<64x128xf32>
    %c0_5 = arith.constant 0 : index
    %c8 = arith.constant 8 : index
    %c0_6 = arith.constant 0 : index
    %5 = vector.load %arg1[%c0_5, %c8, %c0_6] : memref<1x80x192xbf16, #tpu.memory_space<vmem>>, vector<1x64x192xbf16>
    %6 = vector.shape_cast %5 : vector<1x64x192xbf16> to vector<64x192xbf16>
    %c1 = arith.constant 1 : index
    %c0_7 = arith.constant 0 : index
    %c0_8 = arith.constant 0 : index
    %7 = vector.load %arg2[%c1, %c0_7, %c0_8] : memref<3x192x128xbf16, #tpu.memory_space<vmem>>, vector<1x192x128xbf16>
    %8 = vector.shape_cast %7 : vector<1x192x128xbf16> to vector<192x128xbf16>
    %cst_9 = arith.constant dense<0.000000e+00> : vector<64x128xf32>
    %9 = tpu.matmul %6, %8, %cst_9 {dimension_numbers = #tpu.dot_dimension_numbers<[1], [0], [0], [1], [0, 0, 1, 1], [], []>} : vector<64x192xbf16>, vector<192x128xbf16>, vector<64x128xf32> -> vector<64x128xf32>
    %10 = arith.addf %4, %9 : vector<64x128xf32>
    %c0_10 = arith.constant 0 : index
    %c16 = arith.constant 16 : index
    %c0_11 = arith.constant 0 : index
    %11 = vector.load %arg1[%c0_10, %c16, %c0_11] : memref<1x80x192xbf16, #tpu.memory_space<vmem>>, vector<1x64x192xbf16>
    %12 = vector.shape_cast %11 : vector<1x64x192xbf16> to vector<64x192xbf16>
    %c2 = arith.constant 2 : index
    %c0_12 = arith.constant 0 : index
    %c0_13 = arith.constant 0 : index
    %13 = vector.load %arg2[%c2, %c0_12, %c0_13] : memref<3x192x128xbf16, #tpu.memory_space<vmem>>, vector<1x192x128xbf16>
    %14 = vector.shape_cast %13 : vector<1x192x128xbf16> to vector<192x128xbf16>
    %cst_14 = arith.constant dense<0.000000e+00> : vector<64x128xf32>
    %15 = tpu.matmul %12, %14, %cst_14 {dimension_numbers = #tpu.dot_dimension_numbers<[1], [0], [0], [1], [0, 0, 1, 1], [], []>} : vector<64x192xbf16>, vector<192x128xbf16>, vector<64x128xf32> -> vector<64x128xf32>
    %16 = arith.addf %10, %15 : vector<64x128xf32>
    %c0_15 = arith.constant 0 : index
    %c0_16 = arith.constant 0 : index
    %17 = vector.load %arg3[%c0_15, %c0_16] : memref<1x128xf32, #tpu.memory_space<vmem>>, vector<1x128xf32>
    %18 = vector.broadcast %17 : vector<1x128xf32> to vector<64x128xf32>
    %19 = arith.addf %16, %18 : vector<64x128xf32>
    %cst_17 = arith.constant 0.000000e+00 : f32
    %20 = vector.broadcast %cst_17 : f32 to vector<64x128xf32>
    %21 = arith.maximumf %19, %20 : vector<64x128xf32>
    %22 = arith.truncf %21 : vector<64x128xf32> to vector<64x128xbf16>
    %c0_18 = arith.constant 0 : index
    %c0_19 = arith.constant 0 : index
    %c0_20 = arith.constant 0 : index
    %23 = vector.load %arg4[%c0_18, %c0_19, %c0_20] : memref<1x64x128xbf16, #tpu.memory_space<vmem>>, vector<1x64x128xbf16>
    %24 = vector.shape_cast %23 : vector<1x64x128xbf16> to vector<64x128xbf16>
    %25 = vector.shape_cast %22 : vector<64x128xbf16> to vector<1x64x128xbf16>
    tpu.vector_store %arg4[%c0_18, %c0_19, %c0_20], %25 {strides = array<i32>} : memref<1x64x128xbf16, #tpu.memory_space<vmem>>, vector<1x64x128xbf16>,
    return
  }
  func.func @transform_0(%arg0: i32) -> (i32, i32, i32) {
    %c0_i32 = arith.constant 0 : i32
    %c0_i32_0 = arith.constant 0 : i32
    %c0_i32_1 = arith.constant 0 : i32
    return %arg0, %c0_i32, %c0_i32_0 : i32, i32, i32
  }
  func.func @transform_1(%arg0: i32) -> (i32, i32, i32) {
    %c0_i32 = arith.constant 0 : i32
    %c0_i32_0 = arith.constant 0 : i32
    %c0_i32_1 = arith.constant 0 : i32
    %c0_i32_2 = arith.constant 0 : i32
    return %c0_i32, %c0_i32_0, %c0_i32_1 : i32, i32, i32
  }
  func.func @transform_2(%arg0: i32) -> (i32, i32) {
    %c0_i32 = arith.constant 0 : i32
    %c0_i32_0 = arith.constant 0 : i32
    %c0_i32_1 = arith.constant 0 : i32
    return %c0_i32, %c0_i32_0 : i32, i32
  }
  func.func @transform_3(%arg0: i32) -> (i32, i32, i32) {
    %c0_i32 = arith.constant 0 : i32
    %c0_i32_0 = arith.constant 0 : i32
    %c0_i32_1 = arith.constant 0 : i32
    return %arg0, %c0_i32, %c0_i32_0 : i32, i32, i32
  }
}

module attributes {stable_mosaic.version = 11 : i64} {
  func.func @_conv_tap_kernel(%arg0: i32, %arg1: memref<1x80x384xbf16, #tpu.memory_space<vmem>>, %arg2: memref<3x384x128xbf16, #tpu.memory_space<vmem>>, %arg3: memref<1x128xf32, #tpu.memory_space<vmem>>, %arg4: memref<1x64x128xbf16, #tpu.memory_space<vmem>>) attributes {dimension_semantics = [#tpu.dimension_semantics<parallel>], iteration_bounds = array<i64: 2>, scalar_prefetch = 0 : i64, scratch_operands = 0 : i64, tpu.core_type = #tpu.core_type<tc>, window_params = [{transform_indices = @transform_0, window_bounds = array<i64: 1, 80, 384>}, {pipeline_mode = #tpu.pipeline_mode<synchronous>, transform_indices = @transform_1, window_bounds = array<i64: 3, 384, 128>}, {pipeline_mode = #tpu.pipeline_mode<synchronous>, transform_indices = @transform_2, window_bounds = array<i64: 1, 128>}, {transform_indices = @transform_3, window_bounds = array<i64: 1, 64, 128>}]} {
    %c0 = arith.constant 0 : index
    %c0_0 = arith.constant 0 : index
    %c0_1 = arith.constant 0 : index
    %0 = vector.load %arg1[%c0, %c0_0, %c0_1] : memref<1x80x384xbf16, #tpu.memory_space<vmem>>, vector<1x64x384xbf16>
    %1 = vector.shape_cast %0 : vector<1x64x384xbf16> to vector<64x384xbf16>
    %c0_2 = arith.constant 0 : index
    %c0_3 = arith.constant 0 : index
    %c0_4 = arith.constant 0 : index
    %2 = vector.load %arg2[%c0_2, %c0_3, %c0_4] : memref<3x384x128xbf16, #tpu.memory_space<vmem>>, vector<1x384x128xbf16>
    %3 = vector.shape_cast %2 : vector<1x384x128xbf16> to vector<384x128xbf16>
    %cst = arith.constant dense<0.000000e+00> : vector<64x128xf32>
    %4 = tpu.matmul %1, %3, %cst {dimension_numbers = #tpu.dot_dimension_numbers<[1], [0], [0], [1], [0, 0, 1, 1], [], []>} : vector<64x384xbf16>, vector<384x128xbf16>, vector<64x128xf32> -> vector<64x128xf32>
    %c0_5 = arith.constant 0 : index
    %c8 = arith.constant 8 : index
    %c0_6 = arith.constant 0 : index
    %5 = vector.load %arg1[%c0_5, %c8, %c0_6] : memref<1x80x384xbf16, #tpu.memory_space<vmem>>, vector<1x64x384xbf16>
    %6 = vector.shape_cast %5 : vector<1x64x384xbf16> to vector<64x384xbf16>
    %c1 = arith.constant 1 : index
    %c0_7 = arith.constant 0 : index
    %c0_8 = arith.constant 0 : index
    %7 = vector.load %arg2[%c1, %c0_7, %c0_8] : memref<3x384x128xbf16, #tpu.memory_space<vmem>>, vector<1x384x128xbf16>
    %8 = vector.shape_cast %7 : vector<1x384x128xbf16> to vector<384x128xbf16>
    %cst_9 = arith.constant dense<0.000000e+00> : vector<64x128xf32>
    %9 = tpu.matmul %6, %8, %cst_9 {dimension_numbers = #tpu.dot_dimension_numbers<[1], [0], [0], [1], [0, 0, 1, 1], [], []>} : vector<64x384xbf16>, vector<384x128xbf16>, vector<64x128xf32> -> vector<64x128xf32>
    %10 = arith.addf %4, %9 : vector<64x128xf32>
    %c0_10 = arith.constant 0 : index
    %c16 = arith.constant 16 : index
    %c0_11 = arith.constant 0 : index
    %11 = vector.load %arg1[%c0_10, %c16, %c0_11] : memref<1x80x384xbf16, #tpu.memory_space<vmem>>, vector<1x64x384xbf16>
    %12 = vector.shape_cast %11 : vector<1x64x384xbf16> to vector<64x384xbf16>
    %c2 = arith.constant 2 : index
    %c0_12 = arith.constant 0 : index
    %c0_13 = arith.constant 0 : index
    %13 = vector.load %arg2[%c2, %c0_12, %c0_13] : memref<3x384x128xbf16, #tpu.memory_space<vmem>>, vector<1x384x128xbf16>
    %14 = vector.shape_cast %13 : vector<1x384x128xbf16> to vector<384x128xbf16>
    %cst_14 = arith.constant dense<0.000000e+00> : vector<64x128xf32>
    %15 = tpu.matmul %12, %14, %cst_14 {dimension_numbers = #tpu.dot_dimension_numbers<[1], [0], [0], [1], [0, 0, 1, 1], [], []>} : vector<64x384xbf16>, vector<384x128xbf16>, vector<64x128xf32> -> vector<64x128xf32>
    %16 = arith.addf %10, %15 : vector<64x128xf32>
    %c0_15 = arith.constant 0 : index
    %c0_16 = arith.constant 0 : index
    %17 = vector.load %arg3[%c0_15, %c0_16] : memref<1x128xf32, #tpu.memory_space<vmem>>, vector<1x128xf32>
    %18 = vector.broadcast %17 : vector<1x128xf32> to vector<64x128xf32>
    %19 = arith.addf %16, %18 : vector<64x128xf32>
    %cst_17 = arith.constant 0.000000e+00 : f32
    %20 = vector.broadcast %cst_17 : f32 to vector<64x128xf32>
    %21 = arith.maximumf %19, %20 : vector<64x128xf32>
    %22 = arith.truncf %21 : vector<64x128xf32> to vector<64x128xbf16>
    %c0_18 = arith.constant 0 : index
    %c0_19 = arith.constant 0 : index
    %c0_20 = arith.constant 0 : index
    %23 = vector.load %arg4[%c0_18, %c0_19, %c0_20] : memref<1x64x128xbf16, #tpu.memory_space<vmem>>, vector<1x64x128xbf16>
    %24 = vector.shape_cast %23 : vector<1x64x128xbf16> to vector<64x128xbf16>
    %25 = vector.shape_cast %22 : vector<64x128xbf16> to vector<1x64x128xbf16>
    tpu.vector_store %arg4[%c0_18, %c0_19, %c0_20], %25 {strides = array<i32>} : memref<1x64x128xbf16, #tpu.memory_space<vmem>>, vector<1x64x128xbf16>,
    return
  }
  func.func @transform_0(%arg0: i32) -> (i32, i32, i32) {
    %c0_i32 = arith.constant 0 : i32
    %c0_i32_0 = arith.constant 0 : i32
    %c0_i32_1 = arith.constant 0 : i32
    return %arg0, %c0_i32, %c0_i32_0 : i32, i32, i32
  }
  func.func @transform_1(%arg0: i32) -> (i32, i32, i32) {
    %c0_i32 = arith.constant 0 : i32
    %c0_i32_0 = arith.constant 0 : i32
    %c0_i32_1 = arith.constant 0 : i32
    %c0_i32_2 = arith.constant 0 : i32
    return %c0_i32, %c0_i32_0, %c0_i32_1 : i32, i32, i32
  }
  func.func @transform_2(%arg0: i32) -> (i32, i32) {
    %c0_i32 = arith.constant 0 : i32
    %c0_i32_0 = arith.constant 0 : i32
    %c0_i32_1 = arith.constant 0 : i32
    return %c0_i32, %c0_i32_0 : i32, i32
  }
  func.func @transform_3(%arg0: i32) -> (i32, i32, i32) {
    %c0_i32 = arith.constant 0 : i32
    %c0_i32_0 = arith.constant 0 : i32
    %c0_i32_1 = arith.constant 0 : i32
    return %arg0, %c0_i32, %c0_i32_0 : i32, i32, i32
  }
}

module attributes {stable_mosaic.version = 11 : i64} {
  func.func @_maxpool2x2_kernel(%arg0: i32, %arg1: memref<4x2x4x256xbf16, #tpu.memory_space<vmem>>, %arg2: memref<4x4x128xbf16, #tpu.memory_space<vmem>>) attributes {dimension_semantics = [#tpu.dimension_semantics<parallel>], iteration_bounds = array<i64: 2>, scalar_prefetch = 0 : i64, scratch_operands = 0 : i64, tpu.core_type = #tpu.core_type<tc>, window_params = [{transform_indices = @transform_0, window_bounds = array<i64: 4, 2, 4, 256>}, {transform_indices = @transform_1, window_bounds = array<i64: 4, 4, 128>}]} {
    %c0 = arith.constant 0 : index
    %c0_0 = arith.constant 0 : index
    %c0_1 = arith.constant 0 : index
    %c0_2 = arith.constant 0 : index
    %0 = vector.load %arg1[%c0, %c0_0, %c0_1, %c0_2] : memref<4x2x4x256xbf16, #tpu.memory_space<vmem>>, vector<4x2x4x256xbf16>
    %1 = vector.extract_strided_slice %0 {offsets = [0, 0, 0, 0], sizes = [4, 1, 4, 256], strides = [1, 1, 1, 1]} : vector<4x2x4x256xbf16> to vector<4x1x4x256xbf16>
    %2 = vector.shape_cast %1 : vector<4x1x4x256xbf16> to vector<4x4x256xbf16>
    %3 = vector.extract_strided_slice %0 {offsets = [0, 1, 0, 0], sizes = [4, 1, 4, 256], strides = [1, 1, 1, 1]} : vector<4x2x4x256xbf16> to vector<4x1x4x256xbf16>
    %4 = vector.shape_cast %3 : vector<4x1x4x256xbf16> to vector<4x4x256xbf16>
    %5 = arith.maximumf %2, %4 : vector<4x4x256xbf16>
    %6 = vector.extract_strided_slice %5 {offsets = [0, 0, 0], sizes = [4, 4, 128], strides = [1, 1, 1]} : vector<4x4x256xbf16> to vector<4x4x128xbf16>
    %7 = vector.extract_strided_slice %5 {offsets = [0, 0, 128], sizes = [4, 4, 128], strides = [1, 1, 1]} : vector<4x4x256xbf16> to vector<4x4x128xbf16>
    %8 = arith.maximumf %6, %7 : vector<4x4x128xbf16>
    %c0_3 = arith.constant 0 : index
    %c0_4 = arith.constant 0 : index
    %c0_5 = arith.constant 0 : index
    %9 = vector.load %arg2[%c0_3, %c0_4, %c0_5] : memref<4x4x128xbf16, #tpu.memory_space<vmem>>, vector<4x4x128xbf16>
    tpu.vector_store %arg2[%c0_3, %c0_4, %c0_5], %8 {strides = array<i32>} : memref<4x4x128xbf16, #tpu.memory_space<vmem>>, vector<4x4x128xbf16>,
    return
  }
  func.func @transform_0(%arg0: i32) -> (i32, i32, i32, i32) {
    %c0_i32 = arith.constant 0 : i32
    %c0_i32_0 = arith.constant 0 : i32
    %c0_i32_1 = arith.constant 0 : i32
    %c0_i32_2 = arith.constant 0 : i32
    return %arg0, %c0_i32, %c0_i32_0, %c0_i32_1 : i32, i32, i32, i32
  }
  func.func @transform_1(%arg0: i32) -> (i32, i32, i32) {
    %c0_i32 = arith.constant 0 : i32
    %c0_i32_0 = arith.constant 0 : i32
    %c0_i32_1 = arith.constant 0 : i32
    return %arg0, %c0_i32, %c0_i32_0 : i32, i32, i32
  }
}

module attributes {stable_mosaic.version = 11 : i64} {
  func.func @_conv_tap_kernel(%arg0: i32, %arg1: memref<1x24x384xbf16, #tpu.memory_space<vmem>>, %arg2: memref<3x384x64xbf16, #tpu.memory_space<vmem>>, %arg3: memref<1x64xf32, #tpu.memory_space<vmem>>, %arg4: memref<1x16x64xbf16, #tpu.memory_space<vmem>>) attributes {dimension_semantics = [#tpu.dimension_semantics<parallel>], iteration_bounds = array<i64: 2>, scalar_prefetch = 0 : i64, scratch_operands = 0 : i64, tpu.core_type = #tpu.core_type<tc>, window_params = [{transform_indices = @transform_0, window_bounds = array<i64: 1, 24, 384>}, {pipeline_mode = #tpu.pipeline_mode<synchronous>, transform_indices = @transform_1, window_bounds = array<i64: 3, 384, 64>}, {pipeline_mode = #tpu.pipeline_mode<synchronous>, transform_indices = @transform_2, window_bounds = array<i64: 1, 64>}, {transform_indices = @transform_3, window_bounds = array<i64: 1, 16, 64>}]} {
    %c0 = arith.constant 0 : index
    %c0_0 = arith.constant 0 : index
    %c0_1 = arith.constant 0 : index
    %0 = vector.load %arg1[%c0, %c0_0, %c0_1] : memref<1x24x384xbf16, #tpu.memory_space<vmem>>, vector<1x16x384xbf16>
    %1 = vector.shape_cast %0 : vector<1x16x384xbf16> to vector<16x384xbf16>
    %c0_2 = arith.constant 0 : index
    %c0_3 = arith.constant 0 : index
    %c0_4 = arith.constant 0 : index
    %2 = vector.load %arg2[%c0_2, %c0_3, %c0_4] : memref<3x384x64xbf16, #tpu.memory_space<vmem>>, vector<1x384x64xbf16>
    %3 = vector.shape_cast %2 : vector<1x384x64xbf16> to vector<384x64xbf16>
    %cst = arith.constant dense<0.000000e+00> : vector<16x64xf32>
    %4 = tpu.matmul %1, %3, %cst {dimension_numbers = #tpu.dot_dimension_numbers<[1], [0], [0], [1], [0, 0, 1, 1], [], []>} : vector<16x384xbf16>, vector<384x64xbf16>, vector<16x64xf32> -> vector<16x64xf32>
    %c0_5 = arith.constant 0 : index
    %c4 = arith.constant 4 : index
    %c0_6 = arith.constant 0 : index
    %5 = vector.load %arg1[%c0_5, %c4, %c0_6] : memref<1x24x384xbf16, #tpu.memory_space<vmem>>, vector<1x16x384xbf16>
    %6 = vector.shape_cast %5 : vector<1x16x384xbf16> to vector<16x384xbf16>
    %c1 = arith.constant 1 : index
    %c0_7 = arith.constant 0 : index
    %c0_8 = arith.constant 0 : index
    %7 = vector.load %arg2[%c1, %c0_7, %c0_8] : memref<3x384x64xbf16, #tpu.memory_space<vmem>>, vector<1x384x64xbf16>
    %8 = vector.shape_cast %7 : vector<1x384x64xbf16> to vector<384x64xbf16>
    %cst_9 = arith.constant dense<0.000000e+00> : vector<16x64xf32>
    %9 = tpu.matmul %6, %8, %cst_9 {dimension_numbers = #tpu.dot_dimension_numbers<[1], [0], [0], [1], [0, 0, 1, 1], [], []>} : vector<16x384xbf16>, vector<384x64xbf16>, vector<16x64xf32> -> vector<16x64xf32>
    %10 = arith.addf %4, %9 : vector<16x64xf32>
    %c0_10 = arith.constant 0 : index
    %c8 = arith.constant 8 : index
    %c0_11 = arith.constant 0 : index
    %11 = vector.load %arg1[%c0_10, %c8, %c0_11] : memref<1x24x384xbf16, #tpu.memory_space<vmem>>, vector<1x16x384xbf16>
    %12 = vector.shape_cast %11 : vector<1x16x384xbf16> to vector<16x384xbf16>
    %c2 = arith.constant 2 : index
    %c0_12 = arith.constant 0 : index
    %c0_13 = arith.constant 0 : index
    %13 = vector.load %arg2[%c2, %c0_12, %c0_13] : memref<3x384x64xbf16, #tpu.memory_space<vmem>>, vector<1x384x64xbf16>
    %14 = vector.shape_cast %13 : vector<1x384x64xbf16> to vector<384x64xbf16>
    %cst_14 = arith.constant dense<0.000000e+00> : vector<16x64xf32>
    %15 = tpu.matmul %12, %14, %cst_14 {dimension_numbers = #tpu.dot_dimension_numbers<[1], [0], [0], [1], [0, 0, 1, 1], [], []>} : vector<16x384xbf16>, vector<384x64xbf16>, vector<16x64xf32> -> vector<16x64xf32>
    %16 = arith.addf %10, %15 : vector<16x64xf32>
    %c0_15 = arith.constant 0 : index
    %c0_16 = arith.constant 0 : index
    %17 = vector.load %arg3[%c0_15, %c0_16] : memref<1x64xf32, #tpu.memory_space<vmem>>, vector<1x64xf32>
    %18 = vector.broadcast %17 : vector<1x64xf32> to vector<16x64xf32>
    %19 = arith.addf %16, %18 : vector<16x64xf32>
    %cst_17 = arith.constant 0.000000e+00 : f32
    %20 = vector.broadcast %cst_17 : f32 to vector<16x64xf32>
    %21 = arith.maximumf %19, %20 : vector<16x64xf32>
    %22 = arith.truncf %21 : vector<16x64xf32> to vector<16x64xbf16>
    %c0_18 = arith.constant 0 : index
    %c0_19 = arith.constant 0 : index
    %c0_20 = arith.constant 0 : index
    %23 = vector.load %arg4[%c0_18, %c0_19, %c0_20] : memref<1x16x64xbf16, #tpu.memory_space<vmem>>, vector<1x16x64xbf16>
    %24 = vector.shape_cast %23 : vector<1x16x64xbf16> to vector<16x64xbf16>
    %25 = vector.shape_cast %22 : vector<16x64xbf16> to vector<1x16x64xbf16>
    tpu.vector_store %arg4[%c0_18, %c0_19, %c0_20], %25 {strides = array<i32>} : memref<1x16x64xbf16, #tpu.memory_space<vmem>>, vector<1x16x64xbf16>,
    return
  }
  func.func @transform_0(%arg0: i32) -> (i32, i32, i32) {
    %c0_i32 = arith.constant 0 : i32
    %c0_i32_0 = arith.constant 0 : i32
    %c0_i32_1 = arith.constant 0 : i32
    return %arg0, %c0_i32, %c0_i32_0 : i32, i32, i32
  }
  func.func @transform_1(%arg0: i32) -> (i32, i32, i32) {
    %c0_i32 = arith.constant 0 : i32
    %c0_i32_0 = arith.constant 0 : i32
    %c0_i32_1 = arith.constant 0 : i32
    %c0_i32_2 = arith.constant 0 : i32
    return %c0_i32, %c0_i32_0, %c0_i32_1 : i32, i32, i32
  }
  func.func @transform_2(%arg0: i32) -> (i32, i32) {
    %c0_i32 = arith.constant 0 : i32
    %c0_i32_0 = arith.constant 0 : i32
    %c0_i32_1 = arith.constant 0 : i32
    return %c0_i32, %c0_i32_0 : i32, i32
  }
  func.func @transform_3(%arg0: i32) -> (i32, i32, i32) {
    %c0_i32 = arith.constant 0 : i32
    %c0_i32_0 = arith.constant 0 : i32
    %c0_i32_1 = arith.constant 0 : i32
    return %arg0, %c0_i32, %c0_i32_0 : i32, i32, i32
  }
}

module attributes {stable_mosaic.version = 11 : i64} {
  func.func @_conv_tap_upfold_kernel(%arg0: i32, %arg1: memref<1x24x192xbf16, #tpu.memory_space<vmem>>, %arg2: memref<3x192x64xbf16, #tpu.memory_space<vmem>>, %arg3: memref<1x64xf32, #tpu.memory_space<vmem>>, %arg4: memref<64x128xbf16, #tpu.memory_space<vmem>>, %arg5: memref<1x128xf32, #tpu.memory_space<vmem>>, %arg6: memref<1x16x128xf32, #tpu.memory_space<vmem>>) attributes {dimension_semantics = [#tpu.dimension_semantics<parallel>], iteration_bounds = array<i64: 2>, scalar_prefetch = 0 : i64, scratch_operands = 0 : i64, tpu.core_type = #tpu.core_type<tc>, window_params = [{transform_indices = @transform_0, window_bounds = array<i64: 1, 24, 192>}, {pipeline_mode = #tpu.pipeline_mode<synchronous>, transform_indices = @transform_1, window_bounds = array<i64: 3, 192, 64>}, {pipeline_mode = #tpu.pipeline_mode<synchronous>, transform_indices = @transform_2, window_bounds = array<i64: 1, 64>}, {pipeline_mode = #tpu.pipeline_mode<synchronous>, transform_indices = @transform_3, window_bounds = array<i64: 64, 128>}, {pipeline_mode = #tpu.pipeline_mode<synchronous>, transform_indices = @transform_4, window_bounds = array<i64: 1, 128>}, {transform_indices = @transform_5, window_bounds = array<i64: 1, 16, 128>}]} {
    %c0 = arith.constant 0 : index
    %c0_0 = arith.constant 0 : index
    %c0_1 = arith.constant 0 : index
    %0 = vector.load %arg1[%c0, %c0_0, %c0_1] : memref<1x24x192xbf16, #tpu.memory_space<vmem>>, vector<1x16x192xbf16>
    %1 = vector.shape_cast %0 : vector<1x16x192xbf16> to vector<16x192xbf16>
    %c0_2 = arith.constant 0 : index
    %c0_3 = arith.constant 0 : index
    %c0_4 = arith.constant 0 : index
    %2 = vector.load %arg2[%c0_2, %c0_3, %c0_4] : memref<3x192x64xbf16, #tpu.memory_space<vmem>>, vector<1x192x64xbf16>
    %3 = vector.shape_cast %2 : vector<1x192x64xbf16> to vector<192x64xbf16>
    %cst = arith.constant dense<0.000000e+00> : vector<16x64xf32>
    %4 = tpu.matmul %1, %3, %cst {dimension_numbers = #tpu.dot_dimension_numbers<[1], [0], [0], [1], [0, 0, 1, 1], [], []>} : vector<16x192xbf16>, vector<192x64xbf16>, vector<16x64xf32> -> vector<16x64xf32>
    %c0_5 = arith.constant 0 : index
    %c4 = arith.constant 4 : index
    %c0_6 = arith.constant 0 : index
    %5 = vector.load %arg1[%c0_5, %c4, %c0_6] : memref<1x24x192xbf16, #tpu.memory_space<vmem>>, vector<1x16x192xbf16>
    %6 = vector.shape_cast %5 : vector<1x16x192xbf16> to vector<16x192xbf16>
    %c1 = arith.constant 1 : index
    %c0_7 = arith.constant 0 : index
    %c0_8 = arith.constant 0 : index
    %7 = vector.load %arg2[%c1, %c0_7, %c0_8] : memref<3x192x64xbf16, #tpu.memory_space<vmem>>, vector<1x192x64xbf16>
    %8 = vector.shape_cast %7 : vector<1x192x64xbf16> to vector<192x64xbf16>
    %cst_9 = arith.constant dense<0.000000e+00> : vector<16x64xf32>
    %9 = tpu.matmul %6, %8, %cst_9 {dimension_numbers = #tpu.dot_dimension_numbers<[1], [0], [0], [1], [0, 0, 1, 1], [], []>} : vector<16x192xbf16>, vector<192x64xbf16>, vector<16x64xf32> -> vector<16x64xf32>
    %10 = arith.addf %4, %9 : vector<16x64xf32>
    %c0_10 = arith.constant 0 : index
    %c8 = arith.constant 8 : index
    %c0_11 = arith.constant 0 : index
    %11 = vector.load %arg1[%c0_10, %c8, %c0_11] : memref<1x24x192xbf16, #tpu.memory_space<vmem>>, vector<1x16x192xbf16>
    %12 = vector.shape_cast %11 : vector<1x16x192xbf16> to vector<16x192xbf16>
    %c2 = arith.constant 2 : index
    %c0_12 = arith.constant 0 : index
    %c0_13 = arith.constant 0 : index
    %13 = vector.load %arg2[%c2, %c0_12, %c0_13] : memref<3x192x64xbf16, #tpu.memory_space<vmem>>, vector<1x192x64xbf16>
    %14 = vector.shape_cast %13 : vector<1x192x64xbf16> to vector<192x64xbf16>
    %cst_14 = arith.constant dense<0.000000e+00> : vector<16x64xf32>
    %15 = tpu.matmul %12, %14, %cst_14 {dimension_numbers = #tpu.dot_dimension_numbers<[1], [0], [0], [1], [0, 0, 1, 1], [], []>} : vector<16x192xbf16>, vector<192x64xbf16>, vector<16x64xf32> -> vector<16x64xf32>
    %16 = arith.addf %10, %15 : vector<16x64xf32>
    %c0_15 = arith.constant 0 : index
    %c0_16 = arith.constant 0 : index
    %17 = vector.load %arg3[%c0_15, %c0_16] : memref<1x64xf32, #tpu.memory_space<vmem>>, vector<1x64xf32>
    %18 = vector.broadcast %17 : vector<1x64xf32> to vector<16x64xf32>
    %19 = arith.addf %16, %18 : vector<16x64xf32>
    %cst_17 = arith.constant 0.000000e+00 : f32
    %20 = vector.broadcast %cst_17 : f32 to vector<16x64xf32>
    %21 = arith.maximumf %19, %20 : vector<16x64xf32>
    %22 = arith.truncf %21 : vector<16x64xf32> to vector<16x64xbf16>
    %c0_18 = arith.constant 0 : index
    %c0_19 = arith.constant 0 : index
    %23 = vector.load %arg4[%c0_18, %c0_19] : memref<64x128xbf16, #tpu.memory_space<vmem>>, vector<64x128xbf16>
    %cst_20 = arith.constant dense<0.000000e+00> : vector<16x128xf32>
    %24 = tpu.matmul %22, %23, %cst_20 {dimension_numbers = #tpu.dot_dimension_numbers<[1], [0], [0], [1], [0, 0, 1, 1], [], []>} : vector<16x64xbf16>, vector<64x128xbf16>, vector<16x128xf32> -> vector<16x128xf32>
    %c0_21 = arith.constant 0 : index
    %c0_22 = arith.constant 0 : index
    %25 = vector.load %arg5[%c0_21, %c0_22] : memref<1x128xf32, #tpu.memory_space<vmem>>, vector<1x128xf32>
    %26 = vector.broadcast %25 : vector<1x128xf32> to vector<16x128xf32>
    %27 = arith.addf %24, %26 : vector<16x128xf32>
    %c0_23 = arith.constant 0 : index
    %c0_24 = arith.constant 0 : index
    %c0_25 = arith.constant 0 : index
    %28 = vector.load %arg6[%c0_23, %c0_24, %c0_25] : memref<1x16x128xf32, #tpu.memory_space<vmem>>, vector<1x16x128xf32>
    %29 = vector.shape_cast %28 : vector<1x16x128xf32> to vector<16x128xf32>
    %30 = vector.shape_cast %27 : vector<16x128xf32> to vector<1x16x128xf32>
    tpu.vector_store %arg6[%c0_23, %c0_24, %c0_25], %30 {strides = array<i32>} : memref<1x16x128xf32, #tpu.memory_space<vmem>>, vector<1x16x128xf32>,
    return
  }
  func.func @transform_0(%arg0: i32) -> (i32, i32, i32) {
    %c0_i32 = arith.constant 0 : i32
    %c0_i32_0 = arith.constant 0 : i32
    %c0_i32_1 = arith.constant 0 : i32
    return %arg0, %c0_i32, %c0_i32_0 : i32, i32, i32
  }
  func.func @transform_1(%arg0: i32) -> (i32, i32, i32) {
    %c0_i32 = arith.constant 0 : i32
    %c0_i32_0 = arith.constant 0 : i32
    %c0_i32_1 = arith.constant 0 : i32
    %c0_i32_2 = arith.constant 0 : i32
    return %c0_i32, %c0_i32_0, %c0_i32_1 : i32, i32, i32
  }
  func.func @transform_2(%arg0: i32) -> (i32, i32) {
    %c0_i32 = arith.constant 0 : i32
    %c0_i32_0 = arith.constant 0 : i32
    %c0_i32_1 = arith.constant 0 : i32
    return %c0_i32, %c0_i32_0 : i32, i32
  }
  func.func @transform_3(%arg0: i32) -> (i32, i32) {
    %c0_i32 = arith.constant 0 : i32
    %c0_i32_0 = arith.constant 0 : i32
    %c0_i32_1 = arith.constant 0 : i32
    return %c0_i32, %c0_i32_0 : i32, i32
  }
  func.func @transform_4(%arg0: i32) -> (i32, i32) {
    %c0_i32 = arith.constant 0 : i32
    %c0_i32_0 = arith.constant 0 : i32
    %c0_i32_1 = arith.constant 0 : i32
    return %c0_i32, %c0_i32_0 : i32, i32
  }
  func.func @transform_5(%arg0: i32) -> (i32, i32, i32) {
    %c0_i32 = arith.constant 0 : i32
    %c0_i32_0 = arith.constant 0 : i32
    %c0_i32_1 = arith.constant 0 : i32
    return %arg0, %c0_i32, %c0_i32_0 : i32, i32, i32
  }
}

</mosaic_0001>

<bundles_post_ra>
// kernel: unet_forward.8
= control target key start
LH: loop header
LB: loop body
LE: loop exit
PB: predicated region body
PF: predicated region fallthrough
CT: control target
= control target key end

     0   :  { %s1735_s12 = smov 0   ;;  %s2033_s0 = inlined_call_operand.vmem [shape: bf16[2,288,9], index: 0, kind: input, shape index: {}]   ;;  %s2034_s1 = inlined_call_operand.vmem [shape: bf16[3,9,64], index: 1, kind: input, shape index: {}]   ;;  %s2035_s2 = inlined_call_operand.vmem [shape: f32[1,64], index: 2, kind: input, shape index: {}]   ;;  %s2036_s3 = inlined_call_operand.vmem [shape: bf16[2,256,64], index: 3, kind: output, shape index: {}]  }
   0x1 LB: > { %s1341_s13 = sadd.s32 4294967295, %s1712_s12   ;;  %p1345_p0 = scmp.ge.s32.totalorder %s1712_s12, 1  ;;  %s1712_s12 = sphi %s1735_s12, %s13_s12  }
   0x2   : > { %p137_p1 = scmp.lt.s32.totalorder %s1712_s12, 3 }
   0x4   : > { %p138_p2 = pnand %p1345_p0, %p137_p1 }
   0x5   : > { %p161_p3 = scmp.lt.s32.totalorder (!%p138_p2), %s1341_s13, 1 }
   0x6   : > { %141 = sbr.rel (%p138_p2) target bundleno = 318 (0x13e), region = 32 }
   0xb   : > { %v1670_v0 = vld [vmem:[%s2034_s1 + $0x8] sm:$0x1f]   ;;  %vm345_vm0 = vcmask 1043456   ;;  %vm346_vm1 = vcmask 1044480   ;;  %v1714_v1 = vmov 65535   ;;  %s2038_s13 = smov (!%p161_p3, %s1341_s13), 1 }
   0xc   : > { %v347_v2 = vsel %vm345_vm0, 4294967295, %v1714_v1  ;;  %v1673_v4 = vld [vmem:[%s2034_s1] sm:$0x1f]   ;;  %v1676_v6 = vld [vmem:[%s2034_s1 + $0x10] sm:$0x1f]   ;;  %s1660_s20 = smul.u32 144, %s2038_s13 }
   0xd   : > { %v348_v3 = vsel %vm346_vm1, %v347_v2, 0  ;;  %vm296_vm2 = vcmask 72704   ;;  %s1472_s26 = sshll.u32 %s2038_s13, 7  ;;  %vm1253_vm3 = vcmask 519168  }
   0xe   : > { %v350_v5 = vand.u32 %v1670_v0, %v348_v3  ;;  %v527_v7 = vand.u32 %v1673_v4, %v348_v3  ;;  %v859_v8 = vand.u32 %v1676_v6, %v348_v3  ;;  %s1758_s23 = scalar_lea.vmem %s2033_s0, %s1660_s20  ;;  %s1908_s29 = scalar_lea.vmem %s2036_s3, %s1472_s26 }
   0xf   : > { %v1671_v9 = vld [vmem:[%s1758_s23 + $0x8] sm:$0xff]   ;;  %v1674_v11 = vld [vmem:[%s1758_s23 + $0x10] sm:$0xff]   ;;  %v1677_v13 = vld [vmem:[%s1758_s23 + $0x18] sm:$0xff]  }
  0x10   : > { %1658 = vmatprep.subr.bf16.mxu1 %v350_v5  ;;  %1556 = vmatprep.subr.bf16.mxu0 %v350_v5  ;;  %v1762_v10 = vld [vmem:[%s1758_s23 + $0x48] sm:$0xff]   ;;  %v1675_v12 = vld [vmem:[%s1758_s23 + $0x50] sm:$0xff]   ;;  %v1678_v14 = vld [vmem:[%s1758_s23 + $0x58] sm:$0xff]  }
  0x11   : > { %1659 = vmatpush3.bf16.msra.mxu1 %v350_v5  ;;  %1557 = vmatpush3.bf16.msra.mxu0 %v350_v5  ;;  %v1679_v15 = vld [vmem:[%s1758_s23 + $0x20] sm:$0xff]   ;;  %v1681_v17 = vld [vmem:[%s1758_s23 + $0x28] sm:$0xff]   ;;  %v1683_v19 = vld [vmem:[%s1758_s23 + $0x30] sm:$0xff]  }
  0x12   : > { %1590 = vmatprep.subr.bf16.mxu1 %v527_v7  ;;  %1624 = vmatprep.subr.bf16.mxu0 %v859_v8  ;;  %v1680_v16 = vld [vmem:[%s1758_s23 + $0x60] sm:$0xff]   ;;  %v1682_v18 = vld [vmem:[%s1758_s23 + $0x68] sm:$0xff]   ;;  %v1684_v20 = vld [vmem:[%s1758_s23 + $0x70] sm:$0xff]  }
  0x13   : > { %1558 = vmatprep.mubr.msk.bf16.mxu0 %vm296_vm2, %v1671_v9  ;;  %1574 = vmatprep.mubr.msk.bf16.mxu1 %vm296_vm2, %v1762_v10  ;;  %v1685_v21 = vld [vmem:[%s1758_s23 + $0x38] sm:$0xff]   ;;  %v1687_v23 = vld [vmem:[%s1758_s23 + $0x40] sm:$0xff]   ;;  %v1690_v25 = vld [vmem:[%s1758_s23 + $0x10] sm:$0xff]  }
  0x14   : > { %1559 = vmatmul.mubr.msk.bf16.vlgmr.msra.gmra.mxu0 %vm296_vm2, %v1674_v11  ;;  %1575 = vmatmul.mubr.msk.bf16.vlgmr.msra.gmra.mxu1 %vm296_vm2, %v1675_v12  ;;  %v1686_v22 = vld [vmem:[%s1758_s23 + $0x78] sm:$0xff]   ;;  %v1688_v24 = vld [vmem:[%s1758_s23 + $0x80] sm:$0xff]   ;;  %v1693_v29 = vld [vmem:[%s1758_s23 + $0x28] sm:$0xff]  }
  0x15   : > { %1625 = vmatpush3.bf16.msra.mxu0 %v859_v8  ;;  %1591 = vmatpush3.bf16.msra.mxu1 %v527_v7  ;;  %v1689_v26 = vld [vmem:[%s1758_s23] sm:$0xff]   ;;  %v1691_v27 = vld [vmem:[%s1758_s23 + $0x18] sm:$0xff]   ;;  %v1694_v30 = vld [vmem:[%s1758_s23 + $0x30] sm:$0xff]  }
  0x16   : > { %1562 = vmatprep.mubr.msk.bf16.mxu0 %vm296_vm2, %v1677_v13  ;;  %1578 = vmatprep.mubr.msk.bf16.mxu1 %vm296_vm2, %v1678_v14  ;;  %v1692_v28 = vld [vmem:[%s1758_s23 + $0x20] sm:$0xff]   ;;  %v1695_v31 = vld [vmem:[%s1758_s23 + $0x38] sm:$0xff]   ;;  %v1697_v33 = vld [vmem:[%s1758_s23 + $0x48] sm:$0xff]  }
  0x17   : > { %v1696_v32 = vld [vmem:[%s1758_s23 + $0x40] sm:$0xff]   ;;  %v1698_v34 = vld [vmem:[%s1758_s23 + $0x50] sm:$0xff]   ;;  %v1699_v35 = vld [vmem:[%s1758_s23 + $0x58] sm:$0xff]  }
  0x18   : > { %v1700_v36 = vld [vmem:[%s1758_s23 + $0x60] sm:$0xff]   ;;  %v1701_v37 = vld [vmem:[%s1758_s23 + $0x68] sm:$0xff]   ;;  %v1702_v38 = vld [vmem:[%s1758_s23 + $0x70] sm:$0xff]  }
  0x19   : > { %v1703_v39 = vld [vmem:[%s1758_s23 + $0x78] sm:$0xff]   ;;  %v1704_v40 = vld [vmem:[%s1758_s23 + $0x80] sm:$0xff]   ;;  %v1705_v41 = vld [vmem:[%s1758_s23 + $0x88] sm:$0xff]  }
  0x1c   : > { %1563 = vmatmul.mubr.msk.bf16.gmra.mxu0 %vm296_vm2, %v1679_v15  ;;  %1579 = vmatmul.mubr.msk.bf16.gmra.mxu1 %vm296_vm2, %v1680_v16 }
  0x1d   : > { %1566 = vmatprep.mubr.msk.bf16.mxu0 %vm296_vm2, %v1681_v17  ;;  %1582 = vmatprep.mubr.msk.bf16.mxu1 %vm296_vm2, %v1682_v18 }
  0x24   : > { %1567 = vmatmul.mubr.msk.bf16.gmra.mxu0 %vm296_vm2, %v1683_v19  ;;  %1583 = vmatmul.mubr.msk.bf16.gmra.mxu1 %vm296_vm2, %v1684_v20 }
  0x25   : > { %1570 = vmatprep.mubr.msk.bf16.mxu0 %vm296_vm2, %v1685_v21  ;;  %1586 = vmatprep.mubr.msk.bf16.mxu1 %vm296_vm2, %v1686_v22 }
  0x2c   : > { %1571 = vmatmul.mubr.msk.bf16.gmra.mxu0 %vm296_vm2, %v1687_v23  ;;  %1587 = vmatmul.mubr.msk.bf16.gmra.mxu1 %vm296_vm2, %v1688_v24 }
  0x2d   : > { %1626 = vmatprep.mubr.msk.bf16.mxu0 %vm296_vm2, %v1690_v25  ;;  %1592 = vmatprep.mubr.msk.bf16.mxu1 %vm296_vm2, %v1689_v26 }
  0x34   : > { %1627 = vmatmul.mubr.msk.bf16.vlgmr.msra.gmra.mxu0 %vm296_vm2, %v1691_v27  ;;  %1593 = vmatmul.mubr.msk.bf16.vlgmr.msra.gmra.mxu1 %vm296_vm2, %v1671_v9 }
  0x35   : > { %1630 = vmatprep.mubr.msk.bf16.mxu0 %vm296_vm2, %v1692_v28  ;;  %1596 = vmatprep.mubr.msk.bf16.mxu1 %vm296_vm2, %v1674_v11 }
  0x3c   : > { %1631 = vmatmul.mubr.msk.bf16.gmra.mxu0 %vm296_vm2, %v1693_v29  ;;  %1597 = vmatmul.mubr.msk.bf16.gmra.mxu1 %vm296_vm2, %v1677_v13 }
  0x3d   : > { %1634 = vmatprep.mubr.msk.bf16.mxu0 %vm296_vm2, %v1694_v30  ;;  %1600 = vmatprep.mubr.msk.bf16.mxu1 %vm296_vm2, %v1679_v15 }
  0x44   : > { %1635 = vmatmul.mubr.msk.bf16.gmra.mxu0 %vm296_vm2, %v1695_v31  ;;  %1601 = vmatmul.mubr.msk.bf16.gmra.mxu1 %vm296_vm2, %v1681_v17 }
  0x45   : > { %1638 = vmatprep.mubr.msk.bf16.mxu0 %vm296_vm2, %v1696_v32  ;;  %1604 = vmatprep.mubr.msk.bf16.mxu1 %vm296_vm2, %v1683_v19 }
  0x4c   : > { %1639 = vmatmul.mubr.msk.bf16.gmra.mxu0 %vm296_vm2, %v1697_v33  ;;  %1605 = vmatmul.mubr.msk.bf16.gmra.mxu1 %vm296_vm2, %v1685_v21 }
  0x4d   : > { %1642 = vmatprep.mubr.msk.bf16.mxu0 %vm296_vm2, %v1698_v34  ;;  %1608 = vmatprep.mubr.msk.bf16.mxu1 %vm296_vm2, %v1687_v23 }
  0x54   : > { %1643 = vmatmul.mubr.msk.bf16.gmra.mxu0 %vm296_vm2, %v1699_v35  ;;  %1609 = vmatmul.mubr.msk.bf16.gmra.mxu1 %vm296_vm2, %v1762_v10 }
  0x55   : > { %1646 = vmatprep.mubr.msk.bf16.mxu0 %vm296_vm2, %v1700_v36  ;;  %1612 = vmatprep.mubr.msk.bf16.mxu1 %vm296_vm2, %v1675_v12 }
  0x5c   : > { %1647 = vmatmul.mubr.msk.bf16.gmra.mxu0 %vm296_vm2, %v1701_v37  ;;  %1613 = vmatmul.mubr.msk.bf16.gmra.mxu1 %vm296_vm2, %v1678_v14  ;;  %v1900_v14 = vld [vmem:[%s2035_s2] ss:$0 sm:$0xff] }
  0x5d   : > { %1650 = vmatprep.mubr.msk.bf16.mxu0 %vm296_vm2, %v1702_v38  ;;  %1616 = vmatprep.mubr.msk.bf16.mxu1 %vm296_vm2, %v1680_v16 }
  0x64   : > { %1651 = vmatmul.mubr.msk.bf16.gmra.mxu0 %vm296_vm2, %v1703_v39  ;;  %1617 = vmatmul.mubr.msk.bf16.gmra.mxu1 %vm296_vm2, %v1682_v18 }
  0x65   : > { %1654 = vmatprep.mubr.msk.bf16.mxu0 %vm296_vm2, %v1704_v40  ;;  %1620 = vmatprep.mubr.msk.bf16.mxu1 %vm296_vm2, %v1684_v20 }
  0x6c   : > { %1655 = vmatmul.mubr.msk.bf16.gmra.mxu0 %vm296_vm2, %v1705_v41  ;;  %1621 = vmatmul.mubr.msk.bf16.gmra.mxu1 %vm296_vm2, %v1686_v22 }
  0xd4   : > { %v1560_v42 = vpop.f32.mrf.mxu0  ;;  %v1845_v43 = vpop.f32.mrf.mxu1 }
  0xd6   : > { %v386_v44 = vpop.f32.mrf.mxu0  ;;  %v1847_v45 = vpop.f32.mrf.mxu1 }
  0xd8   : > { %v1561_v46 = vpop.f32.mrf.mxu0  ;;  %v1849_v47 = vpop.f32.mrf.mxu1 }
  0xda   : > { %v389_v48 = vpop.f32.mrf.mxu0  ;;  %v1851_v49 = vpop.f32.mrf.mxu1 }
  0xdc   : > { %v1564_v50 = vpop.f32.mrf.mxu0  ;;  %v1853_v51 = vpop.f32.mrf.mxu1 }
  0xde   : > { %v402_v52 = vpop.f32.mrf.mxu0  ;;  %v1855_v53 = vpop.f32.mrf.mxu1 }
  0xe0   : > { %v1857_v54 = vpop.f32.mrf.mxu0  ;;  %v1859_v55 = vpop.f32.mrf.mxu1 }
  0xe2   : > { %v1861_v56 = vpop.f32.mrf.mxu0  ;;  %v1863_v57 = vpop.f32.mrf.mxu1 }
  0xe4   : > { %v1865_v58 = vpop.f32.mrf.mxu0  ;;  %v1867_v59 = vpop.f32.mrf.mxu1 }
  0xe6   : > { %v1869_v60 = vpop.f32.mrf.mxu0  ;;  %v1871_v61 = vpop.f32.mrf.mxu1 }
  0xe8   : > { %v1873_v62 = vpop.f32.mrf.mxu0  ;;  %v1875_v63 = vpop.f32.mrf.mxu1 }
  0xea   : > { %v1877_v0 = vpop.f32.mrf.mxu0  ;;  %v1879_v1 = vpop.f32.mrf.mxu1 }
  0xec   : > { %v1881_v2 = vpop.f32.mrf.mxu0  ;;  %v1883_v3 = vpop.f32.mrf.mxu1 }
  0xee   : > { %v1885_v4 = vpop.f32.mrf.mxu0  ;;  %v1887_v5 = vpop.f32.mrf.mxu1 }
  0xf0   : > { %v1889_v6 = vpop.f32.mrf.mxu0  ;;  %v1891_v7 = vpop.f32.mrf.mxu1 }
  0xf2   : > { %v1893_v8 = vpop.f32.mrf.mxu0  ;;  %v1895_v9 = vpop.f32.mrf.mxu1 }
  0xf4   : > { %v1628_v10 = vpop.f32.mrf.mxu0  ;;  %v1594_v11 = vpop.f32.mrf.mxu1 }
  0xf5   : > { %v572_v12 = vadd.f32 %v1594_v11, %v1560_v42 }
  0xf6   : > { %v895_v13 = vpop.f32.mrf.mxu0  ;;  %v563_v15 = vpop.f32.mrf.mxu1 }
  0xf7   : > { %v1024_v16 = vadd.f32 %v1628_v10, %v572_v12  ;;  %v564_v17 = vadd.f32 %v563_v15, %v386_v44 }
  0xf8   : > { %v1629_v18 = vpop.f32.mrf.mxu0  ;;  %v1595_v19 = vpop.f32.mrf.mxu1 }
  0xf9   : > { %v1063_v20 = vadd.f32 %v1900_v14, %v1024_v16  ;;  %v1022_v21 = vadd.f32 %v895_v13, %v564_v17  ;;  %v575_v22 = vadd.f32 %v1595_v19, %v1561_v46 }
  0xfa   : > { %v898_v23 = vpop.f32.mrf.mxu0  ;;  %v566_v24 = vpop.f32.mrf.mxu1 }
  0xfb   : > { %v1095_v25 = vmax.f32 %v1063_v20, 0.0  ;;  %v1061_v26 = vadd.f32 %v1900_v14, %v1022_v21  ;;  %v1025_v27 = vadd.f32 %v1629_v18, %v575_v22  ;;  %v567_v28 = vadd.f32 %v566_v24, %v389_v48 }
  0xfc   : > { %v1632_v29 = vpop.f32.mrf.mxu0  ;;  %v1598_v30 = vpop.f32.mrf.mxu1 }
  0xfd   : > { %v1475_v31 = vpack.c.bf16 %v1095_v25, %v1095_v25  ;;  %v1093_v32 = vmax.f32 %v1061_v26, 0.0  ;;  %v1064_v33 = vadd.f32 %v1900_v14, %v1025_v27  ;;  %v1023_v34 = vadd.f32 %v898_v23, %v567_v28 }
  0xfe   : > { %v911_v35 = vpop.f32.mrf.mxu0  ;;  %v588_v36 = vadd.f32 %v1598_v30, %v1564_v50  ;;  %v579_v37 = vpop.f32.mrf.mxu1 }
  0xff   : > { %1256 = vst.msk [vmem:[%s1908_s29 + $0x8] sm:$0xf] %vm1253_vm3, %v1475_v31  ;;  %v1473_v38 = vpack.c.bf16 %v1093_v32, %v1093_v32  ;;  %v1096_v39 = vmax.f32 %v1064_v33, 0.0  ;;  %v1062_v40 = vadd.f32 %v1900_v14, %v1023_v34  ;;  %v580_v41 = vadd.f32 %v579_v37, %v402_v52 }
 0x100   : > { %v1633_v42 = vpop.f32.mrf.mxu0  ;;  %v1028_v44 = vadd.f32 %v1632_v29, %v588_v36  ;;  %v1599_v46 = vpop.f32.mrf.mxu1 }
 0x101   : > { %1254 = vst.msk [vmem:[%s1908_s29] sm:$0xf] %vm1253_vm3, %v1473_v38  ;;  %v1476_v48 = vpack.c.bf16 %v1096_v39, %v1096_v39  ;;  %v1094_v10 = vmax.f32 %v1062_v40, 0.0  ;;  %v1026_v11 = vadd.f32 %v911_v35, %v580_v41  ;;  %v591_v50 = vadd.f32 %v1599_v46, %v1857_v54 }
 0x102   : > { %v914_v12 = vpop.f32.mrf.mxu0  ;;  %v1067_v13 = vadd.f32 %v1900_v14, %v1028_v44  ;;  %v582_v15 = vpop.f32.mrf.mxu1 }
 0x103   : > { %1257 = vst.msk [vmem:[%s1908_s29 + $0xc] sm:$0xf] %vm1253_vm3, %v1476_v48  ;;  %v1474_v16 = vpack.c.bf16 %v1094_v10, %v1094_v10  ;;  %v1065_v52 = vadd.f32 %v1900_v14, %v1026_v11  ;;  %v1029_v17 = vadd.f32 %v1633_v42, %v591_v50  ;;  %v583_v18 = vadd.f32 %v582_v15, %v1861_v56 }
 0x104   : > { %v1636_v19 = vpop.f32.mrf.mxu0  ;;  %v1099_v20 = vmax.f32 %v1067_v13, 0.0  ;;  %v1602_v21 = vpop.f32.mrf.mxu1 }
 0x105   : > { %1255 = vst.msk [vmem:[%s1908_s29 + $0x4] sm:$0xf] %vm1253_vm3, %v1474_v16  ;;  %v1097_v54 = vmax.f32 %v1065_v52, 0.0  ;;  %v1068_v22 = vadd.f32 %v1900_v14, %v1029_v17  ;;  %v1027_v23 = vadd.f32 %v914_v12, %v583_v18  ;;  %v604_v24 = vadd.f32 %v1602_v21, %v1865_v58 }
 0x106   : > { %v927_v25 = vpop.f32.mrf.mxu0  ;;  %v1479_v26 = vpack.c.bf16 %v1099_v20, %v1099_v20  ;;  %v595_v27 = vpop.f32.mrf.mxu1 }
 0x107   : > { %v1477_v28 = vpack.c.bf16 %v1097_v54, %v1097_v54  ;;  %v1100_v29 = vmax.f32 %v1068_v22, 0.0  ;;  %v1066_v56 = vadd.f32 %v1900_v14, %v1027_v23  ;;  %v1032_v30 = vadd.f32 %v1636_v19, %v604_v24 }
 0x108   : > { %v1637_v31 = vpop.f32.mrf.mxu0  ;;  %1260 = vst.msk [vmem:[%s1908_s29 + $0x18] sm:$0xf] %vm1253_vm3, %v1479_v26  ;;  %v596_v32 = vadd.f32 %v595_v27, %v1869_v60  ;;  %v1603_v33 = vpop.f32.mrf.mxu1 }
 0x109   : > { %1258 = vst.msk [vmem:[%s1908_s29 + $0x10] sm:$0xf] %vm1253_vm3, %v1477_v28  ;;  %v1480_v34 = vpack.c.bf16 %v1100_v29, %v1100_v29  ;;  %v1098_v58 = vmax.f32 %v1066_v56, 0.0  ;;  %v1071_v35 = vadd.f32 %v1900_v14, %v1032_v30  ;;  %v607_v36 = vadd.f32 %v1603_v33, %v1873_v62 }
 0x10a   : > { %v930_v37 = vpop.f32.mrf.mxu0  ;;  %v1030_v38 = vadd.f32 %v927_v25, %v596_v32  ;;  %v598_v39 = vpop.f32.mrf.mxu1 }
 0x10b   : > { %1261 = vst.msk [vmem:[%s1908_s29 + $0x1c] sm:$0xf] %vm1253_vm3, %v1480_v34  ;;  %v1478_v40 = vpack.c.bf16 %v1098_v58, %v1098_v58  ;;  %v1103_v41 = vmax.f32 %v1071_v35, 0.0  ;;  %v1033_v42 = vadd.f32 %v1637_v31, %v607_v36  ;;  %v599_v60 = vadd.f32 %v598_v39, %v1877_v0 }
 0x10c   : > { %v1640_v44 = vpop.f32.mrf.mxu0  ;;  %v1069_v46 = vadd.f32 %v1900_v14, %v1030_v38  ;;  %v1606_v48 = vpop.f32.mrf.mxu1 }
 0x10d   : > { %1259 = vst.msk [vmem:[%s1908_s29 + $0x14] sm:$0xf] %vm1253_vm3, %v1478_v40  ;;  %v1483_v10 = vpack.c.bf16 %v1103_v41, %v1103_v41  ;;  %v1072_v62 = vadd.f32 %v1900_v14, %v1033_v42  ;;  %v1031_v11 = vadd.f32 %v930_v37, %v599_v60  ;;  %v620_v50 = vadd.f32 %v1606_v48, %v1881_v2 }
 0x10e   : > { %v943_v12 = vpop.f32.mrf.mxu0  ;;  %v1101_v13 = vmax.f32 %v1069_v46, 0.0  ;;  %v611_v15 = vpop.f32.mrf.mxu1 }
 0x10f   : > { %1264 = vst.msk [vmem:[%s1908_s29 + $0x28] sm:$0xf] %vm1253_vm3, %v1483_v10  ;;  %v1104_v0 = vmax.f32 %v1072_v62, 0.0  ;;  %v1070_v16 = vadd.f32 %v1900_v14, %v1031_v11  ;;  %v1036_v52 = vadd.f32 %v1640_v44, %v620_v50  ;;  %v612_v17 = vadd.f32 %v611_v15, %v1885_v4 }
 0x110   : > { %v1641_v18 = vpop.f32.mrf.mxu0  ;;  %v1481_v19 = vpack.c.bf16 %v1101_v13, %v1101_v13  ;;  %v1607_v20 = vpop.f32.mrf.mxu1 }
 0x111   : > { %v1484_v21 = vpack.c.bf16 %v1104_v0, %v1104_v0  ;;  %v1102_v54 = vmax.f32 %v1070_v16, 0.0  ;;  %v1075_v2 = vadd.f32 %v1900_v14, %v1036_v52  ;;  %v1034_v22 = vadd.f32 %v943_v12, %v612_v17 }
 0x112   : > { %v946_v23 = vpop.f32.mrf.mxu0  ;;  %1262 = vst.msk [vmem:[%s1908_s29 + $0x20] sm:$0xf] %vm1253_vm3, %v1481_v19  ;;  %v623_v24 = vadd.f32 %v1607_v20, %v1889_v6  ;;  %v614_v25 = vpop.f32.mrf.mxu1 }
 0x113   : > { %1265 = vst.msk [vmem:[%s1908_s29 + $0x2c] sm:$0xf] %vm1253_vm3, %v1484_v21  ;;  %v1482_v26 = vpack.c.bf16 %v1102_v54, %v1102_v54  ;;  %v1107_v4 = vmax.f32 %v1075_v2, 0.0  ;;  %v1073_v27 = vadd.f32 %v1900_v14, %v1034_v22  ;;  %v615_v28 = vadd.f32 %v614_v25, %v1893_v8 }
 0x114   : > { %v1644_v29 = vpop.f32.mrf.mxu0  ;;  %v1037_v56 = vadd.f32 %v1641_v18, %v623_v24  ;;  %v1610_v30 = vpop.f32.mrf.mxu1 }
 0x115   : > { %1263 = vst.msk [vmem:[%s1908_s29 + $0x24] sm:$0xf] %vm1253_vm3, %v1482_v26  ;;  %v1487_v31 = vpack.c.bf16 %v1107_v4, %v1107_v4  ;;  %v1105_v32 = vmax.f32 %v1073_v27, 0.0  ;;  %v1035_v33 = vadd.f32 %v946_v23, %v615_v28  ;;  %v636_v6 = vadd.f32 %v1610_v30, %v1845_v43 }
 0x116   : > { %v959_v34 = vpop.f32.mrf.mxu0  ;;  %v1076_v58 = vadd.f32 %v1900_v14, %v1037_v56  ;;  %v627_v35 = vpop.f32.mrf.mxu1 }
 0x117   : > { %1268 = vst.msk [vmem:[%s1908_s29 + $0x38] sm:$0xf] %vm1253_vm3, %v1487_v31  ;;  %v1485_v36 = vpack.c.bf16 %v1105_v32, %v1105_v32  ;;  %v1074_v8 = vadd.f32 %v1900_v14, %v1035_v33  ;;  %v1040_v37 = vadd.f32 %v1644_v29, %v636_v6  ;;  %v628_v38 = vadd.f32 %v627_v35, %v1847_v45 }
 0x118   : > { %v1645_v39 = vpop.f32.mrf.mxu0  ;;  %v1108_v40 = vmax.f32 %v1076_v58, 0.0  ;;  %v1611_v41 = vpop.f32.mrf.mxu1 }
 0x119   : > { %1266 = vst.msk [vmem:[%s1908_s29 + $0x30] sm:$0xf] %vm1253_vm3, %v1485_v36  ;;  %v1106_v43 = vmax.f32 %v1074_v8, 0.0  ;;  %v1079_v42 = vadd.f32 %v1900_v14, %v1040_v37  ;;  %v1038_v60 = vadd.f32 %v959_v34, %v628_v38  ;;  %v639_v44 = vadd.f32 %v1611_v41, %v1849_v47 }
 0x11a   : > { %v962_v46 = vpop.f32.mrf.mxu0  ;;  %v1488_v48 = vpack.c.bf16 %v1108_v40, %v1108_v40  ;;  %v630_v10 = vpop.f32.mrf.mxu1 }
 0x11b   : > { %v1486_v62 = vpack.c.bf16 %v1106_v43, %v1106_v43  ;;  %v1111_v11 = vmax.f32 %v1079_v42, 0.0  ;;  %v1077_v45 = vadd.f32 %v1900_v14, %v1038_v60  ;;  %v1041_v50 = vadd.f32 %v1645_v39, %v639_v44 }
 0x11c   : > { %v1648_v12 = vpop.f32.mrf.mxu0  ;;  %1269 = vst.msk [vmem:[%s1908_s29 + $0x3c] sm:$0xf] %vm1253_vm3, %v1488_v48  ;;  %v631_v13 = vadd.f32 %v630_v10, %v1851_v49  ;;  %v1614_v15 = vpop.f32.mrf.mxu1 }
 0x11d   : > { %1267 = vst.msk [vmem:[%s1908_s29 + $0x34] sm:$0xf] %vm1253_vm3, %v1486_v62  ;;  %v1491_v0 = vpack.c.bf16 %v1111_v11, %v1111_v11  ;;  %v1109_v47 = vmax.f32 %v1077_v45, 0.0  ;;  %v1080_v16 = vadd.f32 %v1900_v14, %v1041_v50  ;;  %v652_v52 = vadd.f32 %v1614_v15, %v1853_v51 }
 0x11e   : > { %v975_v17 = vpop.f32.mrf.mxu0  ;;  %v1039_v18 = vadd.f32 %v962_v46, %v631_v13  ;;  %v643_v19 = vpop.f32.mrf.mxu1 }
 0x11f   : > { %1272 = vst.msk [vmem:[%s1908_s29 + $0x48] sm:$0xf] %vm1253_vm3, %v1491_v0  ;;  %v1489_v20 = vpack.c.bf16 %v1109_v47, %v1109_v47  ;;  %v1112_v21 = vmax.f32 %v1080_v16, 0.0  ;;  %v1044_v54 = vadd.f32 %v1648_v12, %v652_v52  ;;  %v644_v49 = vadd.f32 %v643_v19, %v1855_v53 }
 0x120   : > { %v1649_v2 = vpop.f32.mrf.mxu0  ;;  %v1078_v22 = vadd.f32 %v1900_v14, %v1039_v18  ;;  %v1615_v23 = vpop.f32.mrf.mxu1 }
 0x121   : > { %1270 = vst.msk [vmem:[%s1908_s29 + $0x40] sm:$0xf] %vm1253_vm3, %v1489_v20  ;;  %v1492_v24 = vpack.c.bf16 %v1112_v21, %v1112_v21  ;;  %v1083_v51 = vadd.f32 %v1900_v14, %v1044_v54  ;;  %v1042_v25 = vadd.f32 %v975_v17, %v644_v49  ;;  %v655_v26 = vadd.f32 %v1615_v23, %v1859_v55 }
 0x122   : > { %v978_v4 = vpop.f32.mrf.mxu0  ;;  %v1110_v27 = vmax.f32 %v1078_v22, 0.0  ;;  %v646_v28 = vpop.f32.mrf.mxu1 }
 0x123   : > { %1273 = vst.msk [vmem:[%s1908_s29 + $0x4c] sm:$0xf] %vm1253_vm3, %v1492_v24  ;;  %v1115_v53 = vmax.f32 %v1083_v51, 0.0  ;;  %v1081_v29 = vadd.f32 %v1900_v14, %v1042_v25  ;;  %v1045_v56 = vadd.f32 %v1649_v2, %v655_v26  ;;  %v647_v30 = vadd.f32 %v646_v28, %v1863_v57 }
 0x124   : > { %v1652_v31 = vpop.f32.mrf.mxu0  ;;  %v1490_v32 = vpack.c.bf16 %v1110_v27, %v1110_v27  ;;  %v1618_v33 = vpop.f32.mrf.mxu1 }
 0x125   : > { %v1495_v6 = vpack.c.bf16 %v1115_v53, %v1115_v53  ;;  %v1113_v34 = vmax.f32 %v1081_v29, 0.0  ;;  %v1084_v55 = vadd.f32 %v1900_v14, %v1045_v56  ;;  %v1043_v58 = vadd.f32 %v978_v4, %v647_v30 }
 0x126   : > { %v991_v35 = vpop.f32.mrf.mxu0  ;;  %1271 = vst.msk [vmem:[%s1908_s29 + $0x44] sm:$0xf] %vm1253_vm3, %v1490_v32  ;;  %v668_v36 = vadd.f32 %v1618_v33, %v1867_v59  ;;  %v659_v8 = vpop.f32.mrf.mxu1 }
 0x127   : > { %1276 = vst.msk [vmem:[%s1908_s29 + $0x58] sm:$0xf] %vm1253_vm3, %v1495_v6  ;;  %v1493_v37 = vpack.c.bf16 %v1113_v34, %v1113_v34  ;;  %v1116_v57 = vmax.f32 %v1084_v55, 0.0  ;;  %v1082_v38 = vadd.f32 %v1900_v14, %v1043_v58  ;;  %v660_v39 = vadd.f32 %v659_v8, %v1871_v61 }
 0x128   : > { %v1653_v40 = vpop.f32.mrf.mxu0  ;;  %v1048_v41 = vadd.f32 %v1652_v31, %v668_v36  ;;  %v1619_v43 = vpop.f32.mrf.mxu1 }
 0x129   : > { %1274 = vst.msk [vmem:[%s1908_s29 + $0x50] sm:$0xf] %vm1253_vm3, %v1493_v37  ;;  %v1496_v42 = vpack.c.bf16 %v1116_v57, %v1116_v57  ;;  %v1114_v60 = vmax.f32 %v1082_v38, 0.0  ;;  %v1046_v44 = vadd.f32 %v991_v35, %v660_v39  ;;  %v671_v59 = vadd.f32 %v1619_v43, %v1875_v63 }
 0x12a   : > { %v994_v46 = vpop.f32.mrf.mxu0  ;;  %v1087_v48 = vadd.f32 %v1900_v14, %v1048_v41  ;;  %v662_v10 = vpop.f32.mrf.mxu1 }
 0x12b   : > { %1277 = vst.msk [vmem:[%s1908_s29 + $0x5c] sm:$0xf] %vm1253_vm3, %v1496_v42  ;;  %v1494_v62 = vpack.c.bf16 %v1114_v60, %v1114_v60  ;;  %v1085_v61 = vadd.f32 %v1900_v14, %v1046_v44  ;;  %v1049_v11 = vadd.f32 %v1653_v40, %v671_v59  ;;  %v663_v45 = vadd.f32 %v662_v10, %v1879_v1 }
 0x12c   : > { %v1656_v50 = vpop.f32.mrf.mxu0  ;;  %v1119_v12 = vmax.f32 %v1087_v48, 0.0  ;;  %v1622_v13 = vpop.f32.mrf.mxu1 }
 0x12d   : > { %1275 = vst.msk [vmem:[%s1908_s29 + $0x54] sm:$0xf] %vm1253_vm3, %v1494_v62  ;;  %v1117_v63 = vmax.f32 %v1085_v61, 0.0  ;;  %v1088_v15 = vadd.f32 %v1900_v14, %v1049_v11  ;;  %v1047_v0 = vadd.f32 %v994_v46, %v663_v45  ;;  %v684_v47 = vadd.f32 %v1622_v13, %v1883_v3 }
 0x12e   : > { %v1007_v16 = vpop.f32.mrf.mxu0  ;;  %v1499_v52 = vpack.c.bf16 %v1119_v12, %v1119_v12  ;;  %v675_v17 = vpop.f32.mrf.mxu1 }
 0x12f   : > { %v1497_v18 = vpack.c.bf16 %v1117_v63, %v1117_v63  ;;  %v1120_v19 = vmax.f32 %v1088_v15, 0.0  ;;  %v1086_v1 = vadd.f32 %v1900_v14, %v1047_v0  ;;  %v1052_v20 = vadd.f32 %v1656_v50, %v684_v47 }
 0x130   : > { %1280 = vst.msk [vmem:[%s1908_s29 + $0x68] sm:$0xf] %vm1253_vm3, %v1499_v52  ;;  %v676_v21 = vadd.f32 %v675_v17, %v1887_v5  ;;  %v1623_v54 = vpop.f32.mrf.mxu1  ;;  %v1657_v49 = vpop.f32.mrf.mxu0 }
 0x131   : > { %1278 = vst.msk [vmem:[%s1908_s29 + $0x60] sm:$0xf] %vm1253_vm3, %v1497_v18  ;;  %v1500_v2 = vpack.c.bf16 %v1120_v19, %v1120_v19  ;;  %v1118_v3 = vmax.f32 %v1086_v1, 0.0  ;;  %v1091_v22 = vadd.f32 %v1900_v14, %v1052_v20  ;;  %v687_v23 = vadd.f32 %v1623_v54, %v1891_v7 }
 0x132   : > { %v1050_v24 = vadd.f32 %v1007_v16, %v676_v21  ;;  %v678_v51 = vpop.f32.mrf.mxu1  ;;  %v1010_v28 = vpop.f32.mrf.mxu0 }
 0x133   : > { %1281 = vst.msk [vmem:[%s1908_s29 + $0x6c] sm:$0xf] %vm1253_vm3, %v1500_v2  ;;  %v1498_v25 = vpack.c.bf16 %v1118_v3, %v1118_v3  ;;  %v1123_v26 = vmax.f32 %v1091_v22, 0.0  ;;  %v1053_v5 = vadd.f32 %v1657_v49, %v687_v23  ;;  %v679_v4 = vadd.f32 %v678_v51, %v1895_v9 }
 0x134   : > { %v1089_v27 = vadd.f32 %v1900_v14, %v1050_v24 }
 0x135   : > { %1279 = vst.msk [vmem:[%s1908_s29 + $0x64] sm:$0xf] %vm1253_vm3, %v1498_v25  ;;  %v1503_v53 = vpack.c.bf16 %v1123_v26, %v1123_v26  ;;  %v1092_v7 = vadd.f32 %v1900_v14, %v1053_v5  ;;  %v1051_v29 = vadd.f32 %v1010_v28, %v679_v4 }
 0x136   : > { %v1121_v56 = vmax.f32 %v1089_v27, 0.0 }
 0x137   : > { %1284 = vst.msk [vmem:[%s1908_s29 + $0x78] sm:$0xf] %vm1253_vm3, %v1503_v53  ;;  %v1124_v30 = vmax.f32 %v1092_v7, 0.0  ;;  %v1090_v31 = vadd.f32 %v1900_v14, %v1051_v29 }
 0x138   : > { %v1501_v32 = vpack.c.bf16 %v1121_v56, %v1121_v56 }
 0x139   : > { %v1504_v33 = vpack.c.bf16 %v1124_v30, %v1124_v30  ;;  %v1122_v6 = vmax.f32 %v1090_v31, 0.0 }
 0x13a   : > { %1282 = vst.msk [vmem:[%s1908_s29 + $0x70] sm:$0xf] %vm1253_vm3, %v1501_v32 }
 0x13b   : > { %1285 = vst.msk [vmem:[%s1908_s29 + $0x7c] sm:$0xf] %vm1253_vm3, %v1504_v33  ;;  %v1502_v9 = vpack.c.bf16 %v1122_v6, %v1122_v6 }
 0x13d   : > { %1283 = vst.msk [vmem:[%s1908_s29 + $0x74] sm:$0xf] %vm1253_vm3, %v1502_v9 }
 0x13e PF: > { %s13_s12 = sadd.s32 1, %s1712_s12  }
 0x13f   : > { %p10_p4 = scmp.ge.s32.totalorder %s13_s12, 4  }
 0x141   :  { %12 = sbr.rel (!%p10_p4) target bundleno = 1 (0x1), region = 64 }

// kernel: unet_forward.10
= control target key start
LH: loop header
LB: loop body
LE: loop exit
PB: predicated region body
PF: predicated region fallthrough
CT: control target
= control target key end

     0   :  { %s293_s6 = smov 0   ;;  %s322_s0 = inlined_call_operand.vmem [shape: bf16[16,2,8,128], index: 0, kind: input, shape index: {}]   ;;  %s323_s1 = inlined_call_operand.vmem [shape: bf16[16,8,64], index: 1, kind: output, shape index: {}]  }
   0x1 LB: > { %s252_s7 = sadd.s32 4294967295, %s280_s6   ;;  %p256_p0 = scmp.ge.s32.totalorder %s280_s6, 1  ;;  %s280_s6 = sphi %s293_s6, %s11_s6  }
   0x2   : > { %p89_p1 = scmp.lt.s32.totalorder %s280_s6, 3 }
   0x4   : > { %p90_p2 = pnand %p256_p0, %p89_p1 }
   0x5   : > { %s257_s8 = sshll.u32 (!%p90_p2), %s252_s7, 3  ;;  %s282_s13 = smov (!%p90_p2), 64  }
   0x6   : > { %93 = sbr.rel (%p90_p2) target bundleno = 148 (0x94), region = 24  ;;  %p111_p3 = scmp.lt.s32.totalorder (!%p90_p2), %s257_s8, 15 }
   0xb   : > { %s325_s8 = smov (!%p111_p3, %s257_s8), 15  ;;  %vm187_vm0 = vcmask 519168  }
   0xc   : > { %s264_s9 = sshll.u32 %s325_s8, 3  ;;  %s261_s14 = sshll.u32 %s325_s8, 2 }
   0xd   : > { %s115_s12 = scalar_lea.vmem %s322_s0, %s264_s9  ;;  %s121_s17 = scalar_lea.vmem %s323_s1, %s261_s14 }
   0xe   : > { %v127_v0 = vld [vmem:[%s115_s12 + $0x10] sm:$0xf]  ;;  %v128_v1 = vld [vmem:[%s115_s12 + $0x14] sm:$0xf]  ;;  %v123_v2 = vld [vmem:[%s115_s12] sm:$0xf] }
   0xf   : > { %v141_v3 = vmax.bf16 %v128_v1, %v127_v0  ;;  %v124_v4 = vld [vmem:[%s115_s12 + $0x4] sm:$0xf]  ;;  %v129_v5 = vld [vmem:[%s115_s12 + $0x18] sm:$0xf]  ;;  %v130_v6 = vld [vmem:[%s115_s12 + $0x1c] sm:$0xf] }
  0x10   : > { %v139_v7 = vmax.bf16 %v124_v4, %v123_v2  ;;  %v125_v8 = vld [vmem:[%s115_s12 + $0x8] sm:$0xf]  ;;  %v126_v9 = vld [vmem:[%s115_s12 + $0xc] sm:$0xf]  ;;  %v142_v10 = vmax.bf16 %v130_v6, %v129_v5  ;;  %v131_v14 = vld [vmem:[%s115_s12 + $0x20] sm:$0xf] }
  0x11   : > { %159 = vrot.lane.b32.xlu1 %v141_v3, %s282_s13  ;;  %v140_v11 = vmax.bf16 %v126_v9, %v125_v8  ;;  %v133_v12 = vld [vmem:[%s115_s12 + $0x28] sm:$0xf]  ;;  %v134_v13 = vld [vmem:[%s115_s12 + $0x2c] sm:$0xf]  ;;  %v132_v15 = vld [vmem:[%s115_s12 + $0x24] sm:$0xf] }
  0x12   : > { %155 = vrot.lane.b32.xlu0 %v139_v7, %s282_s13  ;;  %v144_v16 = vmax.bf16 %v134_v13, %v133_v12  ;;  %v143_v17 = vmax.bf16 %v132_v15, %v131_v14  ;;  %v137_v18 = vld [vmem:[%s115_s12 + $0x38] sm:$0xf]  ;;  %v138_v19 = vld [vmem:[%s115_s12 + $0x3c] sm:$0xf]  ;;  %v135_v20 = vld [vmem:[%s115_s12 + $0x30] sm:$0xf] }
  0x13   : > { %v136_v21 = vld [vmem:[%s115_s12 + $0x34] sm:$0xf]  ;;  %v146_v22 = vmax.bf16 %v138_v19, %v137_v18 }
  0x14   : > { %v145_v23 = vmax.bf16 %v136_v21, %v135_v20 }
  0x15   : > { %161 = vrot.lane.b32.xlu1 %v142_v10, %s282_s13 }
  0x16   : > { %157 = vrot.lane.b32.xlu0 %v140_v11, %s282_s13 }
  0x19   : > { %165 = vrot.lane.b32.xlu1 %v144_v16, %s282_s13 }
  0x1a   : > { %163 = vrot.lane.b32.xlu0 %v143_v17, %s282_s13 }
  0x1d   : > { %169 = vrot.lane.b32.xlu1 %v146_v22, %s282_s13 }
  0x1e   : > { %167 = vrot.lane.b32.xlu0 %v145_v23, %s282_s13 }
  0x83   : > { %v160_v24 = vpop.permute.xlu1 %159 }
  0x84   : > { %v181_v25 = vmax.bf16 %v160_v24, %v141_v3  ;;  %v156_v26 = vpop.permute.xlu0 %155 }
  0x85   : > { %v179_v27 = vmax.bf16 %v156_v26, %v139_v7 }
  0x86   : > { %190 = vst.msk [vmem:[%s121_s17 + $0x8] sm:$0xf] %vm187_vm0, %v181_v25 }
  0x87   : > { %188 = vst.msk [vmem:[%s121_s17] sm:$0xf] %vm187_vm0, %v179_v27  ;;  %v162_v28 = vpop.permute.xlu1 %161 }
  0x88   : > { %v182_v29 = vmax.bf16 %v162_v28, %v142_v10  ;;  %v158_v30 = vpop.permute.xlu0 %157 }
  0x89   : > { %v180_v31 = vmax.bf16 %v158_v30, %v140_v11 }
  0x8a   : > { %191 = vst.msk [vmem:[%s121_s17 + $0xc] sm:$0xf] %vm187_vm0, %v182_v29 }
  0x8b   : > { %189 = vst.msk [vmem:[%s121_s17 + $0x4] sm:$0xf] %vm187_vm0, %v180_v31  ;;  %v166_v32 = vpop.permute.xlu1 %165 }
  0x8c   : > { %v184_v33 = vmax.bf16 %v166_v32, %v144_v16  ;;  %v164_v34 = vpop.permute.xlu0 %163 }
  0x8d   : > { %v183_v35 = vmax.bf16 %v164_v34, %v143_v17 }
  0x8e   : > { %193 = vst.msk [vmem:[%s121_s17 + $0x14] sm:$0xf] %vm187_vm0, %v184_v33 }
  0x8f   : > { %192 = vst.msk [vmem:[%s121_s17 + $0x10] sm:$0xf] %vm187_vm0, %v183_v35  ;;  %v170_v36 = vpop.permute.xlu1 %169 }
  0x90   : > { %v186_v37 = vmax.bf16 %v170_v36, %v146_v22  ;;  %v168_v38 = vpop.permute.xlu0 %167 }
  0x91   : > { %v185_v39 = vmax.bf16 %v168_v38, %v145_v23 }
  0x92   : > { %195 = vst.msk [vmem:[%s121_s17 + $0x1c] sm:$0xf] %vm187_vm0, %v186_v37 }
  0x93   : > { %194 = vst.msk [vmem:[%s121_s17 + $0x18] sm:$0xf] %vm187_vm0, %v185_v39 }
  0x94 PF: > { %s11_s6 = sadd.s32 1, %s280_s6  }
  0x95   : > { %p8_p4 = scmp.ge.s32.totalorder %s11_s6, 4  }
  0x97   :  { %10 = sbr.rel (!%p8_p4) target bundleno = 1 (0x1), region = 54 }

// kernel: unet_forward.9
= control target key start
LH: loop header
LB: loop body
LE: loop exit
PB: predicated region body
PF: predicated region fallthrough
CT: control target
= control target key end

     0   :  { %s2154_s12 = smov 0   ;;  %s2747_s0 = inlined_call_operand.vmem [shape: bf16[2,288,192], index: 0, kind: input, shape index: {}]   ;;  %s2748_s1 = inlined_call_operand.vmem [shape: bf16[3,192,64], index: 1, kind: input, shape index: {}]   ;;  %s2749_s2 = inlined_call_operand.vmem [shape: f32[1,64], index: 2, kind: input, shape index: {}]   ;;  %s2750_s3 = inlined_call_operand.vmem [shape: bf16[2,256,64], index: 3, kind: output, shape index: {}]  }
   0x1 LB: > { %s1727_s13 = sadd.s32 4294967295, %s2131_s12   ;;  %p1731_p0 = scmp.ge.s32.totalorder %s2131_s12, 1  ;;  %s2131_s12 = sphi %s2154_s12, %s13_s12  }
   0x2   : > { %p137_p1 = scmp.lt.s32.totalorder %s2131_s12, 3 }
   0x4   : > { %p138_p2 = pnand %p1731_p0, %p137_p1 }
   0x5   : > { %p161_p3 = scmp.lt.s32.totalorder (!%p138_p2), %s1727_s13, 1 }
   0x6   : > { %141 = sbr.rel (%p138_p2) target bundleno = 452 (0x1c4), region = 32 }
   0xb   : > { %v2035_v0 = vld [vmem:[%s2748_s1 + $0x98] sm:$0xff]   ;;  %v2133_v1 = vmov 0   ;;  %v2036_v2 = vld [vmem:[%s2748_s1 + $0x90] sm:$0xff]   ;;  %s2752_s13 = smov (!%p161_p3, %s1727_s13), 1  ;;  %v2037_v3 = vld [vmem:[%s2748_s1 + $0x88] sm:$0xff]   ;;  %vm471_vm0 = vcmask 523264  }
   0xc   : > { %520 = vmatprep.subr.bf16.mxu0 %v2133_v1  ;;  %2001 = vmatprep.subr.bf16.mxu1 %v2133_v1  ;;  %s2025_s20 = smul.u32 288, %s2752_s13  ;;  %v2038_v4 = vld [vmem:[%s2748_s1 + $0x80] sm:$0xff]   ;;  %v2039_v6 = vld [vmem:[%s2748_s1 + $0x78] sm:$0xff]   ;;  %v2040_v8 = vld [vmem:[%s2748_s1 + $0x70] sm:$0xff]   ;;  %s1968_s18 = sshll.u32 %s2752_s13, 7  ;;  %vm1639_vm1 = vcmask 519168  }
   0xd   : > { %521 = vmatpush1.bf16.msra.mxu0 %v2035_v0  ;;  %2013 = vmatpush1.bf16.msra.mxu1 %v2035_v0  ;;  %v2041_v9 = vld [vmem:[%s2748_s1 + $0x68] sm:$0xff]   ;;  %v2042_v10 = vld [vmem:[%s2748_s1 + $0x60] sm:$0xff]   ;;  %v2043_v11 = vld [vmem:[%s2748_s1 + $0xb8] sm:$0xff]   ;;  %s2617_s21 = scalar_lea.vmem %s2750_s3, %s1968_s18 }
   0xe   : > { %522 = vmatprep.subr.bf16.mxu0 %v2133_v1  ;;  %2002 = vmatprep.subr.bf16.mxu1 %v2133_v1  ;;  %s2186_s25 = scalar_lea.vmem %s2747_s0, %s2025_s20  ;;  %v2044_v12 = vld [vmem:[%s2748_s1 + $0xb0] sm:$0xff]   ;;  %v2045_v13 = vld [vmem:[%s2748_s1 + $0xa8] sm:$0xff]   ;;  %v2046_v14 = vld [vmem:[%s2748_s1 + $0xa0] sm:$0xff]  }
   0xf   : > { %v2191_v5 = vld [vmem:[%s2186_s25 + $0x14] ss:$8 sps:$4 sm:$0xff]   ;;  %v2241_v15 = vld [vmem:[%s2186_s25 + $0x10] ss:$8 sps:$4 sm:$0xff]   ;;  %v2255_v19 = vld [vmem:[%s2186_s25 + $0x24] ss:$8 sps:$4 sm:$0xff]  }
  0x10   : > { %v2197_v7 = vld [vmem:[%s2186_s25 + $0x94] ss:$8 sps:$4 sm:$0xff]   ;;  %1803 = vmatprep.mubr.msk.bf16.mxu0 %vm471_vm0, %v2191_v5  ;;  %v2244_v16 = vld [vmem:[%s2186_s25 + $0x90] ss:$8 sps:$4 sm:$0xff]   ;;  %v2258_v20 = vld [vmem:[%s2186_s25 + $0xa4] ss:$8 sps:$4 sm:$0xff]  }
  0x11   : > { %523 = vmatpush1.bf16.msra.mxu0 %v2036_v2  ;;  %2014 = vmatpush1.bf16.msra.mxu1 %v2036_v2  ;;  %v2053_v17 = vld [vmem:[%s2748_s1 + $0x38] sm:$0xff]   ;;  %v2059_v21 = vld [vmem:[%s2748_s1 + $0x30] sm:$0xff]   ;;  %v2272_v23 = vld [vmem:[%s2186_s25 + $0x20] ss:$8 sps:$4 sm:$0xff]  }
  0x12   : > { %524 = vmatprep.subr.bf16.mxu0 %v2133_v1  ;;  %2003 = vmatprep.subr.bf16.mxu1 %v2133_v1  ;;  %v2054_v18 = vld [vmem:[%s2748_s1 + $0xf8] sm:$0xff]   ;;  %v2062_v22 = vld [vmem:[%s2748_s1 + $0xf0] sm:$0xff]   ;;  %v2277_v24 = vld [vmem:[%s2186_s25 + $0xa0] ss:$8 sps:$4 sm:$0xff]  }
  0x13   : > { %1811 = vmatprep.mubr.msk.bf16.mxu1 %vm471_vm0, %v2197_v7  ;;  %v2063_v25 = vld [vmem:[%s2748_s1 + $0x28] sm:$0xff]   ;;  %v2287_v27 = vld [vmem:[%s2186_s25 + $0x34] ss:$8 sps:$4 sm:$0xff]   ;;  %v2071_v29 = vld [vmem:[%s2748_s1 + $0x20] sm:$0xff]  }
  0x14   : > { %v2064_v26 = vld [vmem:[%s2748_s1 + $0xe8] sm:$0xff]   ;;  %v2292_v28 = vld [vmem:[%s2186_s25 + $0xb4] ss:$8 sps:$4 sm:$0xff]   ;;  %v2072_v30 = vld [vmem:[%s2748_s1 + $0xe0] sm:$0xff]  }
  0x15   : > { %525 = vmatpush1.bf16.msra.mxu0 %v2037_v3  ;;  %2015 = vmatpush1.bf16.msra.mxu1 %v2037_v3  ;;  %v2309_v31 = vld [vmem:[%s2186_s25 + $0x30] ss:$8 sps:$4 sm:$0xff]   ;;  %v2315_v33 = vld [vmem:[%s2186_s25 + $0x44] ss:$8 sps:$4 sm:$0xff]   ;;  %v2343_v39 = vld [vmem:[%s2186_s25 + $0x40] ss:$8 sps:$4 sm:$0xff]  }
  0x16   : > { %526 = vmatprep.subr.bf16.mxu0 %v2133_v1  ;;  %2004 = vmatprep.subr.bf16.mxu1 %v2133_v1  ;;  %v2312_v32 = vld [vmem:[%s2186_s25 + $0xb0] ss:$8 sps:$4 sm:$0xff]   ;;  %v2318_v34 = vld [vmem:[%s2186_s25 + $0xc4] ss:$8 sps:$4 sm:$0xff]   ;;  %v2346_v40 = vld [vmem:[%s2186_s25 + $0xc0] ss:$8 sps:$4 sm:$0xff]  }
  0x17   : > { %v2077_v35 = vld [vmem:[%s2748_s1 + $0x18] sm:$0xff]   ;;  %v2081_v37 = vld [vmem:[%s2748_s1 + $0x10] sm:$0xff]   ;;  %v2089_v43 = vld [vmem:[%s2748_s1 + $0x8] sm:$0xff]  }
  0x18   : > { %v2080_v36 = vld [vmem:[%s2748_s1 + $0xd8] sm:$0xff]   ;;  %v2082_v38 = vld [vmem:[%s2748_s1 + $0xd0] sm:$0xff]   ;;  %v2090_v44 = vld [vmem:[%s2748_s1 + $0xc8] sm:$0xff]  }
  0x19   : > { %527 = vmatpush1.bf16.msra.mxu0 %v2038_v4  ;;  %2016 = vmatpush1.bf16.msra.mxu1 %v2038_v4  ;;  %v2349_v41 = vld [vmem:[%s2186_s25 + $0x54] ss:$8 sps:$4 sm:$0xff]   ;;  %v2095_v45 = vld [vmem:[%s2748_s1] sm:$0xff]   ;;  %v2377_v47 = vld [vmem:[%s2186_s25 + $0x50] ss:$8 sps:$4 sm:$0xff]  }
  0x1a   : > { %528 = vmatprep.subr.bf16.mxu0 %v2133_v1  ;;  %2005 = vmatprep.subr.bf16.mxu1 %v2133_v1  ;;  %v2352_v42 = vld [vmem:[%s2186_s25 + $0xd4] ss:$8 sps:$4 sm:$0xff]   ;;  %v2098_v46 = vld [vmem:[%s2748_s1 + $0xc0] sm:$0xff]   ;;  %v2380_v48 = vld [vmem:[%s2186_s25 + $0xd0] ss:$8 sps:$4 sm:$0xff]  }
  0x1b   : > { %v2383_v49 = vld [vmem:[%s2186_s25 + $0x64] ss:$8 sps:$4 sm:$0xff]   ;;  %v2099_v51 = vld [vmem:[%s2748_s1 + $0x58] sm:$0xff]   ;;  %v2107_v53 = vld [vmem:[%s2748_s1 + $0x50] sm:$0xff]  }
  0x1c   : > { %v2386_v50 = vld [vmem:[%s2186_s25 + $0xe4] ss:$8 sps:$4 sm:$0xff]   ;;  %v2100_v52 = vld [vmem:[%s2748_s1 + $0x118] sm:$0xff]   ;;  %v2108_v54 = vld [vmem:[%s2748_s1 + $0x110] sm:$0xff]  }
  0x1d   : > { %529 = vmatpush1.bf16.msra.mxu0 %v2039_v6  ;;  %2017 = vmatpush1.bf16.msra.mxu1 %v2039_v6  ;;  %v2096_v55 = vld [vmem:[%s2186_s25 + $0x60] ss:$8 sps:$4 sm:$0xff]   ;;  %v2101_v57 = vld [vmem:[%s2186_s25 + $0x74] ss:$8 sps:$4 sm:$0xff]   ;;  %v2105_v63 = vld [vmem:[%s2186_s25 + $0x70] ss:$8 sps:$4 sm:$0xff]  }
  0x1e   : > { %530 = vmatprep.subr.bf16.mxu0 %v2133_v1  ;;  %2006 = vmatprep.subr.bf16.mxu1 %v2133_v1  ;;  %v2412_v56 = vld [vmem:[%s2186_s25 + $0xe0] ss:$8 sps:$4 sm:$0xff]   ;;  %v2416_v58 = vld [vmem:[%s2186_s25 + $0xf4] ss:$8 sps:$4 sm:$0xff]   ;;  %v2440_v0 = vld [vmem:[%s2186_s25 + $0xf0] ss:$8 sps:$4 sm:$0xff]  }
  0x1f   : > { %v2113_v59 = vld [vmem:[%s2748_s1 + $0x48] sm:$0xff]   ;;  %v2117_v61 = vld [vmem:[%s2748_s1 + $0x40] sm:$0xff]  }
  0x20   : > { %v2116_v60 = vld [vmem:[%s2748_s1 + $0x108] sm:$0xff]   ;;  %v2118_v62 = vld [vmem:[%s2748_s1 + $0x100] sm:$0xff]  }
  0x21   : > { %531 = vmatpush1.bf16.msra.mxu0 %v2040_v8  ;;  %2018 = vmatpush1.bf16.msra.mxu1 %v2040_v8  ;;  %v2109_v2 = vld [vmem:[%s2186_s25 + $0x84] ss:$8 sps:$4 sm:$0xff]   ;;  %v2114_v4 = vld [vmem:[%s2186_s25 + $0x80] ss:$8 sps:$4 sm:$0xff]  }
  0x22   : > { %532 = vmatprep.subr.bf16.mxu0 %v2133_v1  ;;  %2007 = vmatprep.subr.bf16.mxu1 %v2133_v1  ;;  %v2444_v3 = vld [vmem:[%s2186_s25 + $0x104] ss:$8 sps:$4 sm:$0xff]   ;;  %v2452_v6 = vld [vmem:[%s2186_s25 + $0x100] ss:$8 sps:$4 sm:$0xff]  }
  0x23   : > { %v2119_v8 = vld [vmem:[%s2186_s25] ss:$8 sps:$4 sm:$0xff]  }
  0x25   : > { %533 = vmatpush1.bf16.msra.mxu0 %v2041_v9  ;;  %2019 = vmatpush1.bf16.msra.mxu1 %v2041_v9 }
  0x26   : > { %534 = vmatprep.subr.bf16.mxu0 %v2133_v1  ;;  %2008 = vmatprep.subr.bf16.mxu1 %v2133_v1 }
  0x29   : > { %535 = vmatpush1.bf16.msra.mxu0 %v2042_v10  ;;  %2020 = vmatpush1.bf16.msra.mxu1 %v2042_v10 }
  0x2a   : > { %544 = vmatprep.subr.bf16.mxu0 %v2133_v1  ;;  %2009 = vmatprep.subr.bf16.mxu1 %v2133_v1 }
  0x2d   : > { %545 = vmatpush2.bf16.msra.mxu0 %v2043_v11  ;;  %2021 = vmatpush2.bf16.msra.mxu1 %v2043_v11 }
  0x2e   : > { %546 = vmatprep.subr.bf16.mxu0 %v2133_v1  ;;  %2010 = vmatprep.subr.bf16.mxu1 %v2133_v1 }
  0x31   : > { %547 = vmatpush2.bf16.msra.mxu0 %v2044_v12  ;;  %2022 = vmatpush2.bf16.msra.mxu1 %v2044_v12 }
  0x32   : > { %548 = vmatprep.subr.bf16.mxu0 %v2133_v1  ;;  %2011 = vmatprep.subr.bf16.mxu1 %v2133_v1 }
  0x35   : > { %549 = vmatpush2.bf16.msra.mxu0 %v2045_v13  ;;  %2023 = vmatpush2.bf16.msra.mxu1 %v2045_v13 }
  0x36   : > { %550 = vmatprep.subr.bf16.mxu0 %v2133_v1  ;;  %2012 = vmatprep.subr.bf16.mxu1 %v2133_v1 }
  0x39   : > { %551 = vmatpush2.bf16.msra.mxu0 %v2046_v14  ;;  %2024 = vmatpush2.bf16.msra.mxu1 %v2046_v14 }
  0x3a   : > { %765 = vmatprep.subr.bf16.mxu1 %v2133_v1  ;;  %1247 = vmatprep.subr.bf16.mxu0 %v2133_v1 }
  0x3c   : > { %553 = vmatmul.mubr.bf16.vlgmr.msra.gmra.mxu0 %v2241_v15  ;;  %617 = vmatmul.mubr.bf16.vlgmr.msra.gmra.mxu1 %v2244_v16 }
  0x3d   : > { %766 = vmatpush1.bf16.msra.mxu1 %v2053_v17  ;;  %1248 = vmatpush1.bf16.msra.mxu0 %v2054_v18 }
  0x3e   : > { %767 = vmatprep.subr.bf16.mxu1 %v2133_v1  ;;  %1804 = vmatprep.mubr.msk.bf16.mxu0 %vm471_vm0, %v2255_v19 }
  0x3f   : > { %1812 = vmatprep.mubr.msk.bf16.mxu1 %vm471_vm0, %v2258_v20  ;;  %1249 = vmatprep.subr.bf16.mxu0 %v2133_v1 }
  0x41   : > { %768 = vmatpush1.bf16.msra.mxu1 %v2059_v21  ;;  %1250 = vmatpush1.bf16.msra.mxu0 %v2062_v22 }
  0x42   : > { %769 = vmatprep.subr.bf16.mxu1 %v2133_v1  ;;  %1251 = vmatprep.subr.bf16.mxu0 %v2133_v1 }
  0x44   : > { %561 = vmatmul.mubr.bf16.gmra.mxu0 %v2272_v23  ;;  %625 = vmatmul.mubr.bf16.gmra.mxu1 %v2277_v24 }
  0x45   : > { %770 = vmatpush1.bf16.msra.mxu1 %v2063_v25  ;;  %1252 = vmatpush1.bf16.msra.mxu0 %v2064_v26 }
  0x46   : > { %1805 = vmatprep.mubr.msk.bf16.mxu0 %vm471_vm0, %v2287_v27  ;;  %1813 = vmatprep.mubr.msk.bf16.mxu1 %vm471_vm0, %v2292_v28 }
  0x47   : > { %771 = vmatprep.subr.bf16.mxu1 %v2133_v1  ;;  %1253 = vmatprep.subr.bf16.mxu0 %v2133_v1 }
  0x49   : > { %772 = vmatpush1.bf16.msra.mxu1 %v2071_v29  ;;  %1254 = vmatpush1.bf16.msra.mxu0 %v2072_v30 }
  0x4a   : > { %773 = vmatprep.subr.bf16.mxu1 %v2133_v1  ;;  %1255 = vmatprep.subr.bf16.mxu0 %v2133_v1 }
  0x4c   : > { %569 = vmatmul.mubr.bf16.gmra.mxu0 %v2309_v31  ;;  %633 = vmatmul.mubr.bf16.gmra.mxu1 %v2312_v32 }
  0x4d   : > { %1806 = vmatprep.mubr.msk.bf16.mxu0 %vm471_vm0, %v2315_v33  ;;  %1814 = vmatprep.mubr.msk.bf16.mxu1 %vm471_vm0, %v2318_v34 }
  0x4e   : > { %774 = vmatpush1.bf16.msra.mxu1 %v2077_v35  ;;  %1256 = vmatpush1.bf16.msra.mxu0 %v2080_v36 }
  0x4f   : > { %775 = vmatprep.subr.bf16.mxu1 %v2133_v1  ;;  %1257 = vmatprep.subr.bf16.mxu0 %v2133_v1 }
  0x52   : > { %776 = vmatpush1.bf16.msra.mxu1 %v2081_v37  ;;  %1258 = vmatpush1.bf16.msra.mxu0 %v2082_v38 }
  0x53   : > { %777 = vmatprep.subr.bf16.mxu1 %v2133_v1  ;;  %1259 = vmatprep.subr.bf16.mxu0 %v2133_v1 }
  0x54   : > { %577 = vmatmul.mubr.bf16.gmra.mxu0 %v2343_v39  ;;  %641 = vmatmul.mubr.bf16.gmra.mxu1 %v2346_v40 }
  0x55   : > { %1807 = vmatprep.mubr.msk.bf16.mxu0 %vm471_vm0, %v2349_v41  ;;  %1815 = vmatprep.mubr.msk.bf16.mxu1 %vm471_vm0, %v2352_v42 }
  0x56   : > { %778 = vmatpush1.bf16.msra.mxu1 %v2089_v43  ;;  %1260 = vmatpush1.bf16.msra.mxu0 %v2090_v44 }
  0x57   : > { %779 = vmatprep.subr.bf16.mxu1 %v2133_v1  ;;  %1261 = vmatprep.subr.bf16.mxu0 %v2133_v1 }
  0x5a   : > { %780 = vmatpush1.bf16.msra.mxu1 %v2095_v45  ;;  %1262 = vmatpush1.bf16.msra.mxu0 %v2098_v46 }
  0x5b   : > { %789 = vmatprep.subr.bf16.mxu1 %v2133_v1  ;;  %1271 = vmatprep.subr.bf16.mxu0 %v2133_v1 }
  0x5c   : > { %585 = vmatmul.mubr.bf16.gmra.mxu0 %v2377_v47  ;;  %649 = vmatmul.mubr.bf16.gmra.mxu1 %v2380_v48 }
  0x5d   : > { %1808 = vmatprep.mubr.msk.bf16.mxu0 %vm471_vm0, %v2383_v49  ;;  %1816 = vmatprep.mubr.msk.bf16.mxu1 %vm471_vm0, %v2386_v50 }
  0x5e   : > { %790 = vmatpush2.bf16.msra.mxu1 %v2099_v51  ;;  %1272 = vmatpush2.bf16.msra.mxu0 %v2100_v52 }
  0x5f   : > { %791 = vmatprep.subr.bf16.mxu1 %v2133_v1  ;;  %1273 = vmatprep.subr.bf16.mxu0 %v2133_v1 }
  0x62   : > { %792 = vmatpush2.bf16.msra.mxu1 %v2107_v53  ;;  %1274 = vmatpush2.bf16.msra.mxu0 %v2108_v54 }
  0x63   : > { %793 = vmatprep.subr.bf16.mxu1 %v2133_v1  ;;  %1275 = vmatprep.subr.bf16.mxu0 %v2133_v1 }
  0x64   : > { %593 = vmatmul.mubr.bf16.gmra.mxu0 %v2096_v55  ;;  %657 = vmatmul.mubr.bf16.gmra.mxu1 %v2412_v56 }
  0x65   : > { %1809 = vmatprep.mubr.msk.bf16.mxu0 %vm471_vm0, %v2101_v57  ;;  %1817 = vmatprep.mubr.msk.bf16.mxu1 %vm471_vm0, %v2416_v58 }
  0x66   : > { %794 = vmatpush2.bf16.msra.mxu1 %v2113_v59  ;;  %1276 = vmatpush2.bf16.msra.mxu0 %v2116_v60 }
  0x67   : > { %795 = vmatprep.subr.bf16.mxu1 %v2133_v1  ;;  %1277 = vmatprep.subr.bf16.mxu0 %v2133_v1  ;;  %v2121_v1 = vld [vmem:[%s2186_s25 + $0x4] ss:$8 sps:$4 sm:$0xff]  }
  0x6a   : > { %796 = vmatpush2.bf16.msra.mxu1 %v2117_v61  ;;  %1278 = vmatpush2.bf16.msra.mxu0 %v2118_v62 }
  0x6c   : > { %601 = vmatmul.mubr.bf16.gmra.mxu0 %v2105_v63  ;;  %665 = vmatmul.mubr.bf16.gmra.mxu1 %v2440_v0 }
  0x6d   : > { %1810 = vmatprep.mubr.msk.bf16.mxu0 %vm471_vm0, %v2109_v2  ;;  %1818 = vmatprep.mubr.msk.bf16.mxu1 %vm471_vm0, %v2444_v3 }
  0x74   : > { %609 = vmatmul.mubr.bf16.gmra.mxu0 %v2114_v4  ;;  %673 = vmatmul.mubr.bf16.gmra.mxu1 %v2452_v6 }
  0x75   : > { %1833 = vmatprep.mubr.msk.bf16.mxu1 %vm471_vm0, %v2121_v1  ;;  %1917 = vmatprep.mubr.msk.bf16.mxu0 %vm471_vm0, %v2255_v19 }
  0x7c   : > { %798 = vmatmul.mubr.bf16.vlgmr.msra.gmra.mxu1 %v2119_v8  ;;  %1280 = vmatmul.mubr.bf16.vlgmr.msra.gmra.mxu0 %v2272_v23 }
  0x7d   : > { %1834 = vmatprep.mubr.msk.bf16.mxu1 %vm471_vm0, %v2191_v5  ;;  %1918 = vmatprep.mubr.msk.bf16.mxu0 %vm471_vm0, %v2287_v27  ;;  %v2122_v5 = vld [vmem:[%s2186_s25 + $0x114] ss:$8 sps:$4 sm:$0xff]  }
  0x84   : > { %806 = vmatmul.mubr.bf16.gmra.mxu1 %v2241_v15  ;;  %1288 = vmatmul.mubr.bf16.gmra.mxu0 %v2309_v31 }
  0x85   : > { %1835 = vmatprep.mubr.msk.bf16.mxu1 %vm471_vm0, %v2255_v19  ;;  %1919 = vmatprep.mubr.msk.bf16.mxu0 %vm471_vm0, %v2315_v33 }
  0x8c   : > { %814 = vmatmul.mubr.bf16.gmra.mxu1 %v2272_v23  ;;  %1296 = vmatmul.mubr.bf16.gmra.mxu0 %v2343_v39 }
  0x8d   : > { %1836 = vmatprep.mubr.msk.bf16.mxu1 %vm471_vm0, %v2287_v27  ;;  %1920 = vmatprep.mubr.msk.bf16.mxu0 %vm471_vm0, %v2349_v41 }
  0x94   : > { %822 = vmatmul.mubr.bf16.gmra.mxu1 %v2309_v31  ;;  %1304 = vmatmul.mubr.bf16.gmra.mxu0 %v2377_v47 }
  0x95   : > { %1837 = vmatprep.mubr.msk.bf16.mxu1 %vm471_vm0, %v2315_v33  ;;  %1921 = vmatprep.mubr.msk.bf16.mxu0 %vm471_vm0, %v2383_v49 }
  0x9c   : > { %830 = vmatmul.mubr.bf16.gmra.mxu1 %v2343_v39  ;;  %1312 = vmatmul.mubr.bf16.gmra.mxu0 %v2096_v55 }
  0x9d   : > { %1838 = vmatprep.mubr.msk.bf16.mxu1 %vm471_vm0, %v2349_v41  ;;  %1922 = vmatprep.mubr.msk.bf16.mxu0 %vm471_vm0, %v2101_v57 }
  0xa4   : > { %838 = vmatmul.mubr.bf16.gmra.mxu1 %v2377_v47  ;;  %1320 = vmatmul.mubr.bf16.gmra.mxu0 %v2105_v63 }
  0xa5   : > { %1839 = vmatprep.mubr.msk.bf16.mxu1 %vm471_vm0, %v2383_v49  ;;  %1923 = vmatprep.mubr.msk.bf16.mxu0 %vm471_vm0, %v2109_v2 }
  0xac   : > { %846 = vmatmul.mubr.bf16.gmra.mxu1 %v2096_v55  ;;  %1328 = vmatmul.mubr.bf16.gmra.mxu0 %v2114_v4 }
  0xad   : > { %1840 = vmatprep.mubr.msk.bf16.mxu1 %vm471_vm0, %v2101_v57  ;;  %1924 = vmatprep.mubr.msk.bf16.mxu0 %vm471_vm0, %v2197_v7 }
  0xb4   : > { %854 = vmatmul.mubr.bf16.gmra.mxu1 %v2105_v63  ;;  %1336 = vmatmul.mubr.bf16.gmra.mxu0 %v2244_v16 }
  0xb5   : > { %1841 = vmatprep.mubr.msk.bf16.mxu1 %vm471_vm0, %v2109_v2  ;;  %1925 = vmatprep.mubr.msk.bf16.mxu0 %vm471_vm0, %v2258_v20 }
  0xbc   : > { %862 = vmatmul.mubr.bf16.gmra.mxu1 %v2114_v4  ;;  %1344 = vmatmul.mubr.bf16.gmra.mxu0 %v2277_v24 }
  0xbd   : > { %1842 = vmatprep.mubr.msk.bf16.mxu1 %vm471_vm0, %v2197_v7  ;;  %1926 = vmatprep.mubr.msk.bf16.mxu0 %vm471_vm0, %v2292_v28  ;;  %v2124_v7 = vld [vmem:[%s2186_s25 + $0x110] ss:$8 sps:$4 sm:$0xff]  }
  0xc4   : > { %870 = vmatmul.mubr.bf16.gmra.mxu1 %v2244_v16  ;;  %1352 = vmatmul.mubr.bf16.gmra.mxu0 %v2312_v32 }
  0xc5   : > { %1843 = vmatprep.mubr.msk.bf16.mxu1 %vm471_vm0, %v2258_v20  ;;  %1927 = vmatprep.mubr.msk.bf16.mxu0 %vm471_vm0, %v2318_v34 }
  0xcc   : > { %878 = vmatmul.mubr.bf16.gmra.mxu1 %v2277_v24  ;;  %1360 = vmatmul.mubr.bf16.gmra.mxu0 %v2346_v40 }
  0xcd   : > { %1844 = vmatprep.mubr.msk.bf16.mxu1 %vm471_vm0, %v2292_v28  ;;  %1928 = vmatprep.mubr.msk.bf16.mxu0 %vm471_vm0, %v2352_v42 }
  0xd4   : > { %886 = vmatmul.mubr.bf16.gmra.mxu1 %v2312_v32  ;;  %1368 = vmatmul.mubr.bf16.gmra.mxu0 %v2380_v48 }
  0xd5   : > { %1845 = vmatprep.mubr.msk.bf16.mxu1 %vm471_vm0, %v2318_v34  ;;  %1929 = vmatprep.mubr.msk.bf16.mxu0 %vm471_vm0, %v2386_v50 }
  0xdc   : > { %894 = vmatmul.mubr.bf16.gmra.mxu1 %v2346_v40  ;;  %1376 = vmatmul.mubr.bf16.gmra.mxu0 %v2412_v56 }
  0xdd   : > { %1846 = vmatprep.mubr.msk.bf16.mxu1 %vm471_vm0, %v2352_v42  ;;  %1930 = vmatprep.mubr.msk.bf16.mxu0 %vm471_vm0, %v2416_v58 }
  0xe4   : > { %902 = vmatmul.mubr.bf16.gmra.mxu1 %v2380_v48  ;;  %1384 = vmatmul.mubr.bf16.gmra.mxu0 %v2440_v0 }
  0xe5   : > { %1847 = vmatprep.mubr.msk.bf16.mxu1 %vm471_vm0, %v2386_v50  ;;  %1931 = vmatprep.mubr.msk.bf16.mxu0 %vm471_vm0, %v2444_v3 }
  0xec   : > { %910 = vmatmul.mubr.bf16.gmra.mxu1 %v2412_v56  ;;  %1392 = vmatmul.mubr.bf16.gmra.mxu0 %v2452_v6 }
  0xed   : > { %1848 = vmatprep.mubr.msk.bf16.mxu1 %vm471_vm0, %v2416_v58  ;;  %1932 = vmatprep.mubr.msk.bf16.mxu0 %vm471_vm0, %v2122_v5 }
  0xf4   : > { %918 = vmatmul.mubr.bf16.gmra.mxu1 %v2440_v0  ;;  %1400 = vmatmul.mubr.bf16.gmra.mxu0 %v2124_v7 }
  0xfc   : > { %v2541_v9 = vpop.f32.mrf.mxu0  ;;  %v2543_v10 = vpop.f32.mrf.mxu1 }
  0xfe   : > { %v556_v11 = vpop.f32.mrf.mxu0  ;;  %v620_v12 = vpop.f32.mrf.mxu1 }
 0x100   : > { %v2545_v13 = vpop.f32.mrf.mxu0  ;;  %v2547_v14 = vpop.f32.mrf.mxu1 }
 0x102   : > { %v559_v15 = vpop.f32.mrf.mxu0  ;;  %v623_v16 = vpop.f32.mrf.mxu1 }
 0x103   : > { %v2609_v16 = vld [vmem:[%s2749_s2] ss:$0 sm:$0xff] }
 0x104   : > { %v2549_v17 = vpop.f32.mrf.mxu0  ;;  %v2551_v18 = vpop.f32.mrf.mxu1 }
 0x106   : > { %v564_v19 = vpop.f32.mrf.mxu0  ;;  %v628_v20 = vpop.f32.mrf.mxu1 }
 0x108   : > { %v2553_v21 = vpop.f32.mrf.mxu0  ;;  %v2555_v22 = vpop.f32.mrf.mxu1 }
 0x10a   : > { %v567_v23 = vpop.f32.mrf.mxu0  ;;  %v631_v24 = vpop.f32.mrf.mxu1 }
 0x10c   : > { %v2557_v25 = vpop.f32.mrf.mxu0  ;;  %v2559_v26 = vpop.f32.mrf.mxu1 }
 0x10e   : > { %v572_v27 = vpop.f32.mrf.mxu0  ;;  %v636_v28 = vpop.f32.mrf.mxu1 }
 0x110   : > { %v2561_v29 = vpop.f32.mrf.mxu0  ;;  %v2563_v30 = vpop.f32.mrf.mxu1 }
 0x112   : > { %v575_v31 = vpop.f32.mrf.mxu0  ;;  %v639_v32 = vpop.f32.mrf.mxu1 }
 0x114   : > { %v2565_v33 = vpop.f32.mrf.mxu0  ;;  %v2567_v34 = vpop.f32.mrf.mxu1 }
 0x116   : > { %v580_v35 = vpop.f32.mrf.mxu0  ;;  %v644_v36 = vpop.f32.mrf.mxu1 }
 0x118   : > { %v2569_v37 = vpop.f32.mrf.mxu0  ;;  %v2571_v38 = vpop.f32.mrf.mxu1 }
 0x11a   : > { %v583_v39 = vpop.f32.mrf.mxu0  ;;  %v647_v40 = vpop.f32.mrf.mxu1 }
 0x11c   : > { %v2573_v41 = vpop.f32.mrf.mxu0  ;;  %v2575_v42 = vpop.f32.mrf.mxu1 }
 0x11e   : > { %v588_v43 = vpop.f32.mrf.mxu0  ;;  %v652_v44 = vpop.f32.mrf.mxu1 }
 0x120   : > { %v2577_v45 = vpop.f32.mrf.mxu0  ;;  %v2579_v46 = vpop.f32.mrf.mxu1 }
 0x122   : > { %v591_v47 = vpop.f32.mrf.mxu0  ;;  %v655_v48 = vpop.f32.mrf.mxu1 }
 0x124   : > { %v2581_v49 = vpop.f32.mrf.mxu0  ;;  %v2583_v50 = vpop.f32.mrf.mxu1 }
 0x126   : > { %v596_v51 = vpop.f32.mrf.mxu0  ;;  %v660_v52 = vpop.f32.mrf.mxu1 }
 0x128   : > { %v2585_v53 = vpop.f32.mrf.mxu0  ;;  %v2587_v54 = vpop.f32.mrf.mxu1 }
 0x12a   : > { %v599_v55 = vpop.f32.mrf.mxu0  ;;  %v663_v56 = vpop.f32.mrf.mxu1 }
 0x12c   : > { %v2589_v57 = vpop.f32.mrf.mxu0  ;;  %v2591_v58 = vpop.f32.mrf.mxu1 }
 0x12e   : > { %v604_v59 = vpop.f32.mrf.mxu0  ;;  %v668_v60 = vpop.f32.mrf.mxu1 }
 0x130   : > { %v2593_v61 = vpop.f32.mrf.mxu0  ;;  %v2595_v62 = vpop.f32.mrf.mxu1 }
 0x132   : > { %v607_v63 = vpop.f32.mrf.mxu0  ;;  %v671_v0 = vpop.f32.mrf.mxu1 }
 0x134   : > { %v2597_v2 = vpop.f32.mrf.mxu0  ;;  %v2599_v3 = vpop.f32.mrf.mxu1 }
 0x136   : > { %v612_v4 = vpop.f32.mrf.mxu0  ;;  %v676_v6 = vpop.f32.mrf.mxu1 }
 0x138   : > { %v2601_v1 = vpop.f32.mrf.mxu0  ;;  %v2603_v8 = vpop.f32.mrf.mxu1 }
 0x13a   : > { %v615_v5 = vpop.f32.mrf.mxu0  ;;  %v679_v7 = vpop.f32.mrf.mxu1 }
 0x13c   : > { %v799_v11 = vpop.f32.mrf.mxu1  ;;  %v1281_v12 = vpop.f32.mrf.mxu0 }
 0x13d   : > { %v800_v15 = vadd.f32 %v799_v11, %v2541_v9 }
 0x13e   : > { %v801_v19 = vpop.f32.mrf.mxu1  ;;  %v1283_v20 = vpop.f32.mrf.mxu0 }
 0x13f   : > { %v1408_v23 = vadd.f32 %v1281_v12, %v800_v15 }
 0x140   : > { %v802_v24 = vpop.f32.mrf.mxu1  ;;  %v1284_v27 = vpop.f32.mrf.mxu0 }
 0x141   : > { %v1447_v28 = vadd.f32 %v2609_v16, %v1408_v23  ;;  %v803_v31 = vadd.f32 %v802_v24, %v2545_v13 }
 0x142   : > { %v804_v32 = vpop.f32.mrf.mxu1  ;;  %v1286_v35 = vpop.f32.mrf.mxu0 }
 0x143   : > { %v1479_v36 = vmax.f32 %v1447_v28, 0.0  ;;  %v1409_v39 = vadd.f32 %v1284_v27, %v803_v31 }
 0x144   : > { %v807_v9 = vpop.f32.mrf.mxu1  ;;  %v1289_v40 = vpop.f32.mrf.mxu0 }
 0x145   : > { %v1969_v43 = vpack.c.bf16 %v1479_v36, %v1479_v36  ;;  %v1448_v44 = vadd.f32 %v2609_v16, %v1409_v39  ;;  %v808_v47 = vadd.f32 %v807_v9, %v2549_v17 }
 0x146   : > { %v809_v13 = vpop.f32.mrf.mxu1  ;;  %v1291_v48 = vpop.f32.mrf.mxu0 }
 0x147   : > { %1640 = vst.msk [vmem:[%s2617_s21] sm:$0xf] %vm1639_vm1, %v1969_v43  ;;  %v1480_v51 = vmax.f32 %v1448_v44, 0.0  ;;  %v1410_v52 = vadd.f32 %v1289_v40, %v808_v47 }
 0x148   : > { %v810_v55 = vpop.f32.mrf.mxu1  ;;  %v1292_v56 = vpop.f32.mrf.mxu0 }
 0x149   : > { %v1970_v59 = vpack.c.bf16 %v1480_v51, %v1480_v51  ;;  %v1449_v60 = vadd.f32 %v2609_v16, %v1410_v52  ;;  %v811_v63 = vadd.f32 %v810_v55, %v2553_v21 }
 0x14a   : > { %v812_v0 = vpop.f32.mrf.mxu1  ;;  %v1294_v4 = vpop.f32.mrf.mxu0 }
 0x14b   : > { %1641 = vst.msk [vmem:[%s2617_s21 + $0x4] sm:$0xf] %vm1639_vm1, %v1970_v59  ;;  %v1481_v6 = vmax.f32 %v1449_v60, 0.0  ;;  %v1411_v17 = vadd.f32 %v1292_v56, %v811_v63 }
 0x14c   : > { %v815_v5 = vpop.f32.mrf.mxu1  ;;  %v1297_v7 = vpop.f32.mrf.mxu0 }
 0x14d   : > { %v1971_v11 = vpack.c.bf16 %v1481_v6, %v1481_v6  ;;  %v1450_v12 = vadd.f32 %v2609_v16, %v1411_v17  ;;  %v816_v15 = vadd.f32 %v815_v5, %v2557_v25 }
 0x14e   : > { %v817_v19 = vpop.f32.mrf.mxu1  ;;  %v1299_v20 = vpop.f32.mrf.mxu0 }
 0x14f   : > { %1642 = vst.msk [vmem:[%s2617_s21 + $0x8] sm:$0xf] %vm1639_vm1, %v1971_v11  ;;  %v1482_v23 = vmax.f32 %v1450_v12, 0.0  ;;  %v1412_v21 = vadd.f32 %v1297_v7, %v816_v15 }
 0x150   : > { %v818_v24 = vpop.f32.mrf.mxu1  ;;  %v1300_v27 = vpop.f32.mrf.mxu0 }
 0x151   : > { %v1972_v28 = vpack.c.bf16 %v1482_v23, %v1482_v23  ;;  %v1451_v31 = vadd.f32 %v2609_v16, %v1412_v21  ;;  %v819_v32 = vadd.f32 %v818_v24, %v2561_v29 }
 0x152   : > { %v820_v35 = vpop.f32.mrf.mxu1  ;;  %v1302_v36 = vpop.f32.mrf.mxu0 }
 0x153   : > { %1643 = vst.msk [vmem:[%s2617_s21 + $0xc] sm:$0xf] %vm1639_vm1, %v1972_v28  ;;  %v1483_v39 = vmax.f32 %v1451_v31, 0.0  ;;  %v1413_v25 = vadd.f32 %v1300_v27, %v819_v32 }
 0x154   : > { %v823_v9 = vpop.f32.mrf.mxu1  ;;  %v1305_v40 = vpop.f32.mrf.mxu0 }
 0x155   : > { %v1973_v43 = vpack.c.bf16 %v1483_v39, %v1483_v39  ;;  %v1452_v44 = vadd.f32 %v2609_v16, %v1413_v25  ;;  %v824_v47 = vadd.f32 %v823_v9, %v2565_v33 }
 0x156   : > { %v825_v13 = vpop.f32.mrf.mxu1  ;;  %v1307_v48 = vpop.f32.mrf.mxu0 }
 0x157   : > { %1644 = vst.msk [vmem:[%s2617_s21 + $0x10] sm:$0xf] %vm1639_vm1, %v1973_v43  ;;  %v1484_v51 = vmax.f32 %v1452_v44, 0.0  ;;  %v1414_v29 = vadd.f32 %v1305_v40, %v824_v47 }
 0x158   : > { %v826_v52 = vpop.f32.mrf.mxu1  ;;  %v1308_v55 = vpop.f32.mrf.mxu0 }
 0x159   : > { %v1974_v56 = vpack.c.bf16 %v1484_v51, %v1484_v51  ;;  %v1453_v59 = vadd.f32 %v2609_v16, %v1414_v29  ;;  %v827_v60 = vadd.f32 %v826_v52, %v2569_v37 }
 0x15a   : > { %v828_v63 = vpop.f32.mrf.mxu1  ;;  %v1310_v0 = vpop.f32.mrf.mxu0 }
 0x15b   : > { %1645 = vst.msk [vmem:[%s2617_s21 + $0x14] sm:$0xf] %vm1639_vm1, %v1974_v56  ;;  %v1485_v4 = vmax.f32 %v1453_v59, 0.0  ;;  %v1415_v33 = vadd.f32 %v1308_v55, %v827_v60 }
 0x15c   : > { %v831_v6 = vpop.f32.mrf.mxu1  ;;  %v1313_v17 = vpop.f32.mrf.mxu0 }
 0x15d   : > { %v1975_v5 = vpack.c.bf16 %v1485_v4, %v1485_v4  ;;  %v1454_v7 = vadd.f32 %v2609_v16, %v1415_v33  ;;  %v832_v11 = vadd.f32 %v831_v6, %v2573_v41 }
 0x15e   : > { %v833_v12 = vpop.f32.mrf.mxu1  ;;  %v1315_v15 = vpop.f32.mrf.mxu0 }
 0x15f   : > { %1646 = vst.msk [vmem:[%s2617_s21 + $0x18] sm:$0xf] %vm1639_vm1, %v1975_v5  ;;  %v1486_v19 = vmax.f32 %v1454_v7, 0.0  ;;  %v1416_v37 = vadd.f32 %v1313_v17, %v832_v11 }
 0x160   : > { %v834_v20 = vpop.f32.mrf.mxu1  ;;  %v1316_v23 = vpop.f32.mrf.mxu0 }
 0x161   : > { %v1976_v21 = vpack.c.bf16 %v1486_v19, %v1486_v19  ;;  %v1455_v24 = vadd.f32 %v2609_v16, %v1416_v37  ;;  %v835_v27 = vadd.f32 %v834_v20, %v2577_v45 }
 0x162   : > { %v836_v28 = vpop.f32.mrf.mxu1  ;;  %v1318_v31 = vpop.f32.mrf.mxu0 }
 0x163   : > { %1647 = vst.msk [vmem:[%s2617_s21 + $0x1c] sm:$0xf] %vm1639_vm1, %v1976_v21  ;;  %v1487_v32 = vmax.f32 %v1455_v24, 0.0  ;;  %v1417_v41 = vadd.f32 %v1316_v23, %v835_v27 }
 0x164   : > { %v839_v35 = vpop.f32.mrf.mxu1  ;;  %v1321_v36 = vpop.f32.mrf.mxu0 }
 0x165   : > { %v1977_v39 = vpack.c.bf16 %v1487_v32, %v1487_v32  ;;  %v1456_v25 = vadd.f32 %v2609_v16, %v1417_v41  ;;  %v840_v9 = vadd.f32 %v839_v35, %v2581_v49 }
 0x166   : > { %v841_v40 = vpop.f32.mrf.mxu1  ;;  %v1323_v43 = vpop.f32.mrf.mxu0 }
 0x167   : > { %1648 = vst.msk [vmem:[%s2617_s21 + $0x20] sm:$0xf] %vm1639_vm1, %v1977_v39  ;;  %v1488_v44 = vmax.f32 %v1456_v25, 0.0  ;;  %v1418_v45 = vadd.f32 %v1321_v36, %v840_v9 }
 0x168   : > { %v842_v47 = vpop.f32.mrf.mxu1  ;;  %v1324_v13 = vpop.f32.mrf.mxu0 }
 0x169   : > { %v1978_v48 = vpack.c.bf16 %v1488_v44, %v1488_v44  ;;  %v1457_v51 = vadd.f32 %v2609_v16, %v1418_v45  ;;  %v843_v29 = vadd.f32 %v842_v47, %v2585_v53 }
 0x16a   : > { %v844_v52 = vpop.f32.mrf.mxu1  ;;  %v1326_v55 = vpop.f32.mrf.mxu0 }
 0x16b   : > { %1649 = vst.msk [vmem:[%s2617_s21 + $0x24] sm:$0xf] %vm1639_vm1, %v1978_v48  ;;  %v1489_v56 = vmax.f32 %v1457_v51, 0.0  ;;  %v1419_v49 = vadd.f32 %v1324_v13, %v843_v29 }
 0x16c   : > { %v847_v59 = vpop.f32.mrf.mxu1  ;;  %v1329_v60 = vpop.f32.mrf.mxu0 }
 0x16d   : > { %v1979_v63 = vpack.c.bf16 %v1489_v56, %v1489_v56  ;;  %v1458_v0 = vadd.f32 %v2609_v16, %v1419_v49  ;;  %v848_v4 = vadd.f32 %v847_v59, %v2589_v57 }
 0x16e   : > { %v849_v33 = vpop.f32.mrf.mxu1  ;;  %v1331_v6 = vpop.f32.mrf.mxu0 }
 0x16f   : > { %1650 = vst.msk [vmem:[%s2617_s21 + $0x28] sm:$0xf] %vm1639_vm1, %v1979_v63  ;;  %v1490_v17 = vmax.f32 %v1458_v0, 0.0  ;;  %v1420_v53 = vadd.f32 %v1329_v60, %v848_v4 }
 0x170   : > { %v850_v5 = vpop.f32.mrf.mxu1  ;;  %v1332_v7 = vpop.f32.mrf.mxu0 }
 0x171   : > { %v1980_v11 = vpack.c.bf16 %v1490_v17, %v1490_v17  ;;  %v1459_v12 = vadd.f32 %v2609_v16, %v1420_v53  ;;  %v851_v15 = vadd.f32 %v850_v5, %v2593_v61 }
 0x172   : > { %v852_v19 = vpop.f32.mrf.mxu1  ;;  %v1334_v37 = vpop.f32.mrf.mxu0 }
 0x173   : > { %1651 = vst.msk [vmem:[%s2617_s21 + $0x2c] sm:$0xf] %vm1639_vm1, %v1980_v11  ;;  %v1491_v20 = vmax.f32 %v1459_v12, 0.0  ;;  %v1421_v57 = vadd.f32 %v1332_v7, %v851_v15 }
 0x174   : > { %v855_v23 = vpop.f32.mrf.mxu1  ;;  %v1337_v21 = vpop.f32.mrf.mxu0 }
 0x175   : > { %v1981_v24 = vpack.c.bf16 %v1491_v20, %v1491_v20  ;;  %v1460_v27 = vadd.f32 %v2609_v16, %v1421_v57  ;;  %v856_v28 = vadd.f32 %v855_v23, %v2597_v2 }
 0x176   : > { %v857_v31 = vpop.f32.mrf.mxu1  ;;  %v1339_v32 = vpop.f32.mrf.mxu0 }
 0x177   : > { %1652 = vst.msk [vmem:[%s2617_s21 + $0x30] sm:$0xf] %vm1639_vm1, %v1981_v24  ;;  %v1492_v41 = vmax.f32 %v1460_v27, 0.0  ;;  %v1422_v61 = vadd.f32 %v1337_v21, %v856_v28 }
 0x178   : > { %v858_v35 = vpop.f32.mrf.mxu1  ;;  %v1340_v36 = vpop.f32.mrf.mxu0 }
 0x179   : > { %v1982_v39 = vpack.c.bf16 %v1492_v41, %v1492_v41  ;;  %v1461_v25 = vadd.f32 %v2609_v16, %v1422_v61  ;;  %v859_v9 = vadd.f32 %v858_v35, %v2601_v1 }
 0x17a   : > { %v860_v40 = vpop.f32.mrf.mxu1  ;;  %v1342_v43 = vpop.f32.mrf.mxu0 }
 0x17b   : > { %1653 = vst.msk [vmem:[%s2617_s21 + $0x34] sm:$0xf] %vm1639_vm1, %v1982_v39  ;;  %v1493_v44 = vmax.f32 %v1461_v25, 0.0  ;;  %v1423_v2 = vadd.f32 %v1340_v36, %v859_v9 }
 0x17c   : > { %v863_v45 = vpop.f32.mrf.mxu1  ;;  %v1345_v47 = vpop.f32.mrf.mxu0 }
 0x17d   : > { %v1983_v13 = vpack.c.bf16 %v1493_v44, %v1493_v44  ;;  %v1462_v48 = vadd.f32 %v2609_v16, %v1423_v2  ;;  %v864_v51 = vadd.f32 %v863_v45, %v2543_v10 }
 0x17e   : > { %v865_v29 = vpop.f32.mrf.mxu1  ;;  %v1347_v52 = vpop.f32.mrf.mxu0 }
 0x17f   : > { %1654 = vst.msk [vmem:[%s2617_s21 + $0x38] sm:$0xf] %vm1639_vm1, %v1983_v13  ;;  %v1494_v55 = vmax.f32 %v1462_v48, 0.0  ;;  %v1424_v1 = vadd.f32 %v1345_v47, %v864_v51 }
 0x180   : > { %v866_v56 = vpop.f32.mrf.mxu1  ;;  %v1348_v49 = vpop.f32.mrf.mxu0 }
 0x181   : > { %v1984_v59 = vpack.c.bf16 %v1494_v55, %v1494_v55  ;;  %v1463_v60 = vadd.f32 %v2609_v16, %v1424_v1  ;;  %v867_v63 = vadd.f32 %v866_v56, %v2547_v14 }
 0x182   : > { %v868_v0 = vpop.f32.mrf.mxu1  ;;  %v1350_v4 = vpop.f32.mrf.mxu0 }
 0x183   : > { %1655 = vst.msk [vmem:[%s2617_s21 + $0x3c] sm:$0xf] %vm1639_vm1, %v1984_v59  ;;  %v1495_v33 = vmax.f32 %v1463_v60, 0.0  ;;  %v1425_v10 = vadd.f32 %v1348_v49, %v867_v63 }
 0x184   : > { %v871_v6 = vpop.f32.mrf.mxu1  ;;  %v1353_v17 = vpop.f32.mrf.mxu0 }
 0x185   : > { %v1985_v53 = vpack.c.bf16 %v1495_v33, %v1495_v33  ;;  %v1464_v5 = vadd.f32 %v2609_v16, %v1425_v10  ;;  %v872_v7 = vadd.f32 %v871_v6, %v2551_v18 }
 0x186   : > { %v873_v11 = vpop.f32.mrf.mxu1  ;;  %v1355_v12 = vpop.f32.mrf.mxu0 }
 0x187   : > { %1656 = vst.msk [vmem:[%s2617_s21 + $0x40] sm:$0xf] %vm1639_vm1, %v1985_v53  ;;  %v1496_v15 = vmax.f32 %v1464_v5, 0.0  ;;  %v1426_v14 = vadd.f32 %v1353_v17, %v872_v7 }
 0x188   : > { %v874_v19 = vpop.f32.mrf.mxu1  ;;  %v1356_v37 = vpop.f32.mrf.mxu0 }
 0x189   : > { %v1986_v20 = vpack.c.bf16 %v1496_v15, %v1496_v15  ;;  %v1465_v57 = vadd.f32 %v2609_v16, %v1426_v14  ;;  %v875_v23 = vadd.f32 %v874_v19, %v2555_v22 }
 0x18a   : > { %v876_v21 = vpop.f32.mrf.mxu1  ;;  %v1358_v24 = vpop.f32.mrf.mxu0 }
 0x18b   : > { %1657 = vst.msk [vmem:[%s2617_s21 + $0x44] sm:$0xf] %vm1639_vm1, %v1986_v20  ;;  %v1497_v27 = vmax.f32 %v1465_v57, 0.0  ;;  %v1427_v18 = vadd.f32 %v1356_v37, %v875_v23 }
 0x18c   : > { %v879_v28 = vpop.f32.mrf.mxu1  ;;  %v1361_v31 = vpop.f32.mrf.mxu0 }
 0x18d   : > { %v1987_v32 = vpack.c.bf16 %v1497_v27, %v1497_v27  ;;  %v1466_v41 = vadd.f32 %v2609_v16, %v1427_v18  ;;  %v880_v61 = vadd.f32 %v879_v28, %v2559_v26 }
 0x18e   : > { %v881_v35 = vpop.f32.mrf.mxu1  ;;  %v1363_v36 = vpop.f32.mrf.mxu0 }
 0x18f   : > { %1658 = vst.msk [vmem:[%s2617_s21 + $0x48] sm:$0xf] %vm1639_vm1, %v1987_v32  ;;  %v1498_v39 = vmax.f32 %v1466_v41, 0.0  ;;  %v1428_v22 = vadd.f32 %v1361_v31, %v880_v61 }
 0x190   : > { %v882_v25 = vpop.f32.mrf.mxu1  ;;  %v1364_v9 = vpop.f32.mrf.mxu0 }
 0x191   : > { %v1988_v40 = vpack.c.bf16 %v1498_v39, %v1498_v39  ;;  %v1467_v43 = vadd.f32 %v2609_v16, %v1428_v22  ;;  %v883_v44 = vadd.f32 %v882_v25, %v2563_v30 }
 0x192   : > { %v884_v2 = vpop.f32.mrf.mxu1  ;;  %v1366_v45 = vpop.f32.mrf.mxu0 }
 0x193   : > { %1659 = vst.msk [vmem:[%s2617_s21 + $0x4c] sm:$0xf] %vm1639_vm1, %v1988_v40  ;;  %v1499_v47 = vmax.f32 %v1467_v43, 0.0  ;;  %v1429_v26 = vadd.f32 %v1364_v9, %v883_v44 }
 0x194   : > { %v887_v13 = vpop.f32.mrf.mxu1  ;;  %v1369_v48 = vpop.f32.mrf.mxu0 }
 0x195   : > { %v1989_v51 = vpack.c.bf16 %v1499_v47, %v1499_v47  ;;  %v1468_v29 = vadd.f32 %v2609_v16, %v1429_v26  ;;  %v888_v52 = vadd.f32 %v887_v13, %v2567_v34 }
 0x196   : > { %v889_v55 = vpop.f32.mrf.mxu1  ;;  %v1371_v1 = vpop.f32.mrf.mxu0 }
 0x197   : > { %1660 = vst.msk [vmem:[%s2617_s21 + $0x50] sm:$0xf] %vm1639_vm1, %v1989_v51  ;;  %v1500_v56 = vmax.f32 %v1468_v29, 0.0  ;;  %v1430_v30 = vadd.f32 %v1369_v48, %v888_v52 }
 0x198   : > { %v890_v49 = vpop.f32.mrf.mxu1  ;;  %v1372_v59 = vpop.f32.mrf.mxu0 }
 0x199   : > { %v1990_v60 = vpack.c.bf16 %v1500_v56, %v1500_v56  ;;  %v1469_v63 = vadd.f32 %v2609_v16, %v1430_v30  ;;  %v891_v0 = vadd.f32 %v890_v49, %v2571_v38 }
 0x19a   : > { %v892_v4 = vpop.f32.mrf.mxu1  ;;  %v1374_v33 = vpop.f32.mrf.mxu0 }
 0x19b   : > { %1661 = vst.msk [vmem:[%s2617_s21 + $0x54] sm:$0xf] %vm1639_vm1, %v1990_v60  ;;  %v1501_v10 = vmax.f32 %v1469_v63, 0.0  ;;  %v1431_v34 = vadd.f32 %v1372_v59, %v891_v0 }
 0x19c   : > { %v895_v6 = vpop.f32.mrf.mxu1  ;;  %v1377_v17 = vpop.f32.mrf.mxu0 }
 0x19d   : > { %v1991_v53 = vpack.c.bf16 %v1501_v10, %v1501_v10  ;;  %v1470_v5 = vadd.f32 %v2609_v16, %v1431_v34  ;;  %v896_v7 = vadd.f32 %v895_v6, %v2575_v42 }
 0x19e   : > { %v897_v11 = vpop.f32.mrf.mxu1  ;;  %v1379_v12 = vpop.f32.mrf.mxu0 }
 0x19f   : > { %1662 = vst.msk [vmem:[%s2617_s21 + $0x58] sm:$0xf] %vm1639_vm1, %v1991_v53  ;;  %v1502_v15 = vmax.f32 %v1470_v5, 0.0  ;;  %v1432_v38 = vadd.f32 %v1377_v17, %v896_v7 }
 0x1a0   : > { %v898_v14 = vpop.f32.mrf.mxu1  ;;  %v1380_v19 = vpop.f32.mrf.mxu0 }
 0x1a1   : > { %v1992_v37 = vpack.c.bf16 %v1502_v15, %v1502_v15  ;;  %v1471_v20 = vadd.f32 %v2609_v16, %v1432_v38  ;;  %v899_v57 = vadd.f32 %v898_v14, %v2579_v46 }
 0x1a2   : > { %v900_v23 = vpop.f32.mrf.mxu1  ;;  %v1382_v21 = vpop.f32.mrf.mxu0 }
 0x1a3   : > { %1663 = vst.msk [vmem:[%s2617_s21 + $0x5c] sm:$0xf] %vm1639_vm1, %v1992_v37  ;;  %v1503_v24 = vmax.f32 %v1471_v20, 0.0  ;;  %v1433_v42 = vadd.f32 %v1380_v19, %v899_v57 }
 0x1a4   : > { %v903_v27 = vpop.f32.mrf.mxu1  ;;  %v1385_v18 = vpop.f32.mrf.mxu0 }
 0x1a5   : > { %v1993_v28 = vpack.c.bf16 %v1503_v24, %v1503_v24  ;;  %v1472_v31 = vadd.f32 %v2609_v16, %v1433_v42  ;;  %v904_v32 = vadd.f32 %v903_v27, %v2583_v50 }
 0x1a6   : > { %v905_v41 = vpop.f32.mrf.mxu1  ;;  %v1387_v61 = vpop.f32.mrf.mxu0 }
 0x1a7   : > { %1664 = vst.msk [vmem:[%s2617_s21 + $0x60] sm:$0xf] %vm1639_vm1, %v1993_v28  ;;  %v1504_v35 = vmax.f32 %v1472_v31, 0.0  ;;  %v1434_v46 = vadd.f32 %v1385_v18, %v904_v32 }
 0x1a8   : > { %v906_v36 = vpop.f32.mrf.mxu1  ;;  %v1388_v39 = vpop.f32.mrf.mxu0 }
 0x1a9   : > { %v1994_v22 = vpack.c.bf16 %v1504_v35, %v1504_v35  ;;  %v1473_v25 = vadd.f32 %v2609_v16, %v1434_v46  ;;  %v907_v9 = vadd.f32 %v906_v36, %v2587_v54 }
 0x1aa   : > { %v908_v40 = vpop.f32.mrf.mxu1  ;;  %v1390_v43 = vpop.f32.mrf.mxu0 }
 0x1ab   : > { %1665 = vst.msk [vmem:[%s2617_s21 + $0x64] sm:$0xf] %vm1639_vm1, %v1994_v22  ;;  %v1505_v44 = vmax.f32 %v1473_v25, 0.0  ;;  %v1435_v50 = vadd.f32 %v1388_v39, %v907_v9 }
 0x1ac   : > { %v911_v2 = vpop.f32.mrf.mxu1  ;;  %v1393_v45 = vpop.f32.mrf.mxu0 }
 0x1ad   : > { %v1995_v47 = vpack.c.bf16 %v1505_v44, %v1505_v44  ;;  %v1474_v26 = vadd.f32 %v2609_v16, %v1435_v50  ;;  %v912_v13 = vadd.f32 %v911_v2, %v2591_v58 }
 0x1ae   : > { %v913_v48 = vpop.f32.mrf.mxu1  ;;  %v1395_v51 = vpop.f32.mrf.mxu0 }
 0x1af   : > { %1666 = vst.msk [vmem:[%s2617_s21 + $0x68] sm:$0xf] %vm1639_vm1, %v1995_v47  ;;  %v1506_v29 = vmax.f32 %v1474_v26, 0.0  ;;  %v1436_v54 = vadd.f32 %v1393_v45, %v912_v13 }
 0x1b0   : > { %v914_v52 = vpop.f32.mrf.mxu1  ;;  %v1396_v55 = vpop.f32.mrf.mxu0 }
 0x1b1   : > { %v1996_v1 = vpack.c.bf16 %v1506_v29, %v1506_v29  ;;  %v1475_v56 = vadd.f32 %v2609_v16, %v1436_v54  ;;  %v915_v30 = vadd.f32 %v914_v52, %v2595_v62 }
 0x1b2   : > { %v916_v49 = vpop.f32.mrf.mxu1  ;;  %v1398_v59 = vpop.f32.mrf.mxu0 }
 0x1b3   : > { %1667 = vst.msk [vmem:[%s2617_s21 + $0x6c] sm:$0xf] %vm1639_vm1, %v1996_v1  ;;  %v1507_v60 = vmax.f32 %v1475_v56, 0.0  ;;  %v1437_v58 = vadd.f32 %v1396_v55, %v915_v30 }
 0x1b4   : > { %v919_v63 = vpop.f32.mrf.mxu1  ;;  %v1401_v0 = vpop.f32.mrf.mxu0 }
 0x1b5   : > { %v1997_v4 = vpack.c.bf16 %v1507_v60, %v1507_v60  ;;  %v1476_v33 = vadd.f32 %v2609_v16, %v1437_v58  ;;  %v920_v10 = vadd.f32 %v919_v63, %v2599_v3 }
 0x1b6   : > { %v921_v34 = vpop.f32.mrf.mxu1  ;;  %v1403_v6 = vpop.f32.mrf.mxu0 }
 0x1b7   : > { %1668 = vst.msk [vmem:[%s2617_s21 + $0x70] sm:$0xf] %vm1639_vm1, %v1997_v4  ;;  %v1508_v62 = vmax.f32 %v1476_v33, 0.0  ;;  %v1438_v17 = vadd.f32 %v1401_v0, %v920_v10 }
 0x1b8   : > { %v922_v53 = vpop.f32.mrf.mxu1  ;;  %v1404_v5 = vpop.f32.mrf.mxu0 }
 0x1b9   : > { %v1998_v7 = vpack.c.bf16 %v1508_v62, %v1508_v62  ;;  %v1477_v11 = vadd.f32 %v2609_v16, %v1438_v17  ;;  %v923_v12 = vadd.f32 %v922_v53, %v2603_v8 }
 0x1ba   : > { %v924_v15 = vpop.f32.mrf.mxu1  ;;  %v1406_v38 = vpop.f32.mrf.mxu0 }
 0x1bb   : > { %1669 = vst.msk [vmem:[%s2617_s21 + $0x74] sm:$0xf] %vm1639_vm1, %v1998_v7  ;;  %v1509_v3 = vmax.f32 %v1477_v11, 0.0  ;;  %v1439_v14 = vadd.f32 %v1404_v5, %v923_v12 }
 0x1bd   : > { %v1999_v19 = vpack.c.bf16 %v1509_v3, %v1509_v3  ;;  %v1478_v37 = vadd.f32 %v2609_v16, %v1439_v14 }
 0x1bf   : > { %1670 = vst.msk [vmem:[%s2617_s21 + $0x78] sm:$0xf] %vm1639_vm1, %v1999_v19  ;;  %v1510_v20 = vmax.f32 %v1478_v37, 0.0 }
 0x1c1   : > { %v2000_v57 = vpack.c.bf16 %v1510_v20, %v1510_v20 }
 0x1c3   : > { %1671 = vst.msk [vmem:[%s2617_s21 + $0x7c] sm:$0xf] %vm1639_vm1, %v2000_v57 }
 0x1c4 PF: > { %s13_s12 = sadd.s32 1, %s2131_s12  }
 0x1c5   : > { %p10_p4 = scmp.ge.s32.totalorder %s13_s12, 4  }
 0x1c7   :  { %12 = sbr.rel (!%p10_p4) target bundleno = 1 (0x1), region = 64 }

// kernel: unet_forward.11
= control target key start
LH: loop header
LB: loop body
LE: loop exit
PB: predicated region body
PF: predicated region fallthrough
CT: control target
= control target key end

     0   :  { %s1212_s12 = smov 0   ;;  %s1434_s0 = inlined_call_operand.vmem [shape: bf16[2,80,192], index: 0, kind: input, shape index: {}]   ;;  %s1435_s1 = inlined_call_operand.vmem [shape: bf16[3,192,128], index: 1, kind: input, shape index: {}]   ;;  %s1436_s2 = inlined_call_operand.vmem [shape: f32[1,128], index: 2, kind: input, shape index: {}]   ;;  %s1437_s3 = inlined_call_operand.vmem [shape: bf16[2,64,128], index: 3, kind: output, shape index: {}]  }
   0x1 LB: > { %s924_s13 = sadd.s32 4294967295, %s1189_s12   ;;  %p928_p0 = scmp.ge.s32.totalorder %s1189_s12, 1  ;;  %s1189_s12 = sphi %s1212_s12, %s13_s12  }
   0x2   : > { %p137_p1 = scmp.lt.s32.totalorder %s1189_s12, 3 }
   0x4   : > { %p138_p2 = pnand %p928_p0, %p137_p1 }
   0x5   : > { %p161_p3 = scmp.lt.s32.totalorder (!%p138_p2), %s924_s13, 1 }
   0x6   : > { %141 = sbr.rel (%p138_p2) target bundleno = 322 (0x142), region = 32 }
   0xb   : > { %v1129_v0 = vld [vmem:[%s1435_s1 + $0x98] sm:$0xff]   ;;  %v1191_v1 = vmov 0   ;;  %v1131_v3 = vld [vmem:[%s1435_s1 + $0x90] sm:$0xff]   ;;  %v1133_v5 = vld [vmem:[%s1435_s1 + $0x88] sm:$0xff]   ;;  %s1439_s13 = smov (!%p161_p3, %s924_s13), 1  ;;  %vm338_vm0 = vcmask 523264  }
   0xc   : > { %351 = vmatprep.subr.bf16.mxu0 %v1191_v1  ;;  %515 = vmatprep.subr.bf16.mxu1 %v1191_v1  ;;  %v1130_v2 = vld [vmem:[%s1435_s1 + $0x38] sm:$0xff]   ;;  %v1132_v4 = vld [vmem:[%s1435_s1 + $0x30] sm:$0xff]   ;;  %v1134_v6 = vld [vmem:[%s1435_s1 + $0x28] sm:$0xff]   ;;  %s1119_s7 = smul.u32 80, %s1439_s13  ;;  %s1063_s18 = sshll.u32 %s1439_s13, 5 }
   0xd   : > { %352 = vmatpush1.bf16.msra.mxu0 %v1129_v0  ;;  %516 = vmatpush1.bf16.msra.mxu1 %v1130_v2  ;;  %v1135_v7 = vld [vmem:[%s1435_s1 + $0x80] sm:$0xff]   ;;  %v1137_v9 = vld [vmem:[%s1435_s1 + $0x78] sm:$0xff]   ;;  %v1139_v11 = vld [vmem:[%s1435_s1 + $0x70] sm:$0xff]   ;;  %s170_s21 = scalar_lea.vmem %s1437_s3, %s1063_s18 }
   0xe   : > { %353 = vmatprep.subr.bf16.mxu0 %v1191_v1  ;;  %517 = vmatprep.subr.bf16.mxu1 %v1191_v1  ;;  %v1136_v8 = vld [vmem:[%s1435_s1 + $0x20] sm:$0xff]   ;;  %v1138_v10 = vld [vmem:[%s1435_s1 + $0x18] sm:$0xff]   ;;  %v1140_v12 = vld [vmem:[%s1435_s1 + $0x10] sm:$0xff]   ;;  %s1274_s16 = scalar_lea.vmem %s1434_s0, %s1119_s7 }
   0xf   : > { %v1141_v13 = vld [vmem:[%s1435_s1 + $0x68] sm:$0xff]   ;;  %v174_v16 = vld [vmem:[%s1274_s16 + $0x10] sm:$0xff]  ;;  %v172_v17 = vld [vmem:[%s1274_s16] sm:$0xff] }
  0x10   : > { %v1142_v14 = vld [vmem:[%s1435_s1 + $0x8] sm:$0xff]   ;;  %v1143_v20 = vld [vmem:[%s1435_s1 + $0x60] sm:$0xff]   ;;  %v1145_v22 = vld [vmem:[%s1435_s1 + $0xb8] sm:$0xff]  }
  0x11   : > { %354 = vmatpush1.bf16.msra.mxu0 %v1131_v3  ;;  %518 = vmatpush1.bf16.msra.mxu1 %v1132_v4  ;;  %v173_v15 = vld [vmem:[%s1274_s16 + $0x8] sm:$0xff]  ;;  %v1144_v21 = vld [vmem:[%s1435_s1] sm:$0xff]   ;;  %v1146_v23 = vld [vmem:[%s1435_s1 + $0x58] sm:$0xff]  }
  0x12   : > { %355 = vmatprep.subr.bf16.mxu0 %v1191_v1  ;;  %519 = vmatprep.subr.bf16.mxu1 %v1191_v1  ;;  %v957_v18 = vcombine.high %v173_v15, %v174_v16  ;;  %v981_v19 = vcombine.high %v172_v17, %v173_v15  ;;  %v1147_v24 = vld [vmem:[%s1435_s1 + $0xb0] sm:$0xff]   ;;  %v1149_v26 = vld [vmem:[%s1435_s1 + $0xa8] sm:$0xff]   ;;  %v1151_v28 = vld [vmem:[%s1435_s1 + $0xa0] sm:$0xff]   ;;  %v956_v30 = vcombine.low %v173_v15, %v174_v16 }
  0x13   : > { %v1148_v25 = vld [vmem:[%s1435_s1 + $0x50] sm:$0xff]   ;;  %v1150_v27 = vld [vmem:[%s1435_s1 + $0x48] sm:$0xff]   ;;  %v1152_v29 = vld [vmem:[%s1435_s1 + $0x40] sm:$0xff]   ;;  %v980_v33 = vcombine.low %v172_v17, %v173_v15 }
  0x14   : > { %976 = vmatprep.mubr.msk.bf16.mxu0 %vm338_vm0, %v957_v18  ;;  %1000 = vmatprep.mubr.msk.bf16.mxu1 %vm338_vm0, %v981_v19  ;;  %v175_v31 = vld [vmem:[%s1274_s16 + $0x18] sm:$0xff]  ;;  %v176_v32 = vld [vmem:[%s1274_s16 + $0x20] sm:$0xff]  ;;  %v1158_v37 = vld [vmem:[%s1435_s1 + $0xf0] sm:$0xff]  }
  0x15   : > { %356 = vmatpush1.bf16.msra.mxu0 %v1133_v5  ;;  %520 = vmatpush1.bf16.msra.mxu1 %v1134_v6  ;;  %v1157_v34 = vld [vmem:[%s1435_s1 + $0xf8] sm:$0xff]   ;;  %v959_v35 = vcombine.high %v175_v31, %v176_v32  ;;  %v1336_v36 = vcombine.high %v174_v16, %v175_v31  ;;  %v958_v38 = vcombine.low %v175_v31, %v176_v32  ;;  %v177_v39 = vld [vmem:[%s1274_s16 + $0x28] sm:$0xff]  ;;  %v178_v40 = vld [vmem:[%s1274_s16 + $0x30] sm:$0xff] }
  0x16   : > { %357 = vmatprep.subr.bf16.mxu0 %v1191_v1  ;;  %521 = vmatprep.subr.bf16.mxu1 %v1191_v1  ;;  %v1159_v41 = vld [vmem:[%s1435_s1 + $0xe8] sm:$0xff]   ;;  %v1351_v42 = vcombine.low %v174_v16, %v175_v31  ;;  %v961_v43 = vcombine.high %v177_v39, %v178_v40  ;;  %v1355_v44 = vcombine.high %v176_v32, %v177_v39  ;;  %v1160_v45 = vld [vmem:[%s1435_s1 + $0xe0] sm:$0xff]   ;;  %v179_v47 = vld [vmem:[%s1274_s16 + $0x38] sm:$0xff] }
  0x17   : > { %v960_v46 = vcombine.low %v177_v39, %v178_v40  ;;  %v1368_v48 = vld [vmem:[%s1274_s16 + $0x40] sm:$0xff]  ;;  %v1163_v49 = vld [vmem:[%s1435_s1 + $0xd8] sm:$0xff]   ;;  %v984_v50 = vcombine.low %v176_v32, %v177_v39  ;;  %v987_v52 = vcombine.high %v178_v40, %v179_v47  ;;  %v1166_v53 = vld [vmem:[%s1435_s1 + $0xd0] sm:$0xff]   ;;  %v986_v56 = vcombine.low %v178_v40, %v179_v47 }
  0x18   : > { %v963_v51 = vcombine.high %v179_v47, %v1368_v48  ;;  %v962_v54 = vcombine.low %v179_v47, %v1368_v48  ;;  %v1169_v55 = vld [vmem:[%s1435_s1 + $0xc8] sm:$0xff]   ;;  %v1172_v57 = vld [vmem:[%s1435_s1 + $0xc0] sm:$0xff]   ;;  %v1175_v58 = vld [vmem:[%s1435_s1 + $0x118] sm:$0xff]  }
  0x19   : > { %358 = vmatpush1.bf16.msra.mxu0 %v1135_v7  ;;  %522 = vmatpush1.bf16.msra.mxu1 %v1136_v8  ;;  %v1178_v59 = vld [vmem:[%s1435_s1 + $0x110] sm:$0xff]   ;;  %v1179_v60 = vld [vmem:[%s1435_s1 + $0x108] sm:$0xff]   ;;  %v1180_v61 = vld [vmem:[%s1435_s1 + $0x100] sm:$0xff]  }
  0x1a   : > { %359 = vmatprep.subr.bf16.mxu0 %v1191_v1  ;;  %523 = vmatprep.subr.bf16.mxu1 %v1191_v1  ;;  %v587_v62 = vld [vmem:[%s1274_s16 + $0x48] sm:$0xff] }
  0x1b   : > { %v1035_v63 = vcombine.high %v1368_v48, %v587_v62  ;;  %v1034_v0 = vcombine.low %v1368_v48, %v587_v62 }
  0x1d   : > { %360 = vmatpush1.bf16.msra.mxu0 %v1137_v9  ;;  %524 = vmatpush1.bf16.msra.mxu1 %v1138_v10 }
  0x1e   : > { %361 = vmatprep.subr.bf16.mxu0 %v1191_v1  ;;  %525 = vmatprep.subr.bf16.mxu1 %v1191_v1 }
  0x21   : > { %362 = vmatpush1.bf16.msra.mxu0 %v1139_v11  ;;  %526 = vmatpush1.bf16.msra.mxu1 %v1140_v12 }
  0x22   : > { %363 = vmatprep.subr.bf16.mxu0 %v1191_v1  ;;  %527 = vmatprep.subr.bf16.mxu1 %v1191_v1 }
  0x25   : > { %364 = vmatpush1.bf16.msra.mxu0 %v1141_v13  ;;  %528 = vmatpush1.bf16.msra.mxu1 %v1142_v14 }
  0x26   : > { %365 = vmatprep.subr.bf16.mxu0 %v1191_v1  ;;  %529 = vmatprep.subr.bf16.mxu1 %v1191_v1 }
  0x29   : > { %366 = vmatpush1.bf16.msra.mxu0 %v1143_v20  ;;  %530 = vmatpush1.bf16.msra.mxu1 %v1144_v21 }
  0x2a   : > { %375 = vmatprep.subr.bf16.mxu0 %v1191_v1  ;;  %539 = vmatprep.subr.bf16.mxu1 %v1191_v1 }
  0x2d   : > { %376 = vmatpush2.bf16.msra.mxu0 %v1145_v22  ;;  %540 = vmatpush2.bf16.msra.mxu1 %v1146_v23 }
  0x2e   : > { %377 = vmatprep.subr.bf16.mxu0 %v1191_v1  ;;  %541 = vmatprep.subr.bf16.mxu1 %v1191_v1 }
  0x31   : > { %378 = vmatpush2.bf16.msra.mxu0 %v1147_v24  ;;  %542 = vmatpush2.bf16.msra.mxu1 %v1148_v25 }
  0x32   : > { %379 = vmatprep.subr.bf16.mxu0 %v1191_v1  ;;  %543 = vmatprep.subr.bf16.mxu1 %v1191_v1 }
  0x35   : > { %380 = vmatpush2.bf16.msra.mxu0 %v1149_v26  ;;  %544 = vmatpush2.bf16.msra.mxu1 %v1150_v27 }
  0x36   : > { %381 = vmatprep.subr.bf16.mxu0 %v1191_v1  ;;  %545 = vmatprep.subr.bf16.mxu1 %v1191_v1 }
  0x39   : > { %382 = vmatpush2.bf16.msra.mxu0 %v1151_v28  ;;  %546 = vmatpush2.bf16.msra.mxu1 %v1152_v29 }
  0x3a   : > { %733 = vmatprep.subr.bf16.mxu0 %v1191_v1  ;;  %1095 = vmatprep.subr.bf16.mxu1 %v1191_v1 }
  0x3c   : > { %384 = vmatmul.mubr.bf16.vlgmr.msra.gmra.mxu0 %v956_v30  ;;  %548 = vmatmul.mubr.bf16.vlgmr.msra.gmra.mxu1 %v980_v33 }
  0x3d   : > { %734 = vmatpush1.bf16.msra.mxu0 %v1157_v34  ;;  %1107 = vmatpush1.bf16.msra.mxu1 %v1157_v34 }
  0x3e   : > { %735 = vmatprep.subr.bf16.mxu0 %v1191_v1  ;;  %1096 = vmatprep.subr.bf16.mxu1 %v1191_v1 }
  0x3f   : > { %977 = vmatprep.mubr.msk.bf16.mxu0 %vm338_vm0, %v959_v35  ;;  %1001 = vmatprep.mubr.msk.bf16.mxu1 %vm338_vm0, %v1336_v36 }
  0x41   : > { %736 = vmatpush1.bf16.msra.mxu0 %v1158_v37  ;;  %1108 = vmatpush1.bf16.msra.mxu1 %v1158_v37 }
  0x42   : > { %737 = vmatprep.subr.bf16.mxu0 %v1191_v1  ;;  %1097 = vmatprep.subr.bf16.mxu1 %v1191_v1 }
  0x44   : > { %392 = vmatmul.mubr.bf16.gmra.mxu0 %v958_v38  ;;  %556 = vmatmul.mubr.bf16.gmra.mxu1 %v1351_v42  ;;  %v1052_v38 = vld [vmem:[%s1436_s2] ss:$0 sm:$0xff] }
  0x45   : > { %738 = vmatpush1.bf16.msra.mxu0 %v1159_v41  ;;  %1109 = vmatpush1.bf16.msra.mxu1 %v1159_v41 }
  0x46   : > { %739 = vmatprep.subr.bf16.mxu0 %v1191_v1  ;;  %1098 = vmatprep.subr.bf16.mxu1 %v1191_v1 }
  0x47   : > { %978 = vmatprep.mubr.msk.bf16.mxu0 %vm338_vm0, %v961_v43  ;;  %1002 = vmatprep.mubr.msk.bf16.mxu1 %vm338_vm0, %v1355_v44 }
  0x49   : > { %740 = vmatpush1.bf16.msra.mxu0 %v1160_v45  ;;  %1110 = vmatpush1.bf16.msra.mxu1 %v1160_v45 }
  0x4a   : > { %741 = vmatprep.subr.bf16.mxu0 %v1191_v1  ;;  %1099 = vmatprep.subr.bf16.mxu1 %v1191_v1 }
  0x4c   : > { %400 = vmatmul.mubr.bf16.gmra.mxu0 %v960_v46  ;;  %564 = vmatmul.mubr.bf16.gmra.mxu1 %v984_v50 }
  0x4d   : > { %742 = vmatpush1.bf16.msra.mxu0 %v1163_v49  ;;  %1111 = vmatpush1.bf16.msra.mxu1 %v1163_v49 }
  0x4e   : > { %743 = vmatprep.subr.bf16.mxu0 %v1191_v1  ;;  %1100 = vmatprep.subr.bf16.mxu1 %v1191_v1 }
  0x4f   : > { %979 = vmatprep.mubr.msk.bf16.mxu0 %vm338_vm0, %v963_v51  ;;  %1003 = vmatprep.mubr.msk.bf16.mxu1 %vm338_vm0, %v987_v52 }
  0x51   : > { %744 = vmatpush1.bf16.msra.mxu0 %v1166_v53  ;;  %1112 = vmatpush1.bf16.msra.mxu1 %v1166_v53 }
  0x52   : > { %745 = vmatprep.subr.bf16.mxu0 %v1191_v1  ;;  %1101 = vmatprep.subr.bf16.mxu1 %v1191_v1 }
  0x54   : > { %408 = vmatmul.mubr.bf16.gmra.mxu0 %v962_v54  ;;  %572 = vmatmul.mubr.bf16.gmra.mxu1 %v986_v56 }
  0x55   : > { %746 = vmatpush1.bf16.msra.mxu0 %v1169_v55  ;;  %1113 = vmatpush1.bf16.msra.mxu1 %v1169_v55 }
  0x56   : > { %747 = vmatprep.subr.bf16.mxu0 %v1191_v1  ;;  %1102 = vmatprep.subr.bf16.mxu1 %v1191_v1 }
  0x57   : > { %1048 = vmatprep.mubr.msk.bf16.mxu0 %vm338_vm0, %v1336_v36  ;;  %1050 = vmatprep.mubr.msk.bf16.mxu1 %vm338_vm0, %v987_v52 }
  0x59   : > { %748 = vmatpush1.bf16.msra.mxu0 %v1172_v57  ;;  %1114 = vmatpush1.bf16.msra.mxu1 %v1172_v57 }
  0x5a   : > { %757 = vmatprep.subr.bf16.mxu0 %v1191_v1  ;;  %1103 = vmatprep.subr.bf16.mxu1 %v1191_v1 }
  0x5d   : > { %758 = vmatpush2.bf16.msra.mxu0 %v1175_v58  ;;  %1115 = vmatpush2.bf16.msra.mxu1 %v1175_v58 }
  0x5e   : > { %759 = vmatprep.subr.bf16.mxu0 %v1191_v1  ;;  %1104 = vmatprep.subr.bf16.mxu1 %v1191_v1 }
  0x61   : > { %760 = vmatpush2.bf16.msra.mxu0 %v1178_v59  ;;  %1116 = vmatpush2.bf16.msra.mxu1 %v1178_v59 }
  0x62   : > { %761 = vmatprep.subr.bf16.mxu0 %v1191_v1  ;;  %1105 = vmatprep.subr.bf16.mxu1 %v1191_v1 }
  0x65   : > { %762 = vmatpush2.bf16.msra.mxu0 %v1179_v60  ;;  %1117 = vmatpush2.bf16.msra.mxu1 %v1179_v60 }
  0x66   : > { %763 = vmatprep.subr.bf16.mxu0 %v1191_v1  ;;  %1106 = vmatprep.subr.bf16.mxu1 %v1191_v1 }
  0x69   : > { %764 = vmatpush2.bf16.msra.mxu0 %v1180_v61  ;;  %1118 = vmatpush2.bf16.msra.mxu1 %v1180_v61 }
  0x6c   : > { %766 = vmatmul.mubr.bf16.vlgmr.msra.gmra.mxu0 %v1351_v42  ;;  %782 = vmatmul.mubr.bf16.vlgmr.msra.gmra.mxu1 %v986_v56 }
  0x6d   : > { %1049 = vmatprep.mubr.msk.bf16.mxu0 %vm338_vm0, %v1355_v44  ;;  %1051 = vmatprep.mubr.msk.bf16.mxu1 %vm338_vm0, %v1035_v63 }
  0x74   : > { %774 = vmatmul.mubr.bf16.gmra.mxu0 %v984_v50  ;;  %790 = vmatmul.mubr.bf16.gmra.mxu1 %v1034_v0 }
  0xfc   : > { %v385_v2 = vpop.f32.mrf.mxu0  ;;  %v549_v3 = vpop.f32.mrf.mxu1 }
  0xfd   : > { %v550_v33 = vadd.f32 %v549_v3, %v385_v2 }
  0xfe   : > { %v387_v1 = vpop.f32.mrf.mxu0  ;;  %v551_v4 = vpop.f32.mrf.mxu1 }
 0x100   : > { %v388_v5 = vpop.f32.mrf.mxu0  ;;  %v552_v6 = vpop.f32.mrf.mxu1 }
 0x101   : > { %v553_v41 = vadd.f32 %v552_v6, %v388_v5 }
 0x102   : > { %v390_v7 = vpop.f32.mrf.mxu0  ;;  %v554_v8 = vpop.f32.mrf.mxu1 }
 0x104   : > { %v393_v9 = vpop.f32.mrf.mxu0  ;;  %v557_v10 = vpop.f32.mrf.mxu1 }
 0x105   : > { %v558_v51 = vadd.f32 %v557_v10, %v393_v9 }
 0x106   : > { %v395_v11 = vpop.f32.mrf.mxu0  ;;  %v559_v12 = vpop.f32.mrf.mxu1 }
 0x108   : > { %v396_v13 = vpop.f32.mrf.mxu0  ;;  %v560_v14 = vpop.f32.mrf.mxu1 }
 0x109   : > { %v561_v2 = vadd.f32 %v560_v14, %v396_v13 }
 0x10a   : > { %v398_v15 = vpop.f32.mrf.mxu0  ;;  %v562_v16 = vpop.f32.mrf.mxu1 }
 0x10c   : > { %v401_v17 = vpop.f32.mrf.mxu0  ;;  %v565_v18 = vpop.f32.mrf.mxu1 }
 0x10d   : > { %v566_v34 = vadd.f32 %v565_v18, %v401_v17 }
 0x10e   : > { %v403_v19 = vpop.f32.mrf.mxu0  ;;  %v567_v20 = vpop.f32.mrf.mxu1 }
 0x110   : > { %v404_v21 = vpop.f32.mrf.mxu0  ;;  %v568_v22 = vpop.f32.mrf.mxu1 }
 0x111   : > { %v569_v43 = vadd.f32 %v568_v22, %v404_v21 }
 0x112   : > { %v406_v23 = vpop.f32.mrf.mxu0  ;;  %v570_v24 = vpop.f32.mrf.mxu1 }
 0x114   : > { %v409_v25 = vpop.f32.mrf.mxu0  ;;  %v573_v26 = vpop.f32.mrf.mxu1 }
 0x115   : > { %v574_v54 = vadd.f32 %v573_v26, %v409_v25 }
 0x116   : > { %v411_v27 = vpop.f32.mrf.mxu0  ;;  %v575_v28 = vpop.f32.mrf.mxu1 }
 0x118   : > { %v412_v29 = vpop.f32.mrf.mxu0  ;;  %v576_v30 = vpop.f32.mrf.mxu1 }
 0x119   : > { %v577_v4 = vadd.f32 %v576_v30, %v412_v29 }
 0x11a   : > { %v414_v31 = vpop.f32.mrf.mxu0  ;;  %v578_v32 = vpop.f32.mrf.mxu1 }
 0x12c   : > { %v767_v35 = vpop.f32.mrf.mxu0  ;;  %v783_v37 = vpop.f32.mrf.mxu1 }
 0x12d   : > { %v798_v36 = vadd.f32 %v767_v35, %v550_v33  ;;  %v802_v39 = vadd.f32 %v783_v37, %v566_v34 }
 0x12e   : > { %v769_v40 = vpop.f32.mrf.mxu0  ;;  %v785_v42 = vpop.f32.mrf.mxu1 }
 0x12f   : > { %v813_v45 = vadd.f32 %v1052_v38, %v798_v36  ;;  %v817_v48 = vadd.f32 %v1052_v38, %v802_v39 }
 0x130   : > { %v770_v44 = vpop.f32.mrf.mxu0  ;;  %v786_v47 = vpop.f32.mrf.mxu1 }
 0x131   : > { %v799_v46 = vadd.f32 %v770_v44, %v553_v41  ;;  %v803_v49 = vadd.f32 %v786_v47, %v569_v43  ;;  %v821_v57 = vmax.f32 %v813_v45, 0.0  ;;  %v825_v61 = vmax.f32 %v817_v48, 0.0 }
 0x132   : > { %v772_v50 = vpop.f32.mrf.mxu0  ;;  %v788_v53 = vpop.f32.mrf.mxu1 }
 0x133   : > { %v814_v52 = vadd.f32 %v1052_v38, %v799_v46  ;;  %v818_v55 = vadd.f32 %v1052_v38, %v803_v49 }
 0x134   : > { %v775_v56 = vpop.f32.mrf.mxu0  ;;  %v791_v60 = vpop.f32.mrf.mxu1 }
 0x135   : > { %v822_v58 = vmax.f32 %v814_v52, 0.0  ;;  %v800_v59 = vadd.f32 %v775_v56, %v558_v51  ;;  %v826_v62 = vmax.f32 %v818_v55, 0.0  ;;  %v804_v63 = vadd.f32 %v791_v60, %v574_v54 }
 0x136   : > { %v777_v0 = vpop.f32.mrf.mxu0  ;;  %v793_v1 = vpop.f32.mrf.mxu1 }
 0x137   : > { %v1075_v3 = vpack.c.bf16 %v822_v58, %v821_v57  ;;  %v1085_v5 = vpack.c.bf16 %v826_v62, %v825_v61  ;;  %v815_v7 = vadd.f32 %v1052_v38, %v800_v59  ;;  %v819_v10 = vadd.f32 %v1052_v38, %v804_v63 }
 0x138   : > { %v778_v6 = vpop.f32.mrf.mxu0  ;;  %v794_v9 = vpop.f32.mrf.mxu1 }
 0x139   : > { %1076 = vst [vmem:[%s170_s21] sm:$0xff] %v1075_v3   ;;  %v801_v8 = vadd.f32 %v778_v6, %v561_v2  ;;  %1093 = vst [vmem:[%s170_s21 + $0x10] sm:$0xff] %v1085_v5   ;;  %v805_v11 = vadd.f32 %v794_v9, %v577_v4  ;;  %v823_v18 = vmax.f32 %v815_v7, 0.0  ;;  %v827_v20 = vmax.f32 %v819_v10, 0.0 }
 0x13a   : > { %v780_v12 = vpop.f32.mrf.mxu0  ;;  %v796_v16 = vpop.f32.mrf.mxu1 }
 0x13b   : > { %v816_v15 = vadd.f32 %v1052_v38, %v801_v8  ;;  %v820_v17 = vadd.f32 %v1052_v38, %v805_v11 }
 0x13d   : > { %v824_v19 = vmax.f32 %v816_v15, 0.0  ;;  %v828_v13 = vmax.f32 %v820_v17, 0.0 }
 0x13f   : > { %v1080_v14 = vpack.c.bf16 %v824_v19, %v823_v18  ;;  %v1090_v21 = vpack.c.bf16 %v828_v13, %v827_v20 }
 0x141   : > { %1092 = vst [vmem:[%s170_s21 + $0x8] sm:$0xff] %v1080_v14   ;;  %1094 = vst [vmem:[%s170_s21 + $0x18] sm:$0xff] %v1090_v21  }
 0x142 PF: > { %s13_s12 = sadd.s32 1, %s1189_s12  }
 0x143   : > { %p10_p4 = scmp.ge.s32.totalorder %s13_s12, 4  }
 0x145   :  { %12 = sbr.rel (!%p10_p4) target bundleno = 1 (0x1), region = 64 }

// kernel: unet_forward.13
= control target key start
LH: loop header
LB: loop body
LE: loop exit
PB: predicated region body
PF: predicated region fallthrough
CT: control target
= control target key end

     0   :  { %s250_s6 = smov 0   ;;  %s267_s0 = inlined_call_operand.vmem [shape: bf16[8,2,4,256], index: 0, kind: input, shape index: {}]   ;;  %s268_s1 = inlined_call_operand.vmem [shape: bf16[8,4,128], index: 1, kind: output, shape index: {}]  }
   0x1 LB: > { %s211_s7 = sadd.s32 4294967295, %s238_s6   ;;  %p215_p0 = scmp.ge.s32.totalorder %s238_s6, 1  ;;  %s238_s6 = sphi %s250_s6, %s11_s6  }
   0x2   : > { %p89_p1 = scmp.lt.s32.totalorder %s238_s6, 3 }
   0x4   : > { %p90_p2 = pnand %p215_p0, %p89_p1 }
   0x5   : > { %s216_s8 = sshll.u32 (!%p90_p2), %s211_s7, 2 }
   0x6   : > { %93 = sbr.rel (%p90_p2) target bundleno = 24 (0x18), region = 24  ;;  %p111_p3 = scmp.lt.s32.totalorder (!%p90_p2), %s216_s8, 7 }
   0xb   : > { %s270_s8 = smov (!%p111_p3, %s216_s8), 7 }
   0xc   : > { %s223_s9 = sshll.u32 %s270_s8, 3  ;;  %s220_s13 = sshll.u32 %s270_s8, 1 }
   0xd   : > { %s115_s12 = scalar_lea.vmem %s267_s0, %s223_s9  ;;  %s121_s16 = scalar_lea.vmem %s268_s1, %s220_s13 }
   0xe   : > { %v123_v0 = vld [vmem:[%s115_s12] sm:$0xf]  ;;  %v124_v1 = vld [vmem:[%s115_s12 + $0x4] sm:$0xf]  ;;  %v125_v2 = vld [vmem:[%s115_s12 + $0x8] sm:$0xf] }
   0xf   : > { %v131_v3 = vmax.bf16 %v124_v1, %v123_v0  ;;  %v126_v4 = vld [vmem:[%s115_s12 + $0xc] sm:$0xf]  ;;  %v127_v5 = vld [vmem:[%s115_s12 + $0x10] sm:$0xf]  ;;  %v128_v6 = vld [vmem:[%s115_s12 + $0x14] sm:$0xf] }
  0x10   : > { %v132_v7 = vmax.bf16 %v126_v4, %v125_v2  ;;  %v133_v8 = vmax.bf16 %v128_v6, %v127_v5  ;;  %v129_v9 = vld [vmem:[%s115_s12 + $0x18] sm:$0xf]  ;;  %v130_v10 = vld [vmem:[%s115_s12 + $0x1c] sm:$0xf] }
  0x11   : > { %v139_v11 = vrot.slane %v131_v3, 2  ;;  %v134_v12 = vmax.bf16 %v130_v10, %v129_v9 }
  0x12   : > { %v140_v13 = vrot.slane %v132_v7, 2  ;;  %v141_v14 = vrot.slane %v133_v8, 2 }
  0x13   : > { %v147_v15 = vmax.bf16 %v139_v11, %v131_v3  ;;  %v142_v16 = vrot.slane %v134_v12, 2 }
  0x14   : > { %v148_v17 = vmax.bf16 %v140_v13, %v132_v7  ;;  %v149_v18 = vmax.bf16 %v141_v14, %v133_v8 }
  0x15   : > { %151 = vst [vmem:[%s121_s16] sm:$0x3] %v147_v15  ;;  %v150_v19 = vmax.bf16 %v142_v16, %v134_v12 }
  0x16   : > { %152 = vst [vmem:[%s121_s16 + $0x2] sm:$0x3] %v148_v17  ;;  %153 = vst [vmem:[%s121_s16 + $0x4] sm:$0x3] %v149_v18 }
  0x17   : > { %154 = vst [vmem:[%s121_s16 + $0x6] sm:$0x3] %v150_v19 }
  0x18 PF: > { %s11_s6 = sadd.s32 1, %s238_s6  }
  0x19   : > { %p8_p4 = scmp.ge.s32.totalorder %s11_s6, 4  }
  0x1b   :  { %10 = sbr.rel (!%p8_p4) target bundleno = 1 (0x1), region = 54 }

// kernel: unet_forward.12
= control target key start
LH: loop header
LB: loop body
LE: loop exit
PB: predicated region body
PF: predicated region fallthrough
CT: control target
= control target key end

     0   :  { %s2079_s12 = smov 0   ;;  %s2507_s0 = inlined_call_operand.vmem [shape: bf16[2,80,384], index: 0, kind: input, shape index: {}]   ;;  %s2508_s1 = inlined_call_operand.vmem [shape: bf16[3,384,128], index: 1, kind: input, shape index: {}]   ;;  %s2509_s2 = inlined_call_operand.vmem [shape: f32[1,128], index: 2, kind: input, shape index: {}]   ;;  %s2510_s3 = inlined_call_operand.vmem [shape: bf16[2,64,128], index: 3, kind: output, shape index: {}]  }
   0x1 LB: > { %s1457_s13 = sadd.s32 4294967295, %s2057_s12   ;;  %p1461_p0 = scmp.ge.s32.totalorder %s2057_s12, 1  ;;  %s2057_s12 = sphi %s2079_s12, %s13_s12  }
   0x2   : > { %p137_p1 = scmp.lt.s32.totalorder %s2057_s12, 3 }
   0x4   : > { %p138_p2 = pnand %p1461_p0, %p137_p1 }
   0x5   : > { %p161_p3 = scmp.lt.s32.totalorder (!%p138_p2), %s1457_s13, 1 }
   0x6   : > { %141 = sbr.rel (%p138_p2) target bundleno = 344 (0x158), region = 32 }
   0xb   : > { %v1949_v0 = vld [vmem:[%s2508_s1 + $0x138] sm:$0xff]   ;;  %v1952_v3 = vld [vmem:[%s2508_s1 + $0x130] sm:$0xff]   ;;  %v1955_v6 = vld [vmem:[%s2508_s1 + $0x128] sm:$0xff]   ;;  %s2512_s13 = smov (!%p161_p3, %s1457_s13), 1 }
   0xc   : > { %v1950_v1 = vld [vmem:[%s2508_s1 + $0xf8] sm:$0xff]   ;;  %1712 = vmatprep.subr.bf16.mxu0 %v1949_v0  ;;  %v1953_v4 = vld [vmem:[%s2508_s1 + $0xf0] sm:$0xff]   ;;  %v1956_v7 = vld [vmem:[%s2508_s1 + $0xe8] sm:$0xff]   ;;  %s1940_s21 = smul.u32 120, %s2512_s13  ;;  %s1680_s17 = sshll.u32 %s2512_s13, 5 }
   0xd   : > { %v1951_v2 = vld [vmem:[%s2508_s1 + $0x178] sm:$0xff]   ;;  %1713 = vmatpush3.bf16.msra.mxu0 %v1950_v1  ;;  %v1954_v5 = vld [vmem:[%s2508_s1 + $0x170] sm:$0xff]   ;;  %v1957_v8 = vld [vmem:[%s2508_s1 + $0x168] sm:$0xff]   ;;  %s2476_s13 = scalar_lea.vmem %s2510_s3, %s1680_s17 }
   0xe   : > { %1868 = vmatprep.subr.bf16.mxu1 %v1951_v2  ;;  %1714 = vmatprep.subr.bf16.mxu0 %v1952_v3  ;;  %v1958_v9 = vld [vmem:[%s2508_s1 + $0x120] sm:$0xff]   ;;  %v1961_v12 = vld [vmem:[%s2508_s1 + $0x118] sm:$0xff]   ;;  %v1964_v15 = vld [vmem:[%s2508_s1 + $0x110] sm:$0xff]   ;;  %s2157_s5 = scalar_lea.vmem %s2507_s0, %s1940_s21 }
   0xf   : > { %1869 = vmatpush3.bf16.msra.mxu1 %v1951_v2  ;;  %v1959_v10 = vld [vmem:[%s2508_s1 + $0xe0] sm:$0xff]   ;;  %v1963_v13 = vld [vmem:[%s2508_s1 + $0x158] sm:$0xff]   ;;  %v1966_v16 = vld [vmem:[%s2508_s1 + $0x150] sm:$0xff]  }
  0x10   : > { %1870 = vmatprep.subr.bf16.mxu1 %v1954_v5  ;;  %v1960_v11 = vld [vmem:[%s2508_s1 + $0x160] sm:$0xff]   ;;  %v1962_v14 = vld [vmem:[%s2508_s1 + $0xd8] sm:$0xff]   ;;  %v1965_v17 = vld [vmem:[%s2508_s1 + $0xd0] sm:$0xff]  }
  0x11   : > { %1715 = vmatpush3.bf16.msra.mxu0 %v1953_v4  ;;  %v1967_v18 = vld [vmem:[%s2508_s1 + $0x108] sm:$0xff]   ;;  %v1970_v21 = vld [vmem:[%s2508_s1 + $0x100] sm:$0xff]   ;;  %v2169_v23 = vld [vmem:[%s2157_s5 + $0x18] sm:$0xff] }
  0x12   : > { %1716 = vmatprep.subr.bf16.mxu0 %v1955_v6  ;;  %v1968_v19 = vld [vmem:[%s2508_s1 + $0xc8] sm:$0xff]   ;;  %v1971_v24 = vld [vmem:[%s2508_s1 + $0xc0] sm:$0xff]   ;;  %v2180_v27 = vld [vmem:[%s2157_s5 + $0x14] sm:$0xf] }
  0x13   : > { %1871 = vmatpush3.bf16.msra.mxu1 %v1954_v5  ;;  %v1969_v20 = vld [vmem:[%s2508_s1 + $0x148] sm:$0xff]   ;;  %v1972_v26 = vld [vmem:[%s2508_s1 + $0x140] sm:$0xff]   ;;  %v1975_v29 = vld [vmem:[%s2508_s1 + $0x78] sm:$0xff]  }
  0x14   : > { %1872 = vmatprep.subr.bf16.mxu1 %v1957_v8  ;;  %v2166_v22 = vld [vmem:[%s2157_s5 + $0xc] sm:$0xff]  ;;  %v2183_v28 = vld [vmem:[%s2157_s5 + $0x20] sm:$0xf]  ;;  %v2194_v32 = vld [vmem:[%s2157_s5 + $0x38] sm:$0xf] }
  0x15   : > { %1717 = vmatpush3.bf16.msra.mxu0 %v1956_v7  ;;  %v1514_v25 = vcombine.high %v2166_v22, %v2169_v23  ;;  %v1515_v30 = vcombine.low %v2180_v27, %v2183_v28  ;;  %v2191_v31 = vld [vmem:[%s2157_s5 + $0x2c] sm:$0xf]  ;;  %v1513_v33 = vcombine.low %v2166_v22, %v2169_v23  ;;  %v1981_v34 = vld [vmem:[%s2508_s1 + $0xb8] sm:$0xff]   ;;  %v1982_v37 = vld [vmem:[%s2508_s1 + $0x70] sm:$0xff]  }
  0x16   : > { %1718 = vmatprep.subr.bf16.mxu0 %v1958_v9  ;;  %v1979_v35 = vld [vmem:[%s2508_s1 + $0x38] sm:$0xff]   ;;  %v1518_v36 = vcombine.low %v2191_v31, %v2194_v32  ;;  %v2210_v38 = vld [vmem:[%s2157_s5 + $0x24] sm:$0xff]  ;;  %v2213_v39 = vld [vmem:[%s2157_s5 + $0x30] sm:$0xff] }
  0x17   : > { %1873 = vmatpush3.bf16.msra.mxu1 %v1957_v8  ;;  %527 = vmatprep.mubr.bf16.mxu0 %v1514_v25  ;;  %v1517_v40 = vcombine.high %v2210_v38, %v2213_v39  ;;  %v1984_v41 = vld [vmem:[%s2508_s1 + $0xb0] sm:$0xff]   ;;  %v1987_v43 = vld [vmem:[%s2508_s1 + $0x68] sm:$0xff]   ;;  %v1516_v46 = vcombine.low %v2210_v38, %v2213_v39  ;;  %v2236_v48 = vld [vmem:[%s2157_s5 + $0x3c] sm:$0xff] }
  0x18   : > { %1874 = vmatprep.subr.bf16.mxu1 %v1960_v11  ;;  %1884 = vmatprep.mubr.bf16.mxu1 %v1515_v30  ;;  %v1983_v42 = vld [vmem:[%s2508_s1 + $0x30] sm:$0xff]   ;;  %v1988_v44 = vld [vmem:[%s2508_s1 + $0x28] sm:$0xff]   ;;  %v1990_v50 = vld [vmem:[%s2508_s1 + $0x60] sm:$0xff]  }
  0x19   : > { %1719 = vmatpush3.bf16.msra.mxu0 %v1959_v10  ;;  %v173_v45 = vld [vmem:[%s2157_s5 + $0x8] sm:$0xf]  ;;  %v2247_v52 = vld [vmem:[%s2157_s5 + $0x44] sm:$0xf]  ;;  %v2250_v53 = vld [vmem:[%s2157_s5 + $0x50] sm:$0xf] }
  0x1a   : > { %1720 = vmatprep.subr.bf16.mxu0 %v1961_v12  ;;  %v1989_v47 = vld [vmem:[%s2508_s1 + $0xa8] sm:$0xff]   ;;  %v1992_v54 = vld [vmem:[%s2508_s1 + $0xa0] sm:$0xff]   ;;  %v1521_v55 = vcombine.low %v2247_v52, %v2250_v53  ;;  %v2258_v56 = vld [vmem:[%s2157_s5 + $0x5c] sm:$0xf]  ;;  %v1551_v58 = vcombine.low %v173_v45, %v2180_v27 }
  0x1b   : > { %1875 = vmatpush3.bf16.msra.mxu1 %v1960_v11  ;;  %v2239_v49 = vld [vmem:[%s2157_s5 + $0x48] sm:$0xff]  ;;  %v1991_v59 = vld [vmem:[%s2508_s1 + $0x20] sm:$0xff]   ;;  %v1995_v61 = vld [vmem:[%s2508_s1 + $0x58] sm:$0xff]  }
  0x1c   : > { %1876 = vmatprep.subr.bf16.mxu1 %v1963_v13  ;;  %v1520_v51 = vcombine.high %v2236_v48, %v2239_v49  ;;  %v237_v57 = vld [vmem:[%s2157_s5 + $0x68] sm:$0xf]  ;;  %v1997_v62 = vld [vmem:[%s2508_s1 + $0x18] sm:$0xff]   ;;  %v1519_v63 = vcombine.low %v2236_v48, %v2239_v49  ;;  %v2281_v2 = vld [vmem:[%s2157_s5 + $0x60] sm:$0xff] }
  0x1d   : > { %1721 = vmatpush3.bf16.msra.mxu0 %v1962_v14  ;;  %v1524_v60 = vcombine.low %v2258_v56, %v237_v57  ;;  %v1999_v0 = vld [vmem:[%s2508_s1 + $0x98] sm:$0xff]   ;;  %v2000_v3 = vld [vmem:[%s2508_s1 + $0x50] sm:$0xff]   ;;  %v2005_v7 = vld [vmem:[%s2508_s1 + $0x48] sm:$0xff]  }
  0x1e   : > { %1722 = vmatprep.subr.bf16.mxu0 %v1964_v15  ;;  %v2278_v1 = vld [vmem:[%s2157_s5 + $0x54] sm:$0xff]  ;;  %v172_v8 = vld [vmem:[%s2157_s5] sm:$0xff]  ;;  %v2007_v10 = vld [vmem:[%s2508_s1 + $0x88] sm:$0xff]  }
  0x1f   : > { %1877 = vmatpush3.bf16.msra.mxu1 %v1963_v13  ;;  %v1523_v4 = vcombine.high %v2278_v1, %v2281_v2  ;;  %v2002_v5 = vld [vmem:[%s2508_s1 + $0x90] sm:$0xff]   ;;  %v1522_v9 = vcombine.low %v2278_v1, %v2281_v2  ;;  %v2006_v11 = vld [vmem:[%s2508_s1 + $0x8] sm:$0xff]   ;;  %v1550_v12 = vcombine.high %v172_v8, %v2166_v22  ;;  %v2008_v13 = vld [vmem:[%s2508_s1 + $0x40] sm:$0xff]  }
  0x20   : > { %1878 = vmatprep.subr.bf16.mxu1 %v1966_v16  ;;  %v2001_v6 = vld [vmem:[%s2508_s1 + $0x10] sm:$0xff]   ;;  %v2010_v14 = vld [vmem:[%s2508_s1 + $0x80] sm:$0xff]   ;;  %v2021_v27 = vld [vmem:[%s2508_s1 + $0x1e8] sm:$0xff]  }
  0x21   : > { %1723 = vmatpush3.bf16.msra.mxu0 %v1965_v17  ;;  %v2009_v15 = vld [vmem:[%s2508_s1] sm:$0xff]   ;;  %v1549_v17 = vcombine.low %v172_v8, %v2166_v22  ;;  %v2016_v22 = vld [vmem:[%s2508_s1 + $0x1f0] sm:$0xff]   ;;  %v2022_v30 = vld [vmem:[%s2508_s1 + $0x1a8] sm:$0xff]  }
  0x22   : > { %1724 = vmatprep.subr.bf16.mxu0 %v1967_v18  ;;  %v2015_v18 = vld [vmem:[%s2508_s1 + $0x238] sm:$0xff]   ;;  %v2018_v25 = vld [vmem:[%s2508_s1 + $0x230] sm:$0xff]  }
  0x23   : > { %1879 = vmatpush3.bf16.msra.mxu1 %v1966_v16  ;;  %v2013_v16 = vld [vmem:[%s2508_s1 + $0x1f8] sm:$0xff]  }
  0x24   : > { %1880 = vmatprep.subr.bf16.mxu1 %v1969_v20 }
  0x25   : > { %1725 = vmatpush3.bf16.msra.mxu0 %v1968_v19  ;;  %v2014_v19 = vld [vmem:[%s2508_s1 + $0x1b8] sm:$0xff]  }
  0x26   : > { %1726 = vmatprep.subr.bf16.mxu0 %v1970_v21  ;;  %v1554_v21 = vcombine.low %v2183_v28, %v2191_v31  ;;  %v1552_v28 = vcombine.low %v2169_v23, %v2210_v38  ;;  %v1556_v31 = vcombine.high %v2213_v39, %v2236_v48 }
  0x27   : > { %1881 = vmatpush3.bf16.msra.mxu1 %v1969_v20  ;;  %v2328_v20 = vcombine.high %v2169_v23, %v2210_v38  ;;  %v1560_v23 = vcombine.low %v2250_v53, %v2258_v56  ;;  %v2045_v38 = vld [vmem:[%s2157_s5 + $0x20] ss:$12 sps:$4 sm:$0xff]   ;;  %v2048_v56 = vld [vmem:[%s2157_s5 + $0x68] ss:$12 sps:$4 sm:$0xff]  }
  0x28   : > { %1882 = vmatprep.subr.bf16.mxu1 %v1972_v26  ;;  %v2043_v53 = vld [vmem:[%s2508_s1 + $0x180] sm:$0xff]  }
  0x29   : > { %1727 = vmatpush3.bf16.msra.mxu0 %v1971_v24  ;;  %v1557_v24 = vcombine.low %v2194_v32, %v2247_v52  ;;  %v2024_v32 = vld [vmem:[%s2508_s1 + $0x1e0] sm:$0xff]  }
  0x2a   : > { %1764 = vmatprep.subr.bf16.mxu0 %v1975_v29  ;;  %v2023_v29 = vld [vmem:[%s2508_s1 + $0x228] sm:$0xff]   ;;  %v2042_v52 = vld [vmem:[%s2508_s1 + $0x1c0] sm:$0xff]  }
  0x2b   : > { %1883 = vmatpush3.bf16.msra.mxu1 %v1972_v26  ;;  %v2017_v26 = vld [vmem:[%s2508_s1 + $0x1b0] sm:$0xff]  }
  0x2c   : > { %528 = vmatmul.mubr.bf16.vlgmr.msra.gmra.mxu0 %v1513_v33  ;;  %1892 = vmatprep.subr.bf16.mxu1 %v1981_v34  ;;  %v2026_v33 = vld [vmem:[%s2508_s1 + $0x220] sm:$0xff]  }
  0x2d   : > { %1765 = vmatpush3.bf16.msra.mxu0 %v1979_v35  ;;  %535 = vmatprep.mubr.bf16.mxu0 %v1517_v40  ;;  %v2029_v35 = vld [vmem:[%s2508_s1 + $0x1d8] sm:$0xff]  }
  0x2e   : > { %1885 = vmatmul.mubr.bf16.vlgmr.msra.gmra.mxu1 %v1518_v36  ;;  %1766 = vmatprep.subr.bf16.mxu0 %v1982_v37  ;;  %v2031_v36 = vld [vmem:[%s2508_s1 + $0x218] sm:$0xff]   ;;  %v1555_v37 = vcombine.low %v2213_v39, %v2236_v48  ;;  %v2036_v39 = vld [vmem:[%s2508_s1 + $0x210] sm:$0xff]   ;;  %v1558_v48 = vcombine.low %v2239_v49, %v2278_v1 }
  0x2f   : > { %1893 = vmatpush3.bf16.msra.mxu1 %v1981_v34  ;;  %1888 = vmatprep.mubr.bf16.mxu1 %v1521_v55  ;;  %v2025_v34 = vld [vmem:[%s2508_s1 + $0x1a0] sm:$0xff]   ;;  %v2030_v40 = vld [vmem:[%s2508_s1 + $0x198] sm:$0xff]  }
  0x30   : > { %1894 = vmatprep.subr.bf16.mxu1 %v1984_v41  ;;  %v2047_v55 = vld [vmem:[%s2157_s5 + $0x50] ss:$12 sps:$4 sm:$0xff]  }
  0x31   : > { %1767 = vmatpush3.bf16.msra.mxu0 %v1983_v42  ;;  %v2034_v42 = vld [vmem:[%s2508_s1 + $0x1d0] sm:$0xff]  }
  0x32   : > { %1768 = vmatprep.subr.bf16.mxu0 %v1987_v43  ;;  %v942_v43 = vld [vmem:[%s2157_s5 + $0x6c] sm:$0xff] }
  0x33   : > { %1895 = vmatpush3.bf16.msra.mxu1 %v1984_v41  ;;  %v1559_v41 = vcombine.high %v2239_v49, %v2278_v1  ;;  %v1643_v45 = vcombine.high %v2281_v2, %v942_v43  ;;  %v2044_v49 = vld [vmem:[%s2508_s1 + $0x200] sm:$0xff]  }
  0x34   : > { %536 = vmatmul.mubr.bf16.gmra.mxu0 %v1516_v46  ;;  %1896 = vmatprep.subr.bf16.mxu1 %v1989_v47  ;;  %v1642_v46 = vcombine.low %v2281_v2, %v942_v43 }
  0x35   : > { %1769 = vmatpush3.bf16.msra.mxu0 %v1988_v44  ;;  %543 = vmatprep.mubr.bf16.mxu0 %v1520_v51  ;;  %v2035_v44 = vld [vmem:[%s2508_s1 + $0x190] sm:$0xff]   ;;  %v2040_v51 = vld [vmem:[%s2508_s1 + $0x188] sm:$0xff]  }
  0x36   : > { %1770 = vmatprep.subr.bf16.mxu0 %v1990_v50  ;;  %1889 = vmatmul.mubr.bf16.gmra.mxu1 %v1524_v60  ;;  %v2041_v50 = vld [vmem:[%s2508_s1 + $0x208] sm:$0xff]  }
  0x37   : > { %1897 = vmatpush3.bf16.msra.mxu1 %v1989_v47  ;;  %1908 = vmatprep.mubr.bf16.mxu1 %v1551_v58  ;;  %v2039_v47 = vld [vmem:[%s2508_s1 + $0x1c8] sm:$0xff]  }
  0x38   : > { %1898 = vmatprep.subr.bf16.mxu1 %v1992_v54 }
  0x39   : > { %1771 = vmatpush3.bf16.msra.mxu0 %v1991_v59 }
  0x3a   : > { %1772 = vmatprep.subr.bf16.mxu0 %v1995_v61 }
  0x3b   : > { %1899 = vmatpush3.bf16.msra.mxu1 %v1992_v54  ;;  %v2046_v54 = vld [vmem:[%s2157_s5 + $0x38] ss:$12 sps:$4 sm:$0xff]  }
  0x3c   : > { %544 = vmatmul.mubr.bf16.gmra.mxu0 %v1519_v63  ;;  %1900 = vmatprep.subr.bf16.mxu1 %v1999_v0 }
  0x3d   : > { %1773 = vmatpush3.bf16.msra.mxu0 %v1997_v62  ;;  %551 = vmatprep.mubr.bf16.mxu0 %v1523_v4 }
  0x3e   : > { %1774 = vmatprep.subr.bf16.mxu0 %v2000_v3 }
  0x3f   : > { %1901 = vmatpush3.bf16.msra.mxu1 %v1999_v0 }
  0x40   : > { %1902 = vmatprep.subr.bf16.mxu1 %v2002_v5 }
  0x41   : > { %1775 = vmatpush3.bf16.msra.mxu0 %v2001_v6 }
  0x42   : > { %1776 = vmatprep.subr.bf16.mxu0 %v2005_v7 }
  0x43   : > { %1903 = vmatpush3.bf16.msra.mxu1 %v2002_v5 }
  0x44   : > { %552 = vmatmul.mubr.bf16.gmra.mxu0 %v1522_v9  ;;  %1904 = vmatprep.subr.bf16.mxu1 %v2007_v10 }
  0x45   : > { %1777 = vmatpush3.bf16.msra.mxu0 %v2006_v11  ;;  %830 = vmatprep.mubr.bf16.mxu0 %v1550_v12 }
  0x46   : > { %1778 = vmatprep.subr.bf16.mxu0 %v2008_v13 }
  0x47   : > { %1905 = vmatpush3.bf16.msra.mxu1 %v2007_v10 }
  0x48   : > { %1906 = vmatprep.subr.bf16.mxu1 %v2010_v14 }
  0x49   : > { %1779 = vmatpush3.bf16.msra.mxu0 %v2009_v15 }
  0x4a   : > { %1816 = vmatprep.subr.bf16.mxu0 %v2013_v16 }
  0x4b   : > { %1907 = vmatpush3.bf16.msra.mxu1 %v2010_v14 }
  0x4c   : > { %831 = vmatmul.mubr.bf16.vlgmr.msra.gmra.mxu0 %v1549_v17  ;;  %1916 = vmatprep.subr.bf16.mxu1 %v2015_v18 }
  0x4d   : > { %1817 = vmatpush3.bf16.msra.mxu0 %v2014_v19  ;;  %838 = vmatprep.mubr.bf16.mxu0 %v2328_v20 }
  0x4e   : > { %1909 = vmatmul.mubr.bf16.vlgmr.msra.gmra.mxu1 %v1554_v21  ;;  %1818 = vmatprep.subr.bf16.mxu0 %v2016_v22 }
  0x4f   : > { %1917 = vmatpush3.bf16.msra.mxu1 %v2015_v18  ;;  %1912 = vmatprep.mubr.bf16.mxu1 %v1557_v24 }
  0x50   : > { %1918 = vmatprep.subr.bf16.mxu1 %v2018_v25 }
  0x51   : > { %1819 = vmatpush3.bf16.msra.mxu0 %v2017_v26 }
  0x52   : > { %1820 = vmatprep.subr.bf16.mxu0 %v2021_v27 }
  0x53   : > { %1919 = vmatpush3.bf16.msra.mxu1 %v2018_v25 }
  0x54   : > { %839 = vmatmul.mubr.bf16.gmra.mxu0 %v1552_v28  ;;  %1920 = vmatprep.subr.bf16.mxu1 %v2023_v29 }
  0x55   : > { %1821 = vmatpush3.bf16.msra.mxu0 %v2022_v30  ;;  %846 = vmatprep.mubr.bf16.mxu0 %v1556_v31 }
  0x56   : > { %1822 = vmatprep.subr.bf16.mxu0 %v2024_v32  ;;  %1913 = vmatmul.mubr.bf16.gmra.mxu1 %v1560_v23 }
  0x57   : > { %1921 = vmatpush3.bf16.msra.mxu1 %v2023_v29  ;;  %1932 = vmatprep.mubr.bf16.mxu1 %v2045_v38 }
  0x58   : > { %1922 = vmatprep.subr.bf16.mxu1 %v2026_v33 }
  0x59   : > { %1823 = vmatpush3.bf16.msra.mxu0 %v2025_v34 }
  0x5a   : > { %1824 = vmatprep.subr.bf16.mxu0 %v2029_v35 }
  0x5b   : > { %1923 = vmatpush3.bf16.msra.mxu1 %v2026_v33 }
  0x5c   : > { %847 = vmatmul.mubr.bf16.gmra.mxu0 %v1555_v37  ;;  %1924 = vmatprep.subr.bf16.mxu1 %v2031_v36 }
  0x5d   : > { %1825 = vmatpush3.bf16.msra.mxu0 %v2030_v40  ;;  %854 = vmatprep.mubr.bf16.mxu0 %v1559_v41 }
  0x5e   : > { %1826 = vmatprep.subr.bf16.mxu0 %v2034_v42 }
  0x5f   : > { %1925 = vmatpush3.bf16.msra.mxu1 %v2031_v36 }
  0x60   : > { %1926 = vmatprep.subr.bf16.mxu1 %v2036_v39 }
  0x61   : > { %1827 = vmatpush3.bf16.msra.mxu0 %v2035_v44 }
  0x62   : > { %1828 = vmatprep.subr.bf16.mxu0 %v2039_v47 }
  0x63   : > { %1927 = vmatpush3.bf16.msra.mxu1 %v2036_v39 }
  0x64   : > { %855 = vmatmul.mubr.bf16.gmra.mxu0 %v1558_v48  ;;  %1928 = vmatprep.subr.bf16.mxu1 %v2041_v50 }
  0x65   : > { %1829 = vmatpush3.bf16.msra.mxu0 %v2040_v51  ;;  %1233 = vmatprep.mubr.bf16.mxu0 %v2328_v20 }
  0x66   : > { %1830 = vmatprep.subr.bf16.mxu0 %v2042_v52 }
  0x67   : > { %1929 = vmatpush3.bf16.msra.mxu1 %v2041_v50 }
  0x68   : > { %1930 = vmatprep.subr.bf16.mxu1 %v2044_v49 }
  0x69   : > { %1831 = vmatpush3.bf16.msra.mxu0 %v2043_v53 }
  0x6b   : > { %1931 = vmatpush3.bf16.msra.mxu1 %v2044_v49 }
  0x6c   : > { %1234 = vmatmul.mubr.bf16.vlgmr.msra.gmra.mxu0 %v1552_v28 }
  0x6d   : > { %1241 = vmatprep.mubr.bf16.mxu0 %v1556_v31 }
  0x6e   : > { %1933 = vmatmul.mubr.bf16.vlgmr.msra.gmra.mxu1 %v2046_v54 }
  0x6f   : > { %1936 = vmatprep.mubr.bf16.mxu1 %v2047_v55 }
  0x74   : > { %1242 = vmatmul.mubr.bf16.gmra.mxu0 %v1555_v37 }
  0x75   : > { %1249 = vmatprep.mubr.bf16.mxu0 %v1559_v41 }
  0x76   : > { %1937 = vmatmul.mubr.bf16.gmra.mxu1 %v2048_v56 }
  0x7c   : > { %1250 = vmatmul.mubr.bf16.gmra.mxu0 %v1558_v48 }
  0x7d   : > { %1257 = vmatprep.mubr.bf16.mxu0 %v1643_v45 }
  0x84   : > { %1258 = vmatmul.mubr.bf16.gmra.mxu0 %v1642_v46 }
  0xec   : > { %v1728_v57 = vpop.f32.mrf.mxu0 }
  0xee   : > { %v1729_v58 = vpop.f32.mrf.mxu0  ;;  %v1886_v63 = vpop.f32.mrf.mxu1 }
  0xef   : > { %v1730_v59 = vadd.f32 %v1729_v58, %v1728_v57 }
  0xf0   : > { %v1731_v60 = vpop.f32.mrf.mxu0  ;;  %v594_v3 = vpop.f32.mrf.mxu1 }
  0xf1   : > { %v595_v45 = vadd.f32 %v1730_v59, %v594_v3 }
  0xf2   : > { %v1732_v61 = vpop.f32.mrf.mxu0  ;;  %v2418_v6 = vpop.f32.mrf.mxu1 }
  0xf3   : > { %v1733_v46 = vadd.f32 %v1732_v61, %v1731_v60 }
  0xf4   : > { %v1734_v62 = vpop.f32.mrf.mxu0  ;;  %v597_v10 = vpop.f32.mrf.mxu1 }
  0xf5   : > { %v598_v53 = vadd.f32 %v1733_v46, %v597_v10 }
  0xf6   : > { %v1735_v0 = vpop.f32.mrf.mxu0  ;;  %v2426_v12 = vpop.f32.mrf.mxu1 }
  0xf7   : > { %v1736_v1 = vadd.f32 %v1735_v0, %v1734_v62 }
  0xf8   : > { %v1737_v2 = vpop.f32.mrf.mxu0  ;;  %v2430_v16 = vpop.f32.mrf.mxu1 }
  0xfa   : > { %v1738_v4 = vpop.f32.mrf.mxu0  ;;  %v2436_v19 = vpop.f32.mrf.mxu1 }
  0xfb   : > { %v1739_v59 = vadd.f32 %v1738_v4, %v1737_v2 }
  0xfc   : > { %v1740_v5 = vpop.f32.mrf.mxu0  ;;  %v2438_v22 = vpop.f32.mrf.mxu1 }
  0xfe   : > { %v1741_v7 = vpop.f32.mrf.mxu0 }
  0xff   : > { %v2420_v8 = vadd.f32 %v1741_v7, %v1740_v5  ;;  %v603_v5 = vadd.f32 %v1886_v63, %v1736_v1  ;;  %v606_v63 = vadd.f32 %v2418_v6, %v1739_v59 }
 0x100   : > { %v2422_v9 = vpop.f32.mrf.mxu0 }
 0x102   : > { %v2424_v11 = vpop.f32.mrf.mxu0 }
 0x104   : > { %v1746_v13 = vpop.f32.mrf.mxu0 }
 0x106   : > { %v1747_v14 = vpop.f32.mrf.mxu0 }
 0x107   : > { %v2428_v15 = vadd.f32 %v1747_v14, %v1746_v13  ;;  %v2461_v14 = vld [vmem:[%s2509_s2] ss:$0 sm:$0xff] }
 0x108   : > { %v2432_v17 = vpop.f32.mrf.mxu0 }
 0x10a   : > { %v2434_v18 = vpop.f32.mrf.mxu0 }
 0x10c   : > { %v1780_v20 = vpop.f32.mrf.mxu0 }
 0x10e   : > { %v1781_v21 = vpop.f32.mrf.mxu0  ;;  %v1910_v25 = vpop.f32.mrf.mxu1 }
 0x10f   : > { %v1782_v43 = vadd.f32 %v1781_v21, %v1780_v20 }
 0x110   : > { %v1783_v24 = vpop.f32.mrf.mxu0  ;;  %v897_v28 = vpop.f32.mrf.mxu1 }
 0x111   : > { %v833_v51 = vadd.f32 %v1782_v43, %v595_v45 }
 0x112   : > { %v1784_v26 = vpop.f32.mrf.mxu0  ;;  %v2440_v31 = vpop.f32.mrf.mxu1 }
 0x113   : > { %v1785_v50 = vadd.f32 %v1784_v26, %v1783_v24  ;;  %v898_v58 = vadd.f32 %v897_v28, %v833_v51 }
 0x114   : > { %v1786_v27 = vpop.f32.mrf.mxu0  ;;  %v900_v33 = vpop.f32.mrf.mxu1 }
 0x115   : > { %v836_v62 = vadd.f32 %v1785_v50, %v598_v53 }
 0x116   : > { %v1787_v29 = vpop.f32.mrf.mxu0  ;;  %v2442_v36 = vpop.f32.mrf.mxu1 }
 0x117   : > { %v1788_v55 = vadd.f32 %v1787_v29, %v1786_v27  ;;  %v901_v21 = vadd.f32 %v900_v33, %v836_v62 }
 0x118   : > { %v1789_v30 = vpop.f32.mrf.mxu0  ;;  %v2444_v38 = vpop.f32.mrf.mxu1 }
 0x119   : > { %v841_v3 = vadd.f32 %v1788_v55, %v603_v5 }
 0x11a   : > { %v1790_v32 = vpop.f32.mrf.mxu0  ;;  %v2450_v42 = vpop.f32.mrf.mxu1 }
 0x11b   : > { %v1791_v24 = vadd.f32 %v1790_v32, %v1789_v30  ;;  %v906_v29 = vadd.f32 %v1910_v25, %v841_v3  ;;  %v611_v30 = vadd.f32 %v2420_v8, %v2430_v16  ;;  %v1745_v32 = vadd.f32 %v2424_v11, %v2422_v9 }
 0x11c   : > { %v1792_v23 = vpop.f32.mrf.mxu0  ;;  %v2456_v47 = vpop.f32.mrf.mxu1 }
 0x11d   : > { %v844_v45 = vadd.f32 %v1791_v24, %v606_v63  ;;  %v614_v9 = vadd.f32 %v1745_v32, %v2438_v22  ;;  %v619_v22 = vadd.f32 %v2426_v12, %v2428_v15 }
 0x11e   : > { %v1793_v34 = vpop.f32.mrf.mxu0 }
 0x11f   : > { %v1794_v46 = vadd.f32 %v1793_v34, %v1792_v23  ;;  %v909_v34 = vadd.f32 %v2440_v31, %v844_v45 }
 0x120   : > { %v1795_v35 = vpop.f32.mrf.mxu0 }
 0x121   : > { %v849_v8 = vadd.f32 %v1794_v46, %v611_v30 }
 0x122   : > { %v1796_v37 = vpop.f32.mrf.mxu0 }
 0x123   : > { %v1797_v25 = vadd.f32 %v1796_v37, %v1795_v35  ;;  %v914_v62 = vadd.f32 %v2444_v38, %v849_v8 }
 0x124   : > { %v2446_v40 = vpop.f32.mrf.mxu0 }
 0x126   : > { %v2448_v41 = vpop.f32.mrf.mxu0 }
 0x128   : > { %v2452_v39 = vpop.f32.mrf.mxu0 }
 0x12a   : > { %v2454_v44 = vpop.f32.mrf.mxu0 }
 0x12c   : > { %v1832_v48 = vpop.f32.mrf.mxu0 }
 0x12e   : > { %v1833_v52 = vpop.f32.mrf.mxu0  ;;  %v1934_v49 = vpop.f32.mrf.mxu1 }
 0x12f   : > { %v1834_v54 = vadd.f32 %v1833_v52, %v1832_v48 }
 0x130   : > { %v1835_v56 = vpop.f32.mrf.mxu0  ;;  %v1300_v57 = vpop.f32.mrf.mxu1 }
 0x131   : > { %v1301_v0 = vadd.f32 %v1834_v54, %v1300_v57  ;;  %v852_v57 = vadd.f32 %v1797_v25, %v614_v9 }
 0x132   : > { %v1836_v7 = vpop.f32.mrf.mxu0  ;;  %v1935_v13 = vpop.f32.mrf.mxu1 }
 0x133   : > { %v1331_v60 = vadd.f32 %v1301_v0, %v898_v58  ;;  %v1837_v61 = vadd.f32 %v1836_v7, %v1835_v56  ;;  %v1800_v0 = vadd.f32 %v2448_v41, %v2446_v40  ;;  %v1751_v7 = vadd.f32 %v2434_v18, %v2432_v17 }
 0x134   : > { %v1838_v10 = vpop.f32.mrf.mxu0  ;;  %v1303_v20 = vpop.f32.mrf.mxu1  ;;  %v917_v38 = vadd.f32 %v2456_v47, %v852_v57  ;;  %v1803_v41 = vadd.f32 %v2454_v44, %v2452_v39 }
 0x135   : > { %v1304_v26 = vadd.f32 %v1837_v61, %v1303_v20  ;;  %v1346_v1 = vadd.f32 %v2461_v14, %v1331_v60  ;;  %v857_v40 = vadd.f32 %v1800_v0, %v619_v22  ;;  %v622_v15 = vadd.f32 %v2436_v19, %v1751_v7 }
 0x136   : > { %v1839_v27 = vpop.f32.mrf.mxu0  ;;  %v2463_v28 = vpop.f32.mrf.mxu1 }
 0x137   : > { %v1332_v2 = vadd.f32 %v1304_v26, %v901_v21  ;;  %v1840_v4 = vadd.f32 %v1839_v27, %v1838_v10  ;;  %v1354_v51 = vmax.f32 %v1346_v1, 0.0  ;;  %v922_v63 = vadd.f32 %v2442_v36, %v857_v40 }
 0x138   : > { %v1841_v43 = vpop.f32.mrf.mxu0  ;;  %v1316_v6 = vpop.f32.mrf.mxu1  ;;  %v860_v47 = vadd.f32 %v1803_v41, %v622_v15 }
 0x139   : > { %v1347_v48 = vadd.f32 %v2461_v14, %v1332_v2  ;;  %v1309_v50 = vadd.f32 %v1934_v49, %v1840_v4 }
 0x13a   : > { %v1842_v33 = vpop.f32.mrf.mxu0  ;;  %v1939_v55 = vpop.f32.mrf.mxu1 }
 0x13b   : > { %v1355_v52 = vmax.f32 %v1347_v48, 0.0  ;;  %v1333_v53 = vadd.f32 %v1309_v50, %v906_v29  ;;  %v1843_v54 = vadd.f32 %v1842_v33, %v1841_v43  ;;  %v925_v43 = vadd.f32 %v2450_v42, %v860_v47 }
 0x13c   : > { %v1844_v23 = vpop.f32.mrf.mxu0  ;;  %v1319_v59 = vpop.f32.mrf.mxu1 }
 0x13d   : > { %v1692_v16 = vpack.c.bf16 %v1355_v52, %v1354_v51  ;;  %v1312_v49 = vadd.f32 %v1935_v13, %v1843_v54  ;;  %v1348_v56 = vadd.f32 %v2461_v14, %v1333_v53 }
 0x13e   : > { %v1845_v11 = vpop.f32.mrf.mxu0 }
 0x13f   : > { %1693 = vst [vmem:[%s2476_s13] sm:$0xff] %v1692_v16   ;;  %v1334_v35 = vadd.f32 %v1312_v49, %v909_v34  ;;  %v1846_v37 = vadd.f32 %v1845_v11, %v1844_v23  ;;  %v1356_v60 = vmax.f32 %v1348_v56, 0.0 }
 0x140   : > { %v1847_v58 = vpop.f32.mrf.mxu0 }
 0x141   : > { %v1349_v31 = vadd.f32 %v2461_v14, %v1334_v35  ;;  %v1317_v5 = vadd.f32 %v1846_v37, %v1316_v6 }
 0x142   : > { %v1848_v13 = vpop.f32.mrf.mxu0 }
 0x143   : > { %v1357_v61 = vmax.f32 %v1349_v31, 0.0  ;;  %v1335_v3 = vadd.f32 %v1317_v5, %v914_v62  ;;  %v1849_v10 = vadd.f32 %v1848_v13, %v1847_v58 }
 0x144   : > { %v1850_v20 = vpop.f32.mrf.mxu0 }
 0x145   : > { %v1697_v21 = vpack.c.bf16 %v1357_v61, %v1356_v60  ;;  %v1320_v24 = vadd.f32 %v1849_v10, %v1319_v59  ;;  %v1350_v17 = vadd.f32 %v2461_v14, %v1335_v3 }
 0x146   : > { %v1851_v12 = vpop.f32.mrf.mxu0 }
 0x147   : > { %1709 = vst [vmem:[%s2476_s13 + $0x8] sm:$0xff] %v1697_v21   ;;  %v1336_v18 = vadd.f32 %v1320_v24, %v917_v38  ;;  %v1852_v26 = vadd.f32 %v1851_v12, %v1850_v20  ;;  %v1358_v44 = vmax.f32 %v1350_v17, 0.0 }
 0x148   : > { %v1853_v27 = vpop.f32.mrf.mxu0 }
 0x149   : > { %v1351_v1 = vadd.f32 %v2461_v14, %v1336_v18  ;;  %v1325_v2 = vadd.f32 %v2463_v28, %v1852_v26 }
 0x14a   : > { %v1854_v39 = vpop.f32.mrf.mxu0 }
 0x14b   : > { %v1359_v4 = vmax.f32 %v1351_v1, 0.0  ;;  %v1337_v29 = vadd.f32 %v1325_v2, %v922_v63  ;;  %v1855_v19 = vadd.f32 %v1854_v39, %v1853_v27 }
 0x14d   : > { %v1702_v45 = vpack.c.bf16 %v1359_v4, %v1358_v44  ;;  %v1328_v46 = vadd.f32 %v1939_v55, %v1855_v19  ;;  %v1352_v48 = vadd.f32 %v2461_v14, %v1337_v29 }
 0x14f   : > { %1710 = vst [vmem:[%s2476_s13 + $0x10] sm:$0xff] %v1702_v45   ;;  %v1338_v50 = vadd.f32 %v1328_v46, %v925_v43  ;;  %v1360_v30 = vmax.f32 %v1352_v48, 0.0 }
 0x151   : > { %v1353_v36 = vadd.f32 %v2461_v14, %v1338_v50 }
 0x153   : > { %v1361_v32 = vmax.f32 %v1353_v36, 0.0 }
 0x155   : > { %v1707_v33 = vpack.c.bf16 %v1361_v32, %v1360_v30 }
 0x157   : > { %1711 = vst [vmem:[%s2476_s13 + $0x18] sm:$0xff] %v1707_v33  }
 0x158 PF: > { %s13_s12 = sadd.s32 1, %s2057_s12  }
 0x159   : > { %p10_p4 = scmp.ge.s32.totalorder %s13_s12, 4  }
 0x15b   :  { %12 = sbr.rel (!%p10_p4) target bundleno = 1 (0x1), region = 64 }

// kernel: tile.6
= control target key start
LH: loop header
LB: loop body
LE: loop exit
PB: predicated region body
PF: predicated region fallthrough
CT: control target
= control target key end

     0   :  { %s22_s0 = inlined_call_operand.vmem [shape: f32[4], index: 0, kind: input, shape index: {}]   ;;  %s23_s1 = inlined_call_operand.vmem [shape: f32[4,4], index: 1, kind: output, shape index: {}]  }
   0x1   :  { %v4_v0 = vld [vmem:[%s22_s0] ss:$0 sm:$0xff] }
   0x2   :  { %5 = vst [vmem:[%s23_s1] sm:$0xf] %v4_v0 }

// kernel: tile.7
= control target key start
LH: loop header
LB: loop body
LE: loop exit
PB: predicated region body
PF: predicated region fallthrough
CT: control target
= control target key end

     0   :  { %vm8_vm0 = vcmask 31744   ;;  %s40_s8 = smov 4   ;;  %s41_s9 = smov 8   ;;  %vm14_vm1 = vcmask 130144   ;;  %vm20_vm2 = vcmask 97344   ;;  %vm26_vm3 = vcmask 64544   ;;  %s58_s0 = inlined_call_operand.vmem [shape: f32[4,4], index: 0, kind: input, shape index: {}]   ;;  %s59_s1 = inlined_call_operand.vmem [shape: f32[16], index: 1, kind: output, shape index: {}]  }
   0x1   :  { %v5_v0 = vld [vmem:[%s58_s0] sm:$0xf]  ;;  %s39_s0 = smov 12  }
   0x2   :  { %6 = vst [vmem:[#allocation1] sm:$0xf] %v5_v0 }
   0x9   :  { %v11_v1 = vld [vmem:[#allocation1 + $0x3] sm:$0x1]   ;;  %v23_v2 = vld [vmem:[#allocation1 + $0x1] sm:$0x1]   ;;  %v7_v3 = vld [vmem:[#allocation1] sm:$0x1]  }
   0xa   :  { %12 = vrot.lane.b32.xlu0 %v11_v1, %s39_s0  ;;  %24 = vrot.lane.b32.xlu1 %v23_v2, %s40_s8  ;;  %v17_v4 = vld [vmem:[#allocation1 + $0x2] sm:$0x1]   ;;  %9 = vst.msk [vmem:[#allocation0] sm:$0x1] %vm8_vm0, %v7_v3  }
   0xe   :  { %18 = vrot.lane.b32.xlu0 %v17_v4, %s41_s9 }
  0x7c   :  { %v13_v5 = vpop.permute.xlu0 %12   ;;  %v25_v6 = vpop.permute.xlu1 %24  }
  0x7d   :  { %15 = vst.msk [vmem:[#allocation0] sm:$0x1] %vm14_vm1, %v13_v5  }
  0x80   :  { %v19_v7 = vpop.permute.xlu0 %18  }
  0x81   :  { %21 = vst.msk [vmem:[#allocation0] sm:$0x1] %vm20_vm2, %v19_v7  }
  0x82   :  { %27 = vst.msk [vmem:[#allocation0] sm:$0x1] %vm26_vm3, %v25_v6  }
  0x89   :  { %v32_v8 = vld [vmem:[#allocation0] sm:$0x1] }
  0x8a   :  { %35 = vst [vmem:[%s59_s1] sm:$0x1] %v32_v8 }

// kernel: unet_forward.14
= control target key start
LH: loop header
LB: loop body
LE: loop exit
PB: predicated region body
PF: predicated region fallthrough
CT: control target
= control target key end

     0   :  { %s1622_s12 = smov 0   ;;  %s1923_s0 = inlined_call_operand.vmem [shape: bf16[2,24,384], index: 0, kind: input, shape index: {}]   ;;  %s1924_s1 = inlined_call_operand.vmem [shape: bf16[3,384,64], index: 1, kind: input, shape index: {}]   ;;  %s1925_s2 = inlined_call_operand.vmem [shape: f32[1,64], index: 2, kind: input, shape index: {}]   ;;  %s1926_s3 = inlined_call_operand.vmem [shape: bf16[2,16,64], index: 3, kind: output, shape index: {}]  }
   0x1 LB: > { %s1148_s13 = sadd.s32 4294967295, %s1598_s12   ;;  %p1152_p0 = scmp.ge.s32.totalorder %s1598_s12, 1  ;;  %s1598_s12 = sphi %s1622_s12, %s13_s12  }
   0x2   : > { %p137_p1 = scmp.lt.s32.totalorder %s1598_s12, 3 }
   0x4   : > { %p138_p2 = pnand %p1152_p0, %p137_p1 }
   0x5   : > { %p161_p3 = scmp.lt.s32.totalorder (!%p138_p2), %s1148_s13, 1 }
   0x6   : > { %141 = sbr.rel (%p138_p2) target bundleno = 321 (0x141), region = 32 }
   0xb   : > { %v1508_v0 = vld [vmem:[%s1924_s1 + $0x138] sm:$0xff]   ;;  %v1600_v1 = vmov 0.0   ;;  %vm1601_vm0 = vmmov 0   ;;  %v1511_v4 = vld [vmem:[%s1924_s1 + $0x130] sm:$0xff]   ;;  %v1514_v7 = vld [vmem:[%s1924_s1 + $0x128] sm:$0xff]   ;;  %s1928_s13 = smov (!%p161_p3, %s1148_s13), 1 }
   0xc   : > { %1437 = vmatprep.subr.bf16.mxu1 %v1600_v1  ;;  %v1509_v2 = vld [vmem:[%s1924_s1 + $0x178] sm:$0xff]   ;;  %1344 = vmatprep.subr.bf16.mxu0 %v1508_v0  ;;  %v1512_v5 = vld [vmem:[%s1924_s1 + $0x170] sm:$0xff]   ;;  %v1515_v8 = vld [vmem:[%s1924_s1 + $0x168] sm:$0xff]   ;;  %s1497_s21 = smul.u32 36, %s1928_s13  ;;  %vm300_vm1 = vcmask 1045504   ;;  %s1341_s17 = sshll.u32 %s1928_s13, 3 }
   0xd   : > { %v1510_v3 = vld [vmem:[%s1924_s1 + $0xf8] sm:$0xff]   ;;  %1453 = vmatprep.mubr.msk.bf16.mxu1 %vm1601_vm0, %v1600_v1  ;;  %1438 = vmatpush3.bf16.msra.mxu1 %v1509_v2  ;;  %v1513_v6 = vld [vmem:[%s1924_s1 + $0xf0] sm:$0xff]   ;;  %v1516_v9 = vld [vmem:[%s1924_s1 + $0xe8] sm:$0xff]   ;;  %s170_s20 = scalar_lea.vmem %s1926_s3, %s1341_s17  ;;  %vm1090_vm2 = vcmask 519168  }
   0xe   : > { %1345 = vmatpush3.bf16.msra.mxu0 %v1510_v3  ;;  %1439 = vmatprep.subr.bf16.mxu1 %v1600_v1  ;;  %v1517_v10 = vld [vmem:[%s1924_s1 + $0x120] sm:$0xff]   ;;  %v1520_v13 = vld [vmem:[%s1924_s1 + $0x118] sm:$0xff]   ;;  %v1523_v16 = vld [vmem:[%s1924_s1 + $0x110] sm:$0xff]   ;;  %s1708_s5 = scalar_lea.vmem %s1923_s0, %s1497_s21 }
   0xf   : > { %1346 = vmatprep.subr.bf16.mxu0 %v1511_v4  ;;  %v1518_v11 = vld [vmem:[%s1924_s1 + $0x160] sm:$0xff]   ;;  %v1521_v14 = vld [vmem:[%s1924_s1 + $0x158] sm:$0xff]   ;;  %v1524_v17 = vld [vmem:[%s1924_s1 + $0x150] sm:$0xff]  }
  0x10   : > { %v1519_v12 = vld [vmem:[%s1924_s1 + $0xe0] sm:$0xff]   ;;  %v1522_v15 = vld [vmem:[%s1924_s1 + $0xd8] sm:$0xff]   ;;  %v1525_v18 = vld [vmem:[%s1924_s1 + $0xd0] sm:$0xff]  }
  0x11   : > { %1440 = vmatpush3.bf16.msra.mxu1 %v1512_v5  ;;  %v1526_v19 = vld [vmem:[%s1924_s1 + $0x108] sm:$0xff]   ;;  %v1529_v22 = vld [vmem:[%s1924_s1 + $0x100] sm:$0xff]   ;;  %v228_v25 = vld [vmem:[%s1708_s5 + $0x18] sm:$0x33] }
  0x12   : > { %1347 = vmatpush3.bf16.msra.mxu0 %v1513_v6  ;;  %1441 = vmatprep.subr.bf16.mxu1 %v1600_v1  ;;  %v1527_v20 = vld [vmem:[%s1924_s1 + $0x148] sm:$0xff]   ;;  %v224_v23 = vld [vmem:[%s1708_s5] sm:$0xcc]  ;;  %v1208_v28 = vcombine.high %v228_v25, %v228_v25  ;;  %v1728_v30 = vld [vmem:[%s1708_s5 + $0x14] sm:$0xf]  ;;  %v1207_v32 = vcombine.low %v228_v25, %v228_v25 }
  0x13   : > { %1348 = vmatprep.subr.bf16.mxu0 %v1514_v7  ;;  %v1528_v21 = vld [vmem:[%s1924_s1 + $0xc8] sm:$0xff]   ;;  %v1530_v26 = vld [vmem:[%s1924_s1 + $0x140] sm:$0xff]   ;;  %v1538_v43 = vld [vmem:[%s1924_s1 + $0x78] sm:$0xff]  }
  0x14   : > { %v1719_v24 = vld [vmem:[%s1708_s5 + $0xc] sm:$0xff]  ;;  %v225_v29 = vld [vmem:[%s1708_s5 + $0x8] sm:$0xc]  ;;  %v1531_v33 = vld [vmem:[%s1924_s1 + $0xc0] sm:$0xff]   ;;  %v305_v37 = vrot.slane %v1208_v28, 2  ;;  %v302_v39 = vrot.slane %v1207_v32, 2 }
  0x15   : > { %1442 = vmatpush3.bf16.msra.mxu1 %v1515_v8  ;;  %v1205_v27 = vcombine.high %v224_v23, %v1719_v24  ;;  %v1204_v31 = vcombine.low %v224_v23, %v1719_v24  ;;  %v1206_v34 = vcombine.low %v225_v29, %v1728_v30  ;;  %v1535_v35 = vld [vmem:[%s1708_s5 + $0x20] ss:$0 sps:$4 sm:$0x33]   ;;  %v1539_v45 = vld [vmem:[%s1924_s1 + $0xb8] sm:$0xff]   ;;  %v1541_v48 = vld [vmem:[%s1924_s1 + $0x70] sm:$0xff]  }
  0x16   : > { %1349 = vmatpush3.bf16.msra.mxu0 %v1516_v9  ;;  %1443 = vmatprep.subr.bf16.mxu1 %v1600_v1  ;;  %v308_v41 = vrot.slane %v1535_v35, 2  ;;  %v1540_v47 = vld [vmem:[%s1924_s1 + $0x38] sm:$0xff]   ;;  %v1542_v49 = vld [vmem:[%s1924_s1 + $0xb0] sm:$0xff]   ;;  %v1544_v51 = vld [vmem:[%s1924_s1 + $0x68] sm:$0xff]  }
  0x17   : > { %1350 = vmatprep.subr.bf16.mxu0 %v1517_v10  ;;  %v304_v36 = vrot.slane %v1205_v27, 2  ;;  %v301_v38 = vrot.slane %v1204_v31, 2  ;;  %v307_v40 = vrot.slane %v1206_v34, 2  ;;  %v1543_v50 = vld [vmem:[%s1924_s1 + $0x30] sm:$0xff]   ;;  %v1545_v52 = vld [vmem:[%s1924_s1 + $0xa8] sm:$0xff]   ;;  %v1547_v54 = vld [vmem:[%s1924_s1 + $0x60] sm:$0xff]  }
  0x18   : > { %v1546_v53 = vld [vmem:[%s1924_s1 + $0x28] sm:$0xff]   ;;  %v1548_v55 = vld [vmem:[%s1924_s1 + $0xa0] sm:$0xff]   ;;  %v1550_v57 = vld [vmem:[%s1924_s1 + $0x58] sm:$0xff]  }
  0x19   : > { %1444 = vmatpush3.bf16.msra.mxu1 %v1518_v11  ;;  %v306_v42 = vsel %vm300_vm1, %v304_v36, %v305_v37  ;;  %v309_v44 = vsel %vm300_vm1, %v307_v40, %v308_v41  ;;  %v303_v46 = vsel %vm300_vm1, %v301_v38, %v302_v39  ;;  %v1549_v56 = vld [vmem:[%s1924_s1 + $0x20] sm:$0xff]   ;;  %v1551_v58 = vld [vmem:[%s1924_s1 + $0x98] sm:$0xff]   ;;  %v1553_v60 = vld [vmem:[%s1924_s1 + $0x50] sm:$0xff]  }
  0x1a   : > { %1351 = vmatpush3.bf16.msra.mxu0 %v1519_v12  ;;  %1445 = vmatprep.subr.bf16.mxu1 %v1600_v1  ;;  %v1552_v59 = vld [vmem:[%s1924_s1 + $0x18] sm:$0xff]   ;;  %v1554_v61 = vld [vmem:[%s1924_s1 + $0x90] sm:$0xff]   ;;  %v172_v62 = vld [vmem:[%s1708_s5] sm:$0xff] }
  0x1b   : > { %1352 = vmatprep.subr.bf16.mxu0 %v1520_v13  ;;  %489 = vmatprep.mubr.bf16.mxu0 %v306_v42  ;;  %v1555_v63 = vld [vmem:[%s1924_s1 + $0x10] sm:$0xff]   ;;  %v1235_v0 = vcombine.high %v172_v62, %v1719_v24  ;;  %v1556_v2 = vld [vmem:[%s1924_s1 + $0x48] sm:$0xff]   ;;  %v1559_v5 = vld [vmem:[%s1924_s1 + $0x40] sm:$0xff]   ;;  %v1234_v10 = vcombine.low %v172_v62, %v1719_v24 }
  0x1c   : > { %v1557_v3 = vld [vmem:[%s1924_s1 + $0x88] sm:$0xff]   ;;  %v1560_v6 = vld [vmem:[%s1924_s1 + $0x80] sm:$0xff]   ;;  %v1565_v8 = vld [vmem:[%s1924_s1 + $0x1f8] sm:$0xff]  }
  0x1d   : > { %1446 = vmatpush3.bf16.msra.mxu1 %v1521_v14  ;;  %v1558_v4 = vld [vmem:[%s1924_s1 + $0x8] sm:$0xff]   ;;  %v1561_v7 = vld [vmem:[%s1924_s1] sm:$0xff]   ;;  %v1566_v11 = vld [vmem:[%s1924_s1 + $0x238] sm:$0xff]  }
  0x1e   : > { %1353 = vmatpush3.bf16.msra.mxu0 %v1522_v15  ;;  %1447 = vmatprep.subr.bf16.mxu1 %v1600_v1  ;;  %v1564_v9 = vld [vmem:[%s1708_s5 + $0x8] ss:$12 sps:$4 sm:$0xff]   ;;  %v1567_v12 = vld [vmem:[%s1924_s1 + $0x1b8] sm:$0xff]   ;;  %v1586_v36 = vld [vmem:[%s1924_s1 + $0x1c0] sm:$0xff]  }
  0x1f   : > { %1354 = vmatprep.subr.bf16.mxu0 %v1523_v16  ;;  %v1568_v13 = vld [vmem:[%s1924_s1 + $0x1f0] sm:$0xff]   ;;  %v1571_v16 = vld [vmem:[%s1924_s1 + $0x1e8] sm:$0xff]   ;;  %v1577_v23 = vld [vmem:[%s1924_s1 + $0x1d8] sm:$0xff]  }
  0x20   : > { %v1569_v14 = vld [vmem:[%s1924_s1 + $0x230] sm:$0xff]   ;;  %v1578_v28 = vld [vmem:[%s1924_s1 + $0x218] sm:$0xff]   ;;  %v1584_v34 = vld [vmem:[%s1924_s1 + $0x208] sm:$0xff]  }
  0x21   : > { %1448 = vmatpush3.bf16.msra.mxu1 %v1524_v17  ;;  %v1570_v15 = vld [vmem:[%s1924_s1 + $0x1b0] sm:$0xff]   ;;  %v1572_v17 = vld [vmem:[%s1924_s1 + $0x228] sm:$0xff]   ;;  %v1579_v29 = vld [vmem:[%s1924_s1 + $0x198] sm:$0xff]  }
  0x22   : > { %1355 = vmatpush3.bf16.msra.mxu0 %v1525_v18  ;;  %1449 = vmatprep.subr.bf16.mxu1 %v1600_v1  ;;  %v1573_v18 = vld [vmem:[%s1924_s1 + $0x1a8] sm:$0xff]   ;;  %v1580_v31 = vld [vmem:[%s1924_s1 + $0x1d0] sm:$0xff]   ;;  %v1587_v37 = vld [vmem:[%s1924_s1 + $0x200] sm:$0xff]  }
  0x23   : > { %1356 = vmatprep.subr.bf16.mxu0 %v1526_v19  ;;  %v1574_v19 = vld [vmem:[%s1924_s1 + $0x1e0] sm:$0xff]   ;;  %v1582_v32 = vld [vmem:[%s1924_s1 + $0x190] sm:$0xff]   ;;  %v1585_v35 = vld [vmem:[%s1924_s1 + $0x188] sm:$0xff]  }
  0x24   : > { %v1588_v38 = vld [vmem:[%s1924_s1 + $0x180] sm:$0xff]  }
  0x25   : > { %1450 = vmatpush3.bf16.msra.mxu1 %v1527_v20  ;;  %v1575_v20 = vld [vmem:[%s1924_s1 + $0x220] sm:$0xff]  }
  0x26   : > { %1357 = vmatpush3.bf16.msra.mxu0 %v1528_v21  ;;  %1451 = vmatprep.subr.bf16.mxu1 %v1600_v1  ;;  %v1576_v21 = vld [vmem:[%s1924_s1 + $0x1a0] sm:$0xff]  }
  0x27   : > { %1358 = vmatprep.subr.bf16.mxu0 %v1529_v22  ;;  %v781_v22 = vld [vmem:[%s1708_s5 + $0x18] sm:$0xff] }
  0x28   : > { %v1310_v25 = vcombine.high %v1719_v24, %v781_v22  ;;  %v1309_v39 = vcombine.low %v1719_v24, %v781_v22 }
  0x29   : > { %1452 = vmatpush3.bf16.msra.mxu1 %v1530_v26  ;;  %v782_v26 = vld [vmem:[%s1708_s5 + $0x20] sm:$0xf] }
  0x2a   : > { %1359 = vmatpush3.bf16.msra.mxu0 %v1531_v33  ;;  %1457 = vmatprep.subr.bf16.mxu1 %v1600_v1  ;;  %v1311_v27 = vcombine.low %v1728_v30, %v782_v26  ;;  %v1581_v30 = vld [vmem:[%s1924_s1 + $0x210] sm:$0xff]   ;;  %v1583_v33 = vld [vmem:[%s1924_s1 + $0x1c8] sm:$0xff]  }
  0x2b   : > { %1375 = vmatprep.subr.bf16.mxu0 %v1538_v43 }
  0x2c   : > { %1454 = vmatmul.mubr.bf16.vlgmr.msra.gmra.mxu1 %v309_v44 }
  0x2d   : > { %490 = vmatmul.mubr.bf16.vlgmr.msra.gmra.mxu0 %v303_v46  ;;  %1458 = vmatpush3.bf16.msra.mxu1 %v1539_v45 }
  0x2e   : > { %1376 = vmatpush3.bf16.msra.mxu0 %v1540_v47  ;;  %1459 = vmatprep.subr.bf16.mxu1 %v1600_v1 }
  0x2f   : > { %1377 = vmatprep.subr.bf16.mxu0 %v1541_v48  ;;  %1473 = vmatprep.mubr.msk.bf16.mxu1 %vm1601_vm0, %v1600_v1 }
  0x30   : > { %731 = vmatprep.mubr.bf16.mxu0 %v1235_v0 }
  0x31   : > { %1460 = vmatpush3.bf16.msra.mxu1 %v1542_v49 }
  0x32   : > { %1378 = vmatpush3.bf16.msra.mxu0 %v1543_v50  ;;  %1461 = vmatprep.subr.bf16.mxu1 %v1600_v1 }
  0x33   : > { %1379 = vmatprep.subr.bf16.mxu0 %v1544_v51 }
  0x35   : > { %1462 = vmatpush3.bf16.msra.mxu1 %v1545_v52 }
  0x36   : > { %1380 = vmatpush3.bf16.msra.mxu0 %v1546_v53  ;;  %1463 = vmatprep.subr.bf16.mxu1 %v1600_v1 }
  0x37   : > { %1381 = vmatprep.subr.bf16.mxu0 %v1547_v54 }
  0x39   : > { %1464 = vmatpush3.bf16.msra.mxu1 %v1548_v55 }
  0x3a   : > { %1382 = vmatpush3.bf16.msra.mxu0 %v1549_v56  ;;  %1465 = vmatprep.subr.bf16.mxu1 %v1600_v1 }
  0x3b   : > { %1383 = vmatprep.subr.bf16.mxu0 %v1550_v57 }
  0x3d   : > { %1466 = vmatpush3.bf16.msra.mxu1 %v1551_v58 }
  0x3e   : > { %1384 = vmatpush3.bf16.msra.mxu0 %v1552_v59  ;;  %1467 = vmatprep.subr.bf16.mxu1 %v1600_v1 }
  0x3f   : > { %1385 = vmatprep.subr.bf16.mxu0 %v1553_v60 }
  0x41   : > { %1468 = vmatpush3.bf16.msra.mxu1 %v1554_v61 }
  0x42   : > { %1386 = vmatpush3.bf16.msra.mxu0 %v1555_v63  ;;  %1469 = vmatprep.subr.bf16.mxu1 %v1600_v1 }
  0x43   : > { %1387 = vmatprep.subr.bf16.mxu0 %v1556_v2 }
  0x45   : > { %1470 = vmatpush3.bf16.msra.mxu1 %v1557_v3 }
  0x46   : > { %1388 = vmatpush3.bf16.msra.mxu0 %v1558_v4  ;;  %1471 = vmatprep.subr.bf16.mxu1 %v1600_v1 }
  0x47   : > { %1389 = vmatprep.subr.bf16.mxu0 %v1559_v5 }
  0x49   : > { %1472 = vmatpush3.bf16.msra.mxu1 %v1560_v6 }
  0x4a   : > { %1390 = vmatpush3.bf16.msra.mxu0 %v1561_v7  ;;  %1477 = vmatprep.subr.bf16.mxu1 %v1600_v1 }
  0x4b   : > { %1406 = vmatprep.subr.bf16.mxu0 %v1565_v8 }
  0x4c   : > { %1474 = vmatmul.mubr.bf16.vlgmr.msra.gmra.mxu1 %v1564_v9  ;;  %v1336_v9 = vld [vmem:[%s1925_s2] ss:$0 sm:$0xff] }
  0x4d   : > { %732 = vmatmul.mubr.bf16.vlgmr.msra.gmra.mxu0 %v1234_v10  ;;  %1478 = vmatpush3.bf16.msra.mxu1 %v1566_v11 }
  0x4e   : > { %1407 = vmatpush3.bf16.msra.mxu0 %v1567_v12  ;;  %1479 = vmatprep.subr.bf16.mxu1 %v1600_v1 }
  0x4f   : > { %1408 = vmatprep.subr.bf16.mxu0 %v1568_v13  ;;  %1493 = vmatprep.mubr.msk.bf16.mxu1 %vm1601_vm0, %v1600_v1 }
  0x50   : > { %1019 = vmatprep.mubr.bf16.mxu0 %v1310_v25 }
  0x51   : > { %1480 = vmatpush3.bf16.msra.mxu1 %v1569_v14 }
  0x52   : > { %1409 = vmatpush3.bf16.msra.mxu0 %v1570_v15  ;;  %1481 = vmatprep.subr.bf16.mxu1 %v1600_v1 }
  0x53   : > { %1410 = vmatprep.subr.bf16.mxu0 %v1571_v16 }
  0x55   : > { %1482 = vmatpush3.bf16.msra.mxu1 %v1572_v17 }
  0x56   : > { %1411 = vmatpush3.bf16.msra.mxu0 %v1573_v18  ;;  %1483 = vmatprep.subr.bf16.mxu1 %v1600_v1 }
  0x57   : > { %1412 = vmatprep.subr.bf16.mxu0 %v1574_v19 }
  0x59   : > { %1484 = vmatpush3.bf16.msra.mxu1 %v1575_v20 }
  0x5a   : > { %1413 = vmatpush3.bf16.msra.mxu0 %v1576_v21  ;;  %1485 = vmatprep.subr.bf16.mxu1 %v1600_v1 }
  0x5b   : > { %1414 = vmatprep.subr.bf16.mxu0 %v1577_v23 }
  0x5d   : > { %1486 = vmatpush3.bf16.msra.mxu1 %v1578_v28 }
  0x5e   : > { %1415 = vmatpush3.bf16.msra.mxu0 %v1579_v29  ;;  %1487 = vmatprep.subr.bf16.mxu1 %v1600_v1 }
  0x5f   : > { %1416 = vmatprep.subr.bf16.mxu0 %v1580_v31 }
  0x61   : > { %1488 = vmatpush3.bf16.msra.mxu1 %v1581_v30 }
  0x62   : > { %1417 = vmatpush3.bf16.msra.mxu0 %v1582_v32  ;;  %1489 = vmatprep.subr.bf16.mxu1 %v1600_v1 }
  0x63   : > { %1418 = vmatprep.subr.bf16.mxu0 %v1583_v33 }
  0x65   : > { %1490 = vmatpush3.bf16.msra.mxu1 %v1584_v34 }
  0x66   : > { %1419 = vmatpush3.bf16.msra.mxu0 %v1585_v35  ;;  %1491 = vmatprep.subr.bf16.mxu1 %v1600_v1 }
  0x67   : > { %1420 = vmatprep.subr.bf16.mxu0 %v1586_v36 }
  0x69   : > { %1492 = vmatpush3.bf16.msra.mxu1 %v1587_v37 }
  0x6a   : > { %1421 = vmatpush3.bf16.msra.mxu0 %v1588_v38 }
  0x6c   : > { %1494 = vmatmul.mubr.bf16.vlgmr.msra.gmra.mxu1 %v1311_v27 }
  0x6d   : > { %1020 = vmatmul.mubr.bf16.vlgmr.msra.gmra.mxu0 %v1309_v39 }
  0xec   : > { %v532_v40 = vpop.f32.mrf.mxu1 }
  0xed   : > { %v1360_v47 = vpop.f32.mrf.mxu0 }
  0xee   : > { %v1455_v41 = vpop.f32.mrf.mxu1 }
  0xef   : > { %v1361_v48 = vpop.f32.mrf.mxu0 }
  0xf0   : > { %v535_v42 = vpop.f32.mrf.mxu1  ;;  %v1362_v54 = vadd.f32 %v1361_v48, %v1360_v47 }
  0xf1   : > { %v1363_v49 = vpop.f32.mrf.mxu0 }
  0xf2   : > { %v1456_v43 = vpop.f32.mrf.mxu1  ;;  %v533_v56 = vadd.f32 %v1362_v54, %v532_v40 }
  0xf3   : > { %v1364_v50 = vpop.f32.mrf.mxu0 }
  0xf4   : > { %v1365_v57 = vadd.f32 %v1364_v50, %v1363_v49 }
  0xf6   : > { %v536_v0 = vadd.f32 %v1365_v57, %v535_v42 }
 0x10c   : > { %v774_v44 = vpop.f32.mrf.mxu1 }
 0x10d   : > { %v1391_v51 = vpop.f32.mrf.mxu0 }
 0x10e   : > { %v1475_v45 = vpop.f32.mrf.mxu1 }
 0x10f   : > { %v1392_v52 = vpop.f32.mrf.mxu0 }
 0x110   : > { %v777_v46 = vpop.f32.mrf.mxu1  ;;  %v1393_v24 = vadd.f32 %v1392_v52, %v1391_v51 }
 0x111   : > { %v1394_v53 = vpop.f32.mrf.mxu0 }
 0x112   : > { %v1476_v1 = vpop.f32.mrf.mxu1  ;;  %v734_v60 = vadd.f32 %v1393_v24, %v533_v56 }
 0x113   : > { %v1395_v55 = vpop.f32.mrf.mxu0 }
 0x114   : > { %v1396_v61 = vadd.f32 %v1395_v55, %v1394_v53  ;;  %v775_v5 = vadd.f32 %v774_v44, %v734_v60 }
 0x116   : > { %v737_v6 = vadd.f32 %v1396_v61, %v536_v0 }
 0x118   : > { %v778_v13 = vadd.f32 %v777_v46, %v737_v6 }
 0x12c   : > { %v1062_v58 = vpop.f32.mrf.mxu1 }
 0x12d   : > { %v1422_v59 = vpop.f32.mrf.mxu0 }
 0x12e   : > { %v1495_v62 = vpop.f32.mrf.mxu1 }
 0x12f   : > { %v1423_v63 = vpop.f32.mrf.mxu0 }
 0x130   : > { %v1424_v2 = vadd.f32 %v1423_v63, %v1422_v59  ;;  %v1065_v3 = vpop.f32.mrf.mxu1 }
 0x131   : > { %v1425_v4 = vpop.f32.mrf.mxu0 }
 0x132   : > { %v1063_v7 = vadd.f32 %v1424_v2, %v1062_v58  ;;  %v1496_v8 = vpop.f32.mrf.mxu1 }
 0x133   : > { %v1426_v10 = vpop.f32.mrf.mxu0 }
 0x134   : > { %v1069_v11 = vadd.f32 %v1063_v7, %v775_v5  ;;  %v1427_v12 = vadd.f32 %v1426_v10, %v1425_v4 }
 0x136   : > { %v1078_v14 = vadd.f32 %v1336_v9, %v1069_v11  ;;  %v1066_v15 = vadd.f32 %v1427_v12, %v1065_v3 }
 0x138   : > { %v1080_v16 = vmax.f32 %v1078_v14, 0.0  ;;  %v1070_v17 = vadd.f32 %v1066_v15, %v778_v13 }
 0x13a   : > { %v1342_v18 = vpack.c.bf16 %v1080_v16, %v1080_v16  ;;  %v1079_v19 = vadd.f32 %v1336_v9, %v1070_v17 }
 0x13c   : > { %1091 = vst.msk [vmem:[%s170_s20] sm:$0xf] %vm1090_vm2, %v1342_v18  ;;  %v1081_v20 = vmax.f32 %v1079_v19, 0.0 }
 0x13e   : > { %v1343_v21 = vpack.c.bf16 %v1081_v20, %v1081_v20 }
 0x140   : > { %1092 = vst.msk [vmem:[%s170_s20 + $0x4] sm:$0xf] %vm1090_vm2, %v1343_v21 }
 0x141 PF: > { %s13_s12 = sadd.s32 1, %s1598_s12  }
 0x142   : > { %p10_p4 = scmp.ge.s32.totalorder %s13_s12, 4  }
 0x144   :  { %12 = sbr.rel (!%p10_p4) target bundleno = 1 (0x1), region = 64 }

// kernel: unet_forward.15
= control target key start
LH: loop header
LB: loop body
LE: loop exit
PB: predicated region body
PF: predicated region fallthrough
CT: control target
= control target key end

     0   :  { %s1072_s18 = smov 0   ;;  %s1276_s0 = inlined_call_operand.vmem [shape: bf16[2,24,192], index: 0, kind: input, shape index: {}]   ;;  %s1277_s1 = inlined_call_operand.vmem [shape: bf16[3,192,64], index: 1, kind: input, shape index: {}]   ;;  %s1278_s2 = inlined_call_operand.vmem [shape: f32[1,64], index: 2, kind: input, shape index: {}]   ;;  %s1279_s3 = inlined_call_operand.vmem [shape: bf16[64,128], index: 3, kind: input, shape index: {}]   ;;  %s1280_s4 = inlined_call_operand.vmem [shape: f32[1,128], index: 4, kind: input, shape index: {}]   ;;  %s1281_s5 = inlined_call_operand.vmem [shape: f32[2,16,128], index: 5, kind: output, shape index: {}]  }
   0x1 LB: > { %s841_s19 = sadd.s32 4294967295, %s1037_s18   ;;  %p845_p0 = scmp.ge.s32.totalorder %s1037_s18, 1  ;;  %s1037_s18 = sphi %s1072_s18, %s15_s18  }
   0x2   : > { %p187_p1 = scmp.lt.s32.totalorder %s1037_s18, 3 }
   0x4   : > { %p188_p2 = pnand %p845_p0, %p187_p1 }
   0x5   : > { %p215_p3 = scmp.lt.s32.totalorder (!%p188_p2), %s841_s19, 1 }
   0x6   : > { %191 = sbr.rel (%p188_p2) target bundleno = 513 (0x201), region = 40 }
   0xb   : > { %v983_v0 = vld [vmem:[%s1277_s1 + $0x98] sm:$0xff]   ;;  %v1039_v1 = vmov 0   ;;  %v985_v3 = vld [vmem:[%s1277_s1 + $0x90] sm:$0xff]   ;;  %v987_v5 = vld [vmem:[%s1277_s1 + $0x88] sm:$0xff]   ;;  %s1283_s19 = smov (!%p215_p3, %s841_s19), 1  ;;  %vm372_vm0 = vcmask 523264  }
   0xc   : > { %376 = vmatprep.subr.bf16.mxu0 %v1039_v1  ;;  %498 = vmatprep.subr.bf16.mxu1 %v1039_v1  ;;  %v984_v2 = vld [vmem:[%s1277_s1 + $0x38] sm:$0xff]   ;;  %v986_v4 = vld [vmem:[%s1277_s1 + $0x30] sm:$0xff]   ;;  %v988_v6 = vld [vmem:[%s1277_s1 + $0x28] sm:$0xff]   ;;  %s971_s15 = smul.u32 24, %s1283_s19  ;;  %vm292_vm1 = vcmask 1045504   ;;  %v1040_v56 = vmov 0.0  }
   0xd   : > { %377 = vmatpush1.bf16.msra.mxu0 %v983_v0  ;;  %499 = vmatpush1.bf16.msra.mxu1 %v984_v2  ;;  %v989_v7 = vld [vmem:[%s1277_s1 + $0x80] sm:$0xff]   ;;  %v991_v9 = vld [vmem:[%s1277_s1 + $0x78] sm:$0xff]   ;;  %v993_v11 = vld [vmem:[%s1277_s1 + $0x70] sm:$0xff]   ;;  %vm1041_vm2 = vmmov 0   ;;  %s953_s12 = sshll.u32 %s1283_s19, 4 }
   0xe   : > { %378 = vmatprep.subr.bf16.mxu0 %v1039_v1  ;;  %500 = vmatprep.subr.bf16.mxu1 %v1039_v1  ;;  %v990_v8 = vld [vmem:[%s1277_s1 + $0x20] sm:$0xff]   ;;  %v992_v10 = vld [vmem:[%s1277_s1 + $0x18] sm:$0xff]   ;;  %v994_v12 = vld [vmem:[%s1277_s1 + $0x10] sm:$0xff]   ;;  %s1134_s24 = scalar_lea.vmem %s1276_s0, %s971_s15  ;;  %s224_s17 = scalar_lea.vmem %s1281_s5, %s953_s12 }
   0xf   : > { %v995_v13 = vld [vmem:[%s1277_s1 + $0x68] sm:$0xff]   ;;  %v252_v16 = vld [vmem:[%s1134_s24] sm:$0xcc]  ;;  %v253_v17 = vld [vmem:[%s1134_s24 + $0x10] sm:$0x33] }
  0x10   : > { %v996_v14 = vld [vmem:[%s1277_s1 + $0x8] sm:$0xff]   ;;  %v876_v19 = vcombine.high %v253_v17, %v253_v17  ;;  %v226_v20 = vld [vmem:[%s1134_s24] sm:$0xff]  ;;  %v999_v27 = vld [vmem:[%s1277_s1 + $0xb8] sm:$0xff]   ;;  %v875_v34 = vcombine.low %v253_v17, %v253_v17 }
  0x11   : > { %379 = vmatpush1.bf16.msra.mxu0 %v985_v3  ;;  %501 = vmatpush1.bf16.msra.mxu1 %v986_v4  ;;  %v1145_v15 = vld [vmem:[%s1134_s24 + $0x8] sm:$0xff]  ;;  %v997_v21 = vld [vmem:[%s1277_s1 + $0x60] sm:$0xff]   ;;  %v1000_v28 = vld [vmem:[%s1277_s1 + $0x58] sm:$0xff]  }
  0x12   : > { %380 = vmatprep.subr.bf16.mxu0 %v1039_v1  ;;  %502 = vmatprep.subr.bf16.mxu1 %v1039_v1  ;;  %v874_v18 = vcombine.high %v252_v16, %v1145_v15  ;;  %v891_v22 = vcombine.high %v226_v20, %v1145_v15  ;;  %v998_v23 = vld [vmem:[%s1277_s1] sm:$0xff]   ;;  %v297_v25 = vrot.slane %v876_v19, 2  ;;  %v1001_v29 = vld [vmem:[%s1277_s1 + $0xb0] sm:$0xff]   ;;  %v1003_v31 = vld [vmem:[%s1277_s1 + $0xa8] sm:$0xff]   ;;  %v873_v33 = vcombine.low %v252_v16, %v1145_v15 }
  0x13   : > { %v1002_v30 = vld [vmem:[%s1277_s1 + $0x50] sm:$0xff]   ;;  %v1004_v32 = vld [vmem:[%s1277_s1 + $0x48] sm:$0xff]   ;;  %v1005_v35 = vld [vmem:[%s1277_s1 + $0xa0] sm:$0xff]   ;;  %v294_v37 = vrot.slane %v875_v34, 2  ;;  %v890_v40 = vcombine.low %v226_v20, %v1145_v15 }
  0x14   : > { %v296_v24 = vrot.slane %v874_v18, 2  ;;  %904 = vmatprep.mubr.msk.bf16.mxu1 %vm372_vm0, %v891_v22  ;;  %v293_v36 = vrot.slane %v873_v33, 2  ;;  %v1006_v38 = vld [vmem:[%s1277_s1 + $0x40] sm:$0xff]   ;;  %v539_v39 = vld [vmem:[%s1134_s24 + $0x10] sm:$0xff]  ;;  %v1013_v42 = vld [vmem:[%s1277_s1 + $0xf8] sm:$0xff]  }
  0x15   : > { %381 = vmatpush1.bf16.msra.mxu0 %v987_v5  ;;  %503 = vmatpush1.bf16.msra.mxu1 %v988_v6  ;;  %v930_v43 = vcombine.high %v1145_v15, %v539_v39  ;;  %v1014_v44 = vld [vmem:[%s1277_s1 + $0xf0] sm:$0xff]   ;;  %v1015_v45 = vld [vmem:[%s1277_s1 + $0xe8] sm:$0xff]   ;;  %v1016_v46 = vld [vmem:[%s1277_s1 + $0xe0] sm:$0xff]   ;;  %v929_v55 = vcombine.low %v1145_v15, %v539_v39 }
  0x16   : > { %382 = vmatprep.subr.bf16.mxu0 %v1039_v1  ;;  %504 = vmatprep.subr.bf16.mxu1 %v1039_v1  ;;  %v298_v26 = vsel %vm292_vm1, %v296_v24, %v297_v25  ;;  %v295_v41 = vsel %vm292_vm1, %v293_v36, %v294_v37  ;;  %v1017_v47 = vld [vmem:[%s1277_s1 + $0xd8] sm:$0xff]   ;;  %v1018_v48 = vld [vmem:[%s1277_s1 + $0xd0] sm:$0xff]   ;;  %v1019_v49 = vld [vmem:[%s1277_s1 + $0xc8] sm:$0xff]  }
  0x17   : > { %889 = vmatprep.mubr.msk.bf16.mxu0 %vm372_vm0, %v298_v26  ;;  %v1020_v50 = vld [vmem:[%s1277_s1 + $0xc0] sm:$0xff]   ;;  %v1021_v51 = vld [vmem:[%s1277_s1 + $0x118] sm:$0xff]   ;;  %v1022_v52 = vld [vmem:[%s1277_s1 + $0x110] sm:$0xff]  }
  0x18   : > { %v1023_v53 = vld [vmem:[%s1277_s1 + $0x108] sm:$0xff]   ;;  %v1024_v54 = vld [vmem:[%s1277_s1 + $0x100] sm:$0xff]   ;;  %v1027_v57 = vld [vmem:[%s1279_s3 + $0x18] sm:$0xff]  }
  0x19   : > { %383 = vmatpush1.bf16.msra.mxu0 %v989_v7  ;;  %505 = vmatpush1.bf16.msra.mxu1 %v990_v8  ;;  %v1028_v58 = vld [vmem:[%s1279_s3 + $0x10] sm:$0xff]   ;;  %v1029_v59 = vld [vmem:[%s1279_s3 + $0x8] sm:$0xff]   ;;  %v1030_v60 = vld [vmem:[%s1279_s3] sm:$0xff]  }
  0x1a   : > { %384 = vmatprep.subr.bf16.mxu0 %v1039_v1  ;;  %506 = vmatprep.subr.bf16.mxu1 %v1039_v1  ;;  %v944_v8 = vld [vmem:[%s1278_s2] ss:$0 sm:$0xff] }
  0x1b   : > { %v945_v19 = vld [vmem:[%s1280_s4] ss:$0 sm:$0xff] }
  0x1d   : > { %385 = vmatpush1.bf16.msra.mxu0 %v991_v9  ;;  %507 = vmatpush1.bf16.msra.mxu1 %v992_v10 }
  0x1e   : > { %386 = vmatprep.subr.bf16.mxu0 %v1039_v1  ;;  %508 = vmatprep.subr.bf16.mxu1 %v1039_v1 }
  0x21   : > { %387 = vmatpush1.bf16.msra.mxu0 %v993_v11  ;;  %509 = vmatpush1.bf16.msra.mxu1 %v994_v12 }
  0x22   : > { %388 = vmatprep.subr.bf16.mxu0 %v1039_v1  ;;  %510 = vmatprep.subr.bf16.mxu1 %v1039_v1 }
  0x25   : > { %389 = vmatpush1.bf16.msra.mxu0 %v995_v13  ;;  %511 = vmatpush1.bf16.msra.mxu1 %v996_v14 }
  0x26   : > { %390 = vmatprep.subr.bf16.mxu0 %v1039_v1  ;;  %512 = vmatprep.subr.bf16.mxu1 %v1039_v1 }
  0x29   : > { %391 = vmatpush1.bf16.msra.mxu0 %v997_v21  ;;  %513 = vmatpush1.bf16.msra.mxu1 %v998_v23 }
  0x2a   : > { %400 = vmatprep.subr.bf16.mxu0 %v1039_v1  ;;  %522 = vmatprep.subr.bf16.mxu1 %v1039_v1 }
  0x2d   : > { %401 = vmatpush2.bf16.msra.mxu0 %v999_v27  ;;  %523 = vmatpush2.bf16.msra.mxu1 %v1000_v28 }
  0x2e   : > { %402 = vmatprep.subr.bf16.mxu0 %v1039_v1  ;;  %524 = vmatprep.subr.bf16.mxu1 %v1039_v1 }
  0x31   : > { %403 = vmatpush2.bf16.msra.mxu0 %v1001_v29  ;;  %525 = vmatpush2.bf16.msra.mxu1 %v1002_v30 }
  0x32   : > { %404 = vmatprep.subr.bf16.mxu0 %v1039_v1  ;;  %526 = vmatprep.subr.bf16.mxu1 %v1039_v1 }
  0x35   : > { %405 = vmatpush2.bf16.msra.mxu0 %v1003_v31  ;;  %527 = vmatpush2.bf16.msra.mxu1 %v1004_v32 }
  0x36   : > { %406 = vmatprep.subr.bf16.mxu0 %v1039_v1  ;;  %528 = vmatprep.subr.bf16.mxu1 %v1039_v1 }
  0x39   : > { %407 = vmatpush2.bf16.msra.mxu0 %v1005_v35  ;;  %529 = vmatpush2.bf16.msra.mxu1 %v1006_v38 }
  0x3a   : > { %646 = vmatprep.subr.bf16.mxu0 %v1039_v1  ;;  %959 = vmatprep.subr.bf16.mxu1 %v1040_v56 }
  0x3c   : > { %409 = vmatmul.mubr.bf16.vlgmr.msra.gmra.mxu0 %v295_v41  ;;  %531 = vmatmul.mubr.bf16.vlgmr.msra.gmra.mxu1 %v890_v40 }
  0x3d   : > { %647 = vmatpush1.bf16.msra.mxu0 %v1013_v42  ;;  %943 = vmatprep.mubr.msk.bf16.mxu0 %vm372_vm0, %v930_v43 }
  0x3e   : > { %648 = vmatprep.subr.bf16.mxu0 %v1039_v1  ;;  %960 = vmatpush3.bf16.msra.mxu1 %v1027_v57 }
  0x3f   : > { %961 = vmatprep.subr.bf16.mxu1 %v1040_v56  ;;  %967 = vmatprep.mubr.msk.bf16.mxu1 %vm1041_vm2, %v1040_v56 }
  0x41   : > { %649 = vmatpush1.bf16.msra.mxu0 %v1014_v44 }
  0x42   : > { %650 = vmatprep.subr.bf16.mxu0 %v1039_v1  ;;  %962 = vmatpush3.bf16.msra.mxu1 %v1028_v58 }
  0x43   : > { %963 = vmatprep.subr.bf16.mxu1 %v1040_v56 }
  0x45   : > { %651 = vmatpush1.bf16.msra.mxu0 %v1015_v45 }
  0x46   : > { %652 = vmatprep.subr.bf16.mxu0 %v1039_v1  ;;  %964 = vmatpush3.bf16.msra.mxu1 %v1029_v59 }
  0x47   : > { %965 = vmatprep.subr.bf16.mxu1 %v1040_v56 }
  0x49   : > { %653 = vmatpush1.bf16.msra.mxu0 %v1016_v46 }
  0x4a   : > { %654 = vmatprep.subr.bf16.mxu0 %v1039_v1  ;;  %966 = vmatpush3.bf16.msra.mxu1 %v1030_v60 }
  0x4d   : > { %655 = vmatpush1.bf16.msra.mxu0 %v1017_v47 }
  0x4e   : > { %656 = vmatprep.subr.bf16.mxu0 %v1039_v1 }
  0x51   : > { %657 = vmatpush1.bf16.msra.mxu0 %v1018_v48 }
  0x52   : > { %658 = vmatprep.subr.bf16.mxu0 %v1039_v1 }
  0x55   : > { %659 = vmatpush1.bf16.msra.mxu0 %v1019_v49 }
  0x56   : > { %660 = vmatprep.subr.bf16.mxu0 %v1039_v1 }
  0x59   : > { %661 = vmatpush1.bf16.msra.mxu0 %v1020_v50 }
  0x5a   : > { %670 = vmatprep.subr.bf16.mxu0 %v1039_v1 }
  0x5d   : > { %671 = vmatpush2.bf16.msra.mxu0 %v1021_v51 }
  0x5e   : > { %672 = vmatprep.subr.bf16.mxu0 %v1039_v1 }
  0x61   : > { %673 = vmatpush2.bf16.msra.mxu0 %v1022_v52 }
  0x62   : > { %674 = vmatprep.subr.bf16.mxu0 %v1039_v1 }
  0x65   : > { %675 = vmatpush2.bf16.msra.mxu0 %v1023_v53 }
  0x66   : > { %676 = vmatprep.subr.bf16.mxu0 %v1039_v1 }
  0x69   : > { %677 = vmatpush2.bf16.msra.mxu0 %v1024_v54 }
  0x6c   : > { %679 = vmatmul.mubr.bf16.vlgmr.msra.gmra.mxu0 %v929_v55 }
  0xfc   : > { %v410_v61 = vpop.f32.mrf.mxu0  ;;  %v532_v62 = vpop.f32.mrf.mxu1 }
  0xfd   : > { %v533_v5 = vadd.f32 %v532_v62, %v410_v61 }
  0xfe   : > { %v412_v63 = vpop.f32.mrf.mxu0  ;;  %v534_v0 = vpop.f32.mrf.mxu1 }
 0x100   : > { %v413_v1 = vpop.f32.mrf.mxu0  ;;  %v535_v2 = vpop.f32.mrf.mxu1 }
 0x101   : > { %v536_v10 = vadd.f32 %v535_v2, %v413_v1 }
 0x102   : > { %v415_v3 = vpop.f32.mrf.mxu0  ;;  %v537_v4 = vpop.f32.mrf.mxu1 }
 0x12c   : > { %v680_v6 = vpop.f32.mrf.mxu0 }
 0x12d   : > { %v687_v7 = vadd.f32 %v680_v6, %v533_v5 }
 0x12e   : > { %v682_v9 = vpop.f32.mrf.mxu0 }
 0x12f   : > { %v696_v12 = vadd.f32 %v944_v8, %v687_v7 }
 0x130   : > { %v683_v11 = vpop.f32.mrf.mxu0 }
 0x131   : > { %v688_v13 = vadd.f32 %v683_v11, %v536_v10  ;;  %v698_v16 = vmax.f32 %v696_v12, 0.0 }
 0x132   : > { %v685_v14 = vpop.f32.mrf.mxu0 }
 0x133   : > { %v697_v15 = vadd.f32 %v944_v8, %v688_v13 }
 0x135   : > { %v699_v17 = vmax.f32 %v697_v15, 0.0 }
 0x137   : > { %v700_v18 = vpack.c.bf16 %v699_v17, %v698_v16 }
 0x139   : > { %968 = vmatmul.mubr.msk.bf16.vlgmr.msra.gmra.mxu1 %vm372_vm0, %v700_v18 }
 0x1f9   : > { %v777_v20 = vpop.f32.mrf.mxu1 }
 0x1fa   : > { %v778_v21 = vadd.f32 %v945_v19, %v777_v20 }
 0x1fb   : > { %v969_v22 = vpop.f32.mrf.mxu1 }
 0x1fc   : > { %784 = vst [vmem:[%s224_s17] sm:$0xff] %v778_v21 }
 0x1fd   : > { %v780_v23 = vpop.f32.mrf.mxu1 }
 0x1fe   : > { %v781_v24 = vadd.f32 %v945_v19, %v780_v23 }
 0x1ff   : > { %v970_v25 = vpop.f32.mrf.mxu1 }
 0x200   : > { %785 = vst [vmem:[%s224_s17 + $0x8] sm:$0xff] %v781_v24 }
 0x201 PF: > { %s15_s18 = sadd.s32 1, %s1037_s18  }
 0x202   : > { %p12_p4 = scmp.ge.s32.totalorder %s15_s18, 4  }
 0x204   :  { %14 = sbr.rel (!%p12_p4) target bundleno = 1 (0x1), region = 72 }

</bundles_post_ra>
